<compile_context>
chip_gen: v7x
topology: tpu7x:2x2x1
jax: 0.10.0
libtpu: 0.0.40
codegen_flags: <defaults>
</compile_context>

<pallas_src>
import functools

import jax
import jax.numpy as jnp
from jax.experimental import pallas as pl
from jax.experimental.pallas import tpu as pltpu


def _round_up(x, m):
    return (x + m - 1) // m * m


def _choose_m_tiling(M, tm_max=256):
    """Pick (grid_m, tm) so tm is a multiple of 8, grid_m*tm >= M, low padding."""
    grid_m = pl.cdiv(M, tm_max)
    tm = _round_up(pl.cdiv(M, grid_m), 8)
    return grid_m, tm


def _vmem_limit(nbytes):
    # conservative 2x margin for double buffering / temporaries, capped so the
    # scoped limit is valid on v7x (64 MiB physical VMEM per TC).
    return min(48 * 1024 * 1024, max(2 * nbytes, 8 * 1024 * 1024))


# ----------------------------- Pallas kernels ------------------------------ #
def _matmul_bias_act_kernel(a_ref, w_ref, b_ref, o_ref, *, apply_relu):
    # a: (tm, Kp) bf16, w: (Kp, Np) bf16, b: (1, Np) f32  -> o: (tm, Np) f32
    acc = jnp.dot(a_ref[...], w_ref[...], preferred_element_type=jnp.float32)
    acc = acc + b_ref[...]
    if apply_relu:
        acc = jnp.maximum(acc, 0.0)
    o_ref[...] = acc.astype(o_ref.dtype)


def _fc_head_kernel(x_ref, w1_ref, b1_ref, w2_ref, b2_ref, o_ref):
    # fc1 (+ReLU) and fc2 fused; hidden stays on-chip.
    h = jnp.dot(x_ref[...], w1_ref[...], preferred_element_type=jnp.float32)
    h = jnp.maximum(h + b1_ref[...], 0.0)
    q = jnp.dot(h.astype(jnp.bfloat16), w2_ref[...],
                preferred_element_type=jnp.float32)
    o_ref[...] = (q + b2_ref[...]).astype(o_ref.dtype)


# ------------------------------ kernel wrappers ---------------------------- #
def matmul_bias_act(a, w_p, b_p, *, apply_relu, n_valid):
    """act(a @ W + b) with a fused, M-tiled Pallas kernel.

    a: [M, K] (any float dtype; cast to bf16 here).
    w_p: [Kp, Np] pre-padded bf16 weight, b_p: [1, Np] pre-padded f32 bias.
    Returns [M, n_valid] float32.
    """
    M, K = a.shape
    Kp, Np = w_p.shape
    grid_m, tm = _choose_m_tiling(M)
    Mp = grid_m * tm
    a_p = jnp.pad(a.astype(jnp.bfloat16), ((0, Mp - M), (0, Kp - K)))

    nbytes = 2 * (tm * Kp * 2) + 2 * (Kp * Np * 2) + 2 * (Np * 4) + 2 * (tm * Np * 4)

    out = pl.pallas_call(
        functools.partial(_matmul_bias_act_kernel, apply_relu=apply_relu),
        out_shape=jax.ShapeDtypeStruct((Mp, Np), jnp.float32),
        grid=(grid_m,),
        in_specs=[
            pl.BlockSpec((tm, Kp), lambda i: (i, 0)),   # activation tiles stream
            pl.BlockSpec((Kp, Np), lambda i: (0, 0)),   # weight pinned
            pl.BlockSpec((1, Np), lambda i: (0, 0)),    # bias pinned
        ],
        out_specs=pl.BlockSpec((tm, Np), lambda i: (i, 0)),
        compiler_params=pltpu.CompilerParams(
            dimension_semantics=("parallel",),
            vmem_limit_bytes=_vmem_limit(nbytes)),
    )(a_p, w_p, b_p)
    return out[:M, :n_valid]


def fc_head(x, w1_p, b1_p, w2_p, b2_p, *, action_dim):
    """Fused fc1(+ReLU)+fc2. x: [B, 3136] NHWC-flat. Returns [B, action_dim]."""
    M, K = x.shape
    K1p, N1p = w1_p.shape          # 3200, 512
    K2p, N2p = w2_p.shape          # 512, round_up(action_dim, 128)
    grid_m, tm = _choose_m_tiling(M)
    Mp = grid_m * tm
    x_p = jnp.pad(x.astype(jnp.bfloat16), ((0, Mp - M), (0, K1p - K)))

    nbytes = (2 * (tm * K1p * 2) + 2 * (K1p * N1p * 2) + 2 * (N1p * 4)
              + tm * N1p * 4                       # hidden activation
              + 2 * (K2p * N2p * 2) + 2 * (N2p * 4) + 2 * (tm * N2p * 4))

    out = pl.pallas_call(
        _fc_head_kernel,
        out_shape=jax.ShapeDtypeStruct((Mp, N2p), jnp.float32),
        grid=(grid_m,),
        in_specs=[
            pl.BlockSpec((tm, K1p), lambda i: (i, 0)),
            pl.BlockSpec((K1p, N1p), lambda i: (0, 0)),
            pl.BlockSpec((1, N1p), lambda i: (0, 0)),
            pl.BlockSpec((K2p, N2p), lambda i: (0, 0)),
            pl.BlockSpec((1, N2p), lambda i: (0, 0)),
        ],
        out_specs=pl.BlockSpec((tm, N2p), lambda i: (i, 0)),
        compiler_params=pltpu.CompilerParams(
            dimension_semantics=("parallel",),
            vmem_limit_bytes=_vmem_limit(nbytes)),
    )(x_p, w1_p, b1_p, w2_p, b2_p)
    return out[:M, :action_dim]


# ------------------------------ conv via im2col ---------------------------- #
def _im2col_nhwc(x, kh, kw, stride):
    """x: [B, H, W, C] NHWC -> ([B*OH*OW, KH*KW*C], OH, OW); col order (kh, kw, c)."""
    B, H, W, C = x.shape
    oh = (H - kh) // stride + 1
    ow = (W - kw) // stride + 1
    patches = []
    for i in range(kh):
        for j in range(kw):
            patches.append(
                x[:, i:i + stride * oh:stride, j:j + stride * ow:stride, :])
    patches = jnp.stack(patches, axis=3)          # [B, oh, ow, kh*kw, C]
    return patches.reshape(B * oh * ow, kh * kw * C), oh, ow


def conv2d_relu_nhwc(x, w_p, b_p, *, kh, kw, cout, stride):
    """x: [B, H, W, C] NHWC. w_p: pre-padded [Kp, Np] bf16 ((kh,kw,cin) rows).

    Returns NHWC [B, OH, OW, cout] float32 (no transposes)."""
    B = x.shape[0]
    cols, oh, ow = _im2col_nhwc(x, kh, kw, stride)
    y = matmul_bias_act(cols, w_p, b_p, apply_relu=True, n_valid=cout)
    return y.reshape(B, oh, ow, cout)


# ------------------------------ parameters -------------------------------- #
def init_params(key, action_dim):
    ks = jax.random.split(key, 10)

    def u(k, shape, fan_in):
        bound = 1.0 / jnp.sqrt(float(fan_in))
        return jax.random.uniform(k, shape, jnp.float32, -bound, bound)

    return {
        "conv1_w": u(ks[0], (32, 3, 8, 8), 3 * 8 * 8),
        "conv1_b": u(ks[1], (32,), 3 * 8 * 8),
        "conv2_w": u(ks[2], (64, 32, 4, 4), 32 * 4 * 4),
        "conv2_b": u(ks[3], (64,), 32 * 4 * 4),
        "conv3_w": u(ks[4], (64, 64, 3, 3), 64 * 3 * 3),
        "conv3_b": u(ks[5], (64,), 64 * 3 * 3),
        "fc1_w": u(ks[6], (512, 7 * 7 * 64), 7 * 7 * 64),
        "fc1_b": u(ks[7], (512,), 7 * 7 * 64),
        "fc2_w": u(ks[8], (action_dim, 512), 512),
        "fc2_b": u(ks[9], (action_dim,), 512),
    }


def prepare_params(params):
    """One-time transpose / permute / pad / bf16-cast of all weights."""
    def prep_w(w2d):                             # [K, N] f32 -> [Kp, Np] bf16
        K, N = w2d.shape
        Kp, Np = _round_up(K, 128), _round_up(N, 128)
        return jnp.pad(w2d.astype(jnp.bfloat16), ((0, Kp - K), (0, Np - N)))

    def prep_b(b):                               # [N] f32 -> [1, Np] f32
        N = b.shape[0]
        Np = _round_up(N, 128)
        return jnp.pad(b.astype(jnp.float32).reshape(1, N), ((0, 0), (0, Np - N)))

    p = {}
    for name in ("conv1", "conv2", "conv3"):
        w = params[name + "_w"]                  # OIHW [cout, cin, kh, kw]
        cout, cin, kh, kw = w.shape
        w2d = w.transpose(2, 3, 1, 0).reshape(kh * kw * cin, cout)  # (kh,kw,c) rows
        p[name + "_w"] = prep_w(w2d)
        p[name + "_b"] = prep_b(params[name + "_b"])

    # fc1: PyTorch flatten is NCHW (c,h,w); we flatten NHWC (h,w,c), so permute
    # fc1's columns once: [512, 64, 7, 7] -> [512, 7, 7, 64] -> [3136, 512].
    w1 = params["fc1_w"].reshape(512, 64, 7, 7).transpose(0, 2, 3, 1)
    w1 = w1.reshape(512, 7 * 7 * 64).T
    p["fc1_w"] = prep_w(w1)
    p["fc1_b"] = prep_b(params["fc1_b"])
    p["fc2_w"] = prep_w(params["fc2_w"].T)       # [512, action_dim]
    p["fc2_b"] = prep_b(params["fc2_b"])
    return p


# ------------------------------- forward ---------------------------------- #
def dqn_rgb_forward(prep, x, *, action_dim):
    """x: [B, 3, 84, 84] float32 NCHW (PyTorch convention). Returns [B, action_dim]."""
    B = x.shape[0]
    h = jnp.transpose(x, (0, 2, 3, 1))                                   # NHWC
    h = conv2d_relu_nhwc(h, prep["conv1_w"], prep["conv1_b"],
                         kh=8, kw=8, cout=32, stride=4)                  # [B,20,20,32]
    h = conv2d_relu_nhwc(h, prep["conv2_w"], prep["conv2_b"],
                         kh=4, kw=4, cout=64, stride=2)                  # [B,9,9,64]
    h = conv2d_relu_nhwc(h, prep["conv3_w"], prep["conv3_b"],
                         kh=3, kw=3, cout=64, stride=1)                  # [B,7,7,64]
    flat = h.reshape(B, 7 * 7 * 64)             # NHWC-flat; fc1_w columns permuted
    return fc_head(flat, prep["fc1_w"], prep["fc1_b"],
                   prep["fc2_w"], prep["fc2_b"], action_dim=action_dim)


def _reference_forward(params, x):
    """Pure-JAX f32 reference (no Pallas) for a sanity check."""
    def conv(x, w, b, s):
        y = jax.lax.conv_general_dilated(
            x, w, window_strides=(s, s), padding="VALID",
            dimension_numbers=("NCHW", "OIHW", "NCHW"))
        return jax.nn.relu(y + b[None, :, None, None])

    h = conv(x, params["conv1_w"], params["conv1_b"], 4)
    h = conv(h, params["conv2_w"], params["conv2_b"], 2)
    h = conv(h, params["conv3_w"], params["conv3_b"], 1)
    flat = h.reshape(x.shape[0], -1)
    h = jax.nn.relu(flat @ params["fc1_w"].T + params["fc1_b"])
    return h @ params["fc2_w"].T + params["fc2_b"]


if __name__ == "__main__":
    key = jax.random.PRNGKey(0)
    pkey, xkey = jax.random.split(key)
    action_dim = 2
    params = init_params(pkey, action_dim)
    prep = prepare_params(params)     # one-time weight transpose/permute/pad/bf16

    # fc1 hard-codes 7*7*64 features => 84x84 RGB frames.  Batch = 2.
    x = jax.random.normal(xkey, (2, 3, 84, 84), jnp.float32)

    fwd = jax.jit(functools.partial(dqn_rgb_forward, action_dim=action_dim))
    q = fwd(prep, x)
    jax.block_until_ready(q)

    q_ref = _reference_forward(params, x)
    assert q.shape == (2, action_dim)
    # bf16 MXU compute with f32 accumulation; comfortably within 2e-2.
    assert jnp.allclose(q, q_ref, rtol=2e-2, atol=2e-2), (
        f"max abs err {jnp.max(jnp.abs(q - q_ref))}")

    print("KERNEL_OK")
</pallas_src>

<mosaic_0001>
module attributes {stable_mosaic.version = 11 : i64} {
  func.func @_matmul_bias_act_kernel(%arg0: i32, %arg1: memref<200x256xbf16, #tpu.memory_space<vmem>>, %arg2: memref<256x128xbf16, #tpu.memory_space<vmem>>, %arg3: memref<1x128xf32, #tpu.memory_space<vmem>>, %arg4: memref<200x128xf32, #tpu.memory_space<vmem>>) attributes {dimension_semantics = [#tpu.dimension_semantics<parallel>], iteration_bounds = array<i64: 4>, scalar_prefetch = 0 : i64, scratch_operands = 0 : i64, tpu.core_type = #tpu.core_type<tc>, window_params = [{transform_indices = @transform_0, window_bounds = array<i64: 200, 256>}, {pipeline_mode = #tpu.pipeline_mode<synchronous>, transform_indices = @transform_1, window_bounds = array<i64: 256, 128>}, {pipeline_mode = #tpu.pipeline_mode<synchronous>, transform_indices = @transform_2, window_bounds = array<i64: 1, 128>}, {transform_indices = @transform_3, window_bounds = array<i64: 200, 128>}]} {
    %c0 = arith.constant 0 : index
    %c0_0 = arith.constant 0 : index
    %0 = vector.load %arg1[%c0, %c0_0] : memref<200x256xbf16, #tpu.memory_space<vmem>>, vector<200x256xbf16>
    %c0_1 = arith.constant 0 : index
    %c0_2 = arith.constant 0 : index
    %1 = vector.load %arg2[%c0_1, %c0_2] : memref<256x128xbf16, #tpu.memory_space<vmem>>, vector<256x128xbf16>
    %cst = arith.constant dense<0.000000e+00> : vector<200x128xf32>
    %2 = tpu.matmul %0, %1, %cst {dimension_numbers = #tpu.dot_dimension_numbers<[1], [0], [0], [1], [0, 0, 1, 1], [], []>} : vector<200x256xbf16>, vector<256x128xbf16>, vector<200x128xf32> -> vector<200x128xf32>
    %c0_3 = arith.constant 0 : index
    %c0_4 = arith.constant 0 : index
    %3 = vector.load %arg3[%c0_3, %c0_4] : memref<1x128xf32, #tpu.memory_space<vmem>>, vector<1x128xf32>
    %4 = vector.broadcast %3 : vector<1x128xf32> to vector<200x128xf32>
    %5 = arith.addf %2, %4 : vector<200x128xf32>
    %cst_5 = arith.constant 0.000000e+00 : f32
    %6 = vector.broadcast %cst_5 : f32 to vector<200x128xf32>
    %7 = arith.maximumf %5, %6 : vector<200x128xf32>
    %c0_6 = arith.constant 0 : index
    %c0_7 = arith.constant 0 : index
    %8 = vector.load %arg4[%c0_6, %c0_7] : memref<200x128xf32, #tpu.memory_space<vmem>>, vector<200x128xf32>
    tpu.vector_store %arg4[%c0_6, %c0_7], %7 {strides = array<i32>} : memref<200x128xf32, #tpu.memory_space<vmem>>, vector<200x128xf32>,
    return
  }
  func.func @transform_0(%arg0: i32) -> (i32, i32) {
    %c0_i32 = arith.constant 0 : i32
    %c0_i32_0 = arith.constant 0 : i32
    return %arg0, %c0_i32 : i32, i32
  }
  func.func @transform_1(%arg0: i32) -> (i32, i32) {
    %c0_i32 = arith.constant 0 : i32
    %c0_i32_0 = arith.constant 0 : i32
    %c0_i32_1 = arith.constant 0 : i32
    return %c0_i32, %c0_i32_0 : i32, i32
  }
  func.func @transform_2(%arg0: i32) -> (i32, i32) {
    %c0_i32 = arith.constant 0 : i32
    %c0_i32_0 = arith.constant 0 : i32
    %c0_i32_1 = arith.constant 0 : i32
    return %c0_i32, %c0_i32_0 : i32, i32
  }
  func.func @transform_3(%arg0: i32) -> (i32, i32) {
    %c0_i32 = arith.constant 0 : i32
    %c0_i32_0 = arith.constant 0 : i32
    return %arg0, %c0_i32 : i32, i32
  }
}

module attributes {stable_mosaic.version = 11 : i64} {
  func.func @_matmul_bias_act_kernel(%arg0: i32, %arg1: memref<168x512xbf16, #tpu.memory_space<vmem>>, %arg2: memref<512x128xbf16, #tpu.memory_space<vmem>>, %arg3: memref<1x128xf32, #tpu.memory_space<vmem>>, %arg4: memref<168x128xf32, #tpu.memory_space<vmem>>) attributes {dimension_semantics = [#tpu.dimension_semantics<parallel>], iteration_bounds = array<i64: 1>, scalar_prefetch = 0 : i64, scratch_operands = 0 : i64, tpu.core_type = #tpu.core_type<tc>, window_params = [{transform_indices = @transform_0, window_bounds = array<i64: 168, 512>}, {pipeline_mode = #tpu.pipeline_mode<synchronous>, transform_indices = @transform_1, window_bounds = array<i64: 512, 128>}, {pipeline_mode = #tpu.pipeline_mode<synchronous>, transform_indices = @transform_2, window_bounds = array<i64: 1, 128>}, {transform_indices = @transform_3, window_bounds = array<i64: 168, 128>}]} {
    %c0 = arith.constant 0 : index
    %c0_0 = arith.constant 0 : index
    %0 = vector.load %arg1[%c0, %c0_0] : memref<168x512xbf16, #tpu.memory_space<vmem>>, vector<168x512xbf16>
    %c0_1 = arith.constant 0 : index
    %c0_2 = arith.constant 0 : index
    %1 = vector.load %arg2[%c0_1, %c0_2] : memref<512x128xbf16, #tpu.memory_space<vmem>>, vector<512x128xbf16>
    %cst = arith.constant dense<0.000000e+00> : vector<168x128xf32>
    %2 = tpu.matmul %0, %1, %cst {dimension_numbers = #tpu.dot_dimension_numbers<[1], [0], [0], [1], [0, 0, 1, 1], [], []>} : vector<168x512xbf16>, vector<512x128xbf16>, vector<168x128xf32> -> vector<168x128xf32>
    %c0_3 = arith.constant 0 : index
    %c0_4 = arith.constant 0 : index
    %3 = vector.load %arg3[%c0_3, %c0_4] : memref<1x128xf32, #tpu.memory_space<vmem>>, vector<1x128xf32>
    %4 = vector.broadcast %3 : vector<1x128xf32> to vector<168x128xf32>
    %5 = arith.addf %2, %4 : vector<168x128xf32>
    %cst_5 = arith.constant 0.000000e+00 : f32
    %6 = vector.broadcast %cst_5 : f32 to vector<168x128xf32>
    %7 = arith.maximumf %5, %6 : vector<168x128xf32>
    %c0_6 = arith.constant 0 : index
    %c0_7 = arith.constant 0 : index
    %8 = vector.load %arg4[%c0_6, %c0_7] : memref<168x128xf32, #tpu.memory_space<vmem>>, vector<168x128xf32>
    tpu.vector_store %arg4[%c0_6, %c0_7], %7 {strides = array<i32>} : memref<168x128xf32, #tpu.memory_space<vmem>>, vector<168x128xf32>,
    return
  }
  func.func @transform_0(%arg0: i32) -> (i32, i32) {
    %c0_i32 = arith.constant 0 : i32
    %c0_i32_0 = arith.constant 0 : i32
    return %arg0, %c0_i32 : i32, i32
  }
  func.func @transform_1(%arg0: i32) -> (i32, i32) {
    %c0_i32 = arith.constant 0 : i32
    %c0_i32_0 = arith.constant 0 : i32
    %c0_i32_1 = arith.constant 0 : i32
    return %c0_i32, %c0_i32_0 : i32, i32
  }
  func.func @transform_2(%arg0: i32) -> (i32, i32) {
    %c0_i32 = arith.constant 0 : i32
    %c0_i32_0 = arith.constant 0 : i32
    %c0_i32_1 = arith.constant 0 : i32
    return %c0_i32, %c0_i32_0 : i32, i32
  }
  func.func @transform_3(%arg0: i32) -> (i32, i32) {
    %c0_i32 = arith.constant 0 : i32
    %c0_i32_0 = arith.constant 0 : i32
    return %arg0, %c0_i32 : i32, i32
  }
}

module attributes {stable_mosaic.version = 11 : i64} {
  func.func @_matmul_bias_act_kernel(%arg0: i32, %arg1: memref<104x640xbf16, #tpu.memory_space<vmem>>, %arg2: memref<640x128xbf16, #tpu.memory_space<vmem>>, %arg3: memref<1x128xf32, #tpu.memory_space<vmem>>, %arg4: memref<104x128xf32, #tpu.memory_space<vmem>>) attributes {dimension_semantics = [#tpu.dimension_semantics<parallel>], iteration_bounds = array<i64: 1>, scalar_prefetch = 0 : i64, scratch_operands = 0 : i64, tpu.core_type = #tpu.core_type<tc>, window_params = [{transform_indices = @transform_0, window_bounds = array<i64: 104, 640>}, {pipeline_mode = #tpu.pipeline_mode<synchronous>, transform_indices = @transform_1, window_bounds = array<i64: 640, 128>}, {pipeline_mode = #tpu.pipeline_mode<synchronous>, transform_indices = @transform_2, window_bounds = array<i64: 1, 128>}, {transform_indices = @transform_3, window_bounds = array<i64: 104, 128>}]} {
    %c0 = arith.constant 0 : index
    %c0_0 = arith.constant 0 : index
    %0 = vector.load %arg1[%c0, %c0_0] : memref<104x640xbf16, #tpu.memory_space<vmem>>, vector<104x640xbf16>
    %c0_1 = arith.constant 0 : index
    %c0_2 = arith.constant 0 : index
    %1 = vector.load %arg2[%c0_1, %c0_2] : memref<640x128xbf16, #tpu.memory_space<vmem>>, vector<640x128xbf16>
    %cst = arith.constant dense<0.000000e+00> : vector<104x128xf32>
    %2 = tpu.matmul %0, %1, %cst {dimension_numbers = #tpu.dot_dimension_numbers<[1], [0], [0], [1], [0, 0, 1, 1], [], []>} : vector<104x640xbf16>, vector<640x128xbf16>, vector<104x128xf32> -> vector<104x128xf32>
    %c0_3 = arith.constant 0 : index
    %c0_4 = arith.constant 0 : index
    %3 = vector.load %arg3[%c0_3, %c0_4] : memref<1x128xf32, #tpu.memory_space<vmem>>, vector<1x128xf32>
    %4 = vector.broadcast %3 : vector<1x128xf32> to vector<104x128xf32>
    %5 = arith.addf %2, %4 : vector<104x128xf32>
    %cst_5 = arith.constant 0.000000e+00 : f32
    %6 = vector.broadcast %cst_5 : f32 to vector<104x128xf32>
    %7 = arith.maximumf %5, %6 : vector<104x128xf32>
    %c0_6 = arith.constant 0 : index
    %c0_7 = arith.constant 0 : index
    %8 = vector.load %arg4[%c0_6, %c0_7] : memref<104x128xf32, #tpu.memory_space<vmem>>, vector<104x128xf32>
    tpu.vector_store %arg4[%c0_6, %c0_7], %7 {strides = array<i32>} : memref<104x128xf32, #tpu.memory_space<vmem>>, vector<104x128xf32>,
    return
  }
  func.func @transform_0(%arg0: i32) -> (i32, i32) {
    %c0_i32 = arith.constant 0 : i32
    %c0_i32_0 = arith.constant 0 : i32
    return %arg0, %c0_i32 : i32, i32
  }
  func.func @transform_1(%arg0: i32) -> (i32, i32) {
    %c0_i32 = arith.constant 0 : i32
    %c0_i32_0 = arith.constant 0 : i32
    %c0_i32_1 = arith.constant 0 : i32
    return %c0_i32, %c0_i32_0 : i32, i32
  }
  func.func @transform_2(%arg0: i32) -> (i32, i32) {
    %c0_i32 = arith.constant 0 : i32
    %c0_i32_0 = arith.constant 0 : i32
    %c0_i32_1 = arith.constant 0 : i32
    return %c0_i32, %c0_i32_0 : i32, i32
  }
  func.func @transform_3(%arg0: i32) -> (i32, i32) {
    %c0_i32 = arith.constant 0 : i32
    %c0_i32_0 = arith.constant 0 : i32
    return %arg0, %c0_i32 : i32, i32
  }
}

module attributes {stable_mosaic.version = 11 : i64} {
  func.func @_fc_head_kernel(%arg0: i32, %arg1: memref<8x3200xbf16, #tpu.memory_space<vmem>>, %arg2: memref<3200x512xbf16, #tpu.memory_space<vmem>>, %arg3: memref<1x512xf32, #tpu.memory_space<vmem>>, %arg4: memref<512x128xbf16, #tpu.memory_space<vmem>>, %arg5: memref<1x128xf32, #tpu.memory_space<vmem>>, %arg6: memref<8x128xf32, #tpu.memory_space<vmem>>) attributes {dimension_semantics = [#tpu.dimension_semantics<parallel>], iteration_bounds = array<i64: 1>, scalar_prefetch = 0 : i64, scratch_operands = 0 : i64, tpu.core_type = #tpu.core_type<tc>, window_params = [{transform_indices = @transform_0, window_bounds = array<i64: 8, 3200>}, {pipeline_mode = #tpu.pipeline_mode<synchronous>, transform_indices = @transform_1, window_bounds = array<i64: 3200, 512>}, {pipeline_mode = #tpu.pipeline_mode<synchronous>, transform_indices = @transform_2, window_bounds = array<i64: 1, 512>}, {pipeline_mode = #tpu.pipeline_mode<synchronous>, transform_indices = @transform_3, window_bounds = array<i64: 512, 128>}, {pipeline_mode = #tpu.pipeline_mode<synchronous>, transform_indices = @transform_4, window_bounds = array<i64: 1, 128>}, {transform_indices = @transform_5, window_bounds = array<i64: 8, 128>}]} {
    %c0 = arith.constant 0 : index
    %c0_0 = arith.constant 0 : index
    %0 = vector.load %arg1[%c0, %c0_0] : memref<8x3200xbf16, #tpu.memory_space<vmem>>, vector<8x3200xbf16>
    %c0_1 = arith.constant 0 : index
    %c0_2 = arith.constant 0 : index
    %1 = vector.load %arg2[%c0_1, %c0_2] : memref<3200x512xbf16, #tpu.memory_space<vmem>>, vector<3200x512xbf16>
    %cst = arith.constant dense<0.000000e+00> : vector<8x512xf32>
    %2 = tpu.matmul %0, %1, %cst {dimension_numbers = #tpu.dot_dimension_numbers<[1], [0], [0], [1], [0, 0, 1, 1], [], []>} : vector<8x3200xbf16>, vector<3200x512xbf16>, vector<8x512xf32> -> vector<8x512xf32>
    %c0_3 = arith.constant 0 : index
    %c0_4 = arith.constant 0 : index
    %3 = vector.load %arg3[%c0_3, %c0_4] : memref<1x512xf32, #tpu.memory_space<vmem>>, vector<1x512xf32>
    %4 = vector.broadcast %3 : vector<1x512xf32> to vector<8x512xf32>
    %5 = arith.addf %2, %4 : vector<8x512xf32>
    %cst_5 = arith.constant 0.000000e+00 : f32
    %6 = vector.broadcast %cst_5 : f32 to vector<8x512xf32>
    %7 = arith.maximumf %5, %6 : vector<8x512xf32>
    %8 = arith.truncf %7 : vector<8x512xf32> to vector<8x512xbf16>
    %c0_6 = arith.constant 0 : index
    %c0_7 = arith.constant 0 : index
    %9 = vector.load %arg4[%c0_6, %c0_7] : memref<512x128xbf16, #tpu.memory_space<vmem>>, vector<512x128xbf16>
    %cst_8 = arith.constant dense<0.000000e+00> : vector<8x128xf32>
    %10 = tpu.matmul %8, %9, %cst_8 {dimension_numbers = #tpu.dot_dimension_numbers<[1], [0], [0], [1], [0, 0, 1, 1], [], []>} : vector<8x512xbf16>, vector<512x128xbf16>, vector<8x128xf32> -> vector<8x128xf32>
    %c0_9 = arith.constant 0 : index
    %c0_10 = arith.constant 0 : index
    %11 = vector.load %arg5[%c0_9, %c0_10] : memref<1x128xf32, #tpu.memory_space<vmem>>, vector<1x128xf32>
    %12 = vector.broadcast %11 : vector<1x128xf32> to vector<8x128xf32>
    %13 = arith.addf %10, %12 : vector<8x128xf32>
    %c0_11 = arith.constant 0 : index
    %c0_12 = arith.constant 0 : index
    %14 = vector.load %arg6[%c0_11, %c0_12] : memref<8x128xf32, #tpu.memory_space<vmem>>, vector<8x128xf32>
    tpu.vector_store %arg6[%c0_11, %c0_12], %13 {strides = array<i32>} : memref<8x128xf32, #tpu.memory_space<vmem>>, vector<8x128xf32>,
    return
  }
  func.func @transform_0(%arg0: i32) -> (i32, i32) {
    %c0_i32 = arith.constant 0 : i32
    %c0_i32_0 = arith.constant 0 : i32
    return %arg0, %c0_i32 : i32, i32
  }
  func.func @transform_1(%arg0: i32) -> (i32, i32) {
    %c0_i32 = arith.constant 0 : i32
    %c0_i32_0 = arith.constant 0 : i32
    %c0_i32_1 = arith.constant 0 : i32
    return %c0_i32, %c0_i32_0 : i32, i32
  }
  func.func @transform_2(%arg0: i32) -> (i32, i32) {
    %c0_i32 = arith.constant 0 : i32
    %c0_i32_0 = arith.constant 0 : i32
    %c0_i32_1 = arith.constant 0 : i32
    return %c0_i32, %c0_i32_0 : i32, i32
  }
  func.func @transform_3(%arg0: i32) -> (i32, i32) {
    %c0_i32 = arith.constant 0 : i32
    %c0_i32_0 = arith.constant 0 : i32
    %c0_i32_1 = arith.constant 0 : i32
    return %c0_i32, %c0_i32_0 : i32, i32
  }
  func.func @transform_4(%arg0: i32) -> (i32, i32) {
    %c0_i32 = arith.constant 0 : i32
    %c0_i32_0 = arith.constant 0 : i32
    %c0_i32_1 = arith.constant 0 : i32
    return %c0_i32, %c0_i32_0 : i32, i32
  }
  func.func @transform_5(%arg0: i32) -> (i32, i32) {
    %c0_i32 = arith.constant 0 : i32
    %c0_i32_0 = arith.constant 0 : i32
    return %arg0, %c0_i32 : i32, i32
  }
}

</mosaic_0001>

<bundles_post_ra>
// kernel: dqn_rgb_forward.4
= control target key start
LH: loop header
LB: loop body
LE: loop exit
PB: predicated region body
PF: predicated region fallthrough
CT: control target
= control target key end

     0   :  { %s961_s12 = smov 0   ;;  %s1117_s0 = inlined_call_operand.vmem [shape: bf16[800,256], index: 0, kind: input, shape index: {}]   ;;  %s1118_s1 = inlined_call_operand.vmem [shape: bf16[256,128], index: 1, kind: input, shape index: {}]   ;;  %s1119_s2 = inlined_call_operand.vmem [shape: f32[1,128], index: 2, kind: input, shape index: {}]   ;;  %s1120_s3 = inlined_call_operand.vmem [shape: f32[800,128], index: 3, kind: output, shape index: {}]  }
   0x1 LB: > { %s707_s13 = sadd.s32 4294967295, %s939_s12   ;;  %p711_p0 = scmp.ge.s32.totalorder %s939_s12, 1  ;;  %s939_s12 = sphi %s961_s12, %s13_s12  }
   0x2   : > { %p139_p1 = scmp.lt.s32.totalorder %s939_s12, 5 }
   0x4   : > { %p140_p2 = pnand %p711_p0, %p139_p1 }
   0x5   : > { %v879_v0 = vld [vmem:[%s1118_s1 + $0x40] sm:$0xff] (!%p140_p2)   ;;  %s164_s16 = smul.u32 (!%p140_p2), 25, %s707_s13  ;;  %v881_v2 = vld [vmem:[%s1118_s1 + $0x48] sm:$0xff] (!%p140_p2)   ;;  %v883_v4 = vld [vmem:[%s1118_s1 + $0x50] sm:$0xff] (!%p140_p2)  }
   0x6   : > { %143 = sbr.rel (%p140_p2) target bundleno = 308 (0x134), region = 32  ;;  %v880_v1 = vld [vmem:[%s1118_s1] sm:$0xff] (!%p140_p2)   ;;  %761 = vmatprep.subr.bf16.mxu0 (!%p140_p2), %v879_v0  ;;  %855 = vmatprep.subr.bf16.mxu1 (!%p140_p2), %v879_v0  ;;  %v882_v3 = vld [vmem:[%s1118_s1 + $0x8] sm:$0xff] (!%p140_p2)   ;;  %v884_v5 = vld [vmem:[%s1118_s1 + $0x10] sm:$0xff] (!%p140_p2)  }
   0x7   : > { %762 = vmatpush3.bf16.msra.mxu0 (!%p140_p2), %v880_v1  ;;  %863 = vmatpush3.bf16.msra.mxu1 (!%p140_p2), %v880_v1  ;;  %p165_p3 = scmp.lt.s32.totalorder (!%p140_p2), %s164_s16, 99  ;;  %v885_v6 = vld [vmem:[%s1118_s1 + $0x58] sm:$0xff] (!%p140_p2)   ;;  %v887_v8 = vld [vmem:[%s1118_s1 + $0x60] sm:$0xff] (!%p140_p2)   ;;  %v889_v10 = vld [vmem:[%s1118_s1 + $0x68] sm:$0xff] (!%p140_p2)  }
   0x8   : > { %763 = vmatprep.subr.bf16.mxu0 (!%p140_p2), %v881_v2  ;;  %856 = vmatprep.subr.bf16.mxu1 (!%p140_p2), %v881_v2  ;;  %v886_v7 = vld [vmem:[%s1118_s1 + $0x18] sm:$0xff] (!%p140_p2)   ;;  %v888_v9 = vld [vmem:[%s1118_s1 + $0x20] sm:$0xff] (!%p140_p2)   ;;  %v890_v13 = vld [vmem:[%s1118_s1 + $0x28] sm:$0xff] (!%p140_p2)  }
   0x9   : > { %v891_v14 = vld [vmem:[%s1118_s1 + $0x70] sm:$0xff] (!%p140_p2)   ;;  %v893_v16 = vld [vmem:[%s1118_s1 + $0x78] sm:$0xff] (!%p140_p2)   ;;  %v1055_v45 = vld [vmem:[%s1119_s2] ss:$0 sm:$0xff] (!%p140_p2) }
   0xa   : > { %v892_v15 = vld [vmem:[%s1118_s1 + $0x30] sm:$0xff] (!%p140_p2)   ;;  %v894_v17 = vld [vmem:[%s1118_s1 + $0x38] sm:$0xff] (!%p140_p2)  }
   0xb   : > { %764 = vmatpush3.bf16.msra.mxu0 (!%p140_p2), %v882_v3  ;;  %864 = vmatpush3.bf16.msra.mxu1 (!%p140_p2), %v882_v3 }
   0xc   : > { %765 = vmatprep.subr.bf16.mxu0 (!%p140_p2), %v883_v4  ;;  %857 = vmatprep.subr.bf16.mxu1 (!%p140_p2), %v883_v4 }
   0xd   : > { %s1122_s16 = smov (!%p165_p3, %s164_s16), 99 }
   0xe   : > { %s760_s4 = sshll.u32 %s1122_s16, 3 }
   0xf   : > { %766 = vmatpush3.bf16.msra.mxu0 %v884_v5  ;;  %865 = vmatpush3.bf16.msra.mxu1 %v884_v5  ;;  %s1004_s9 = scalar_lea.vmem %s1117_s0, %s760_s4  ;;  %s1064_s30 = scalar_lea.vmem %s1120_s3, %s760_s4 }
  0x10   : > { %767 = vmatprep.subr.bf16.mxu0 %v885_v6  ;;  %858 = vmatprep.subr.bf16.mxu1 %v885_v6  ;;  %v897_v11 = vld [vmem:[%s1004_s9 + $0x4] ss:$8 sps:$4 sm:$0xff]   ;;  %v900_v12 = vld [vmem:[%s1004_s9 + $0x74] ss:$8 sps:$4 sm:$0xff]   ;;  %v895_v18 = vld [vmem:[%s1004_s9] ss:$8 sps:$4 sm:$0xff]  }
  0x11   : > { %497 = vmatprep.mubr.bf16.mxu0 %v897_v11  ;;  %553 = vmatprep.mubr.bf16.mxu1 %v900_v12  ;;  %v898_v19 = vld [vmem:[%s1004_s9 + $0x70] ss:$8 sps:$4 sm:$0xff]   ;;  %v901_v20 = vld [vmem:[%s1004_s9 + $0x14] ss:$8 sps:$4 sm:$0xff]   ;;  %v904_v21 = vld [vmem:[%s1004_s9 + $0x84] ss:$8 sps:$4 sm:$0xff]  }
  0x12   : > { %v903_v22 = vld [vmem:[%s1004_s9 + $0x10] ss:$8 sps:$4 sm:$0xff]   ;;  %v908_v23 = vld [vmem:[%s1004_s9 + $0x80] ss:$8 sps:$4 sm:$0xff]   ;;  %v906_v24 = vld [vmem:[%s1004_s9 + $0x24] ss:$8 sps:$4 sm:$0xff]  }
  0x13   : > { %768 = vmatpush3.bf16.msra.mxu0 %v886_v7  ;;  %866 = vmatpush3.bf16.msra.mxu1 %v886_v7  ;;  %v910_v25 = vld [vmem:[%s1004_s9 + $0x94] ss:$8 sps:$4 sm:$0xff]   ;;  %v909_v26 = vld [vmem:[%s1004_s9 + $0x20] ss:$8 sps:$4 sm:$0xff]   ;;  %v914_v27 = vld [vmem:[%s1004_s9 + $0x90] ss:$8 sps:$4 sm:$0xff]  }
  0x14   : > { %769 = vmatprep.subr.bf16.mxu0 %v887_v8  ;;  %859 = vmatprep.subr.bf16.mxu1 %v887_v8  ;;  %v912_v28 = vld [vmem:[%s1004_s9 + $0x34] ss:$8 sps:$4 sm:$0xff]   ;;  %v916_v29 = vld [vmem:[%s1004_s9 + $0xa4] ss:$8 sps:$4 sm:$0xff]   ;;  %v915_v30 = vld [vmem:[%s1004_s9 + $0x30] ss:$8 sps:$4 sm:$0xff]  }
  0x15   : > { %v920_v31 = vld [vmem:[%s1004_s9 + $0xa0] ss:$8 sps:$4 sm:$0xff]   ;;  %v918_v32 = vld [vmem:[%s1004_s9 + $0x44] ss:$8 sps:$4 sm:$0xff]   ;;  %v922_v33 = vld [vmem:[%s1004_s9 + $0xb4] ss:$8 sps:$4 sm:$0xff]  }
  0x16   : > { %v202_v34 = vld [vmem:[%s1004_s9 + $0xc0] sm:$0xff]  ;;  %v926_v36 = vld [vmem:[%s1004_s9 + $0xb0] ss:$8 sps:$4 sm:$0xff]   ;;  %v924_v37 = vld [vmem:[%s1004_s9 + $0x54] ss:$8 sps:$4 sm:$0xff]  }
  0x17   : > { %770 = vmatpush3.bf16.msra.mxu0 %v888_v9  ;;  %867 = vmatpush3.bf16.msra.mxu1 %v888_v9  ;;  %v921_v35 = vld [vmem:[%s1004_s9 + $0x40] ss:$8 sps:$4 sm:$0xff]   ;;  %v741_v38 = vcombine.high %v202_v34, %v202_v34  ;;  %v927_v39 = vld [vmem:[%s1004_s9 + $0x50] ss:$8 sps:$4 sm:$0xff]   ;;  %v740_v40 = vcombine.low %v202_v34, %v202_v34  ;;  %v929_v41 = vld [vmem:[%s1004_s9 + $0x64] ss:$8 sps:$4 sm:$0xff]  }
  0x18   : > { %771 = vmatprep.subr.bf16.mxu0 %v889_v10  ;;  %860 = vmatprep.subr.bf16.mxu1 %v889_v10  ;;  %v932_v42 = vld [vmem:[%s1004_s9 + $0x60] ss:$8 sps:$4 sm:$0xff]  }
  0x1b   : > { %772 = vmatpush3.bf16.msra.mxu0 %v890_v13  ;;  %868 = vmatpush3.bf16.msra.mxu1 %v890_v13 }
  0x1c   : > { %773 = vmatprep.subr.bf16.mxu0 %v891_v14  ;;  %861 = vmatprep.subr.bf16.mxu1 %v891_v14 }
  0x1f   : > { %774 = vmatpush3.bf16.msra.mxu0 %v892_v15  ;;  %869 = vmatpush3.bf16.msra.mxu1 %v892_v15 }
  0x20   : > { %775 = vmatprep.subr.bf16.mxu0 %v893_v16  ;;  %862 = vmatprep.subr.bf16.mxu1 %v893_v16 }
  0x23   : > { %776 = vmatpush3.bf16.msra.mxu0 %v894_v17  ;;  %870 = vmatpush3.bf16.msra.mxu1 %v894_v17 }
  0x26   : > { %498 = vmatmul.mubr.bf16.vlgmr.msra.gmra.mrb[0].mxu0 %v895_v18  ;;  %554 = vmatmul.mubr.bf16.vlgmr.msra.gmra.mrb[0].mxu1 %v898_v19 }
  0x27   : > { %505 = vmatprep.mubr.bf16.mxu0 %v901_v20  ;;  %561 = vmatprep.mubr.bf16.mxu1 %v904_v21 }
  0x2e   : > { %506 = vmatmul.mubr.bf16.gmra.mrb[4].mxu0 %v903_v22  ;;  %562 = vmatmul.mubr.bf16.gmra.mrb[4].mxu1 %v908_v23 }
  0x2f   : > { %513 = vmatprep.mubr.bf16.mxu0 %v906_v24  ;;  %569 = vmatprep.mubr.bf16.mxu1 %v910_v25 }
  0x36   : > { %514 = vmatmul.mubr.bf16.gmra.mrb[8].mxu0 %v909_v26  ;;  %570 = vmatmul.mubr.bf16.gmra.mrb[8].mxu1 %v914_v27 }
  0x37   : > { %521 = vmatprep.mubr.bf16.mxu0 %v912_v28  ;;  %577 = vmatprep.mubr.bf16.mxu1 %v916_v29 }
  0x3e   : > { %522 = vmatmul.mubr.bf16.gmra.mrb[12].mxu0 %v915_v30  ;;  %578 = vmatmul.mubr.bf16.gmra.mrb[12].mxu1 %v920_v31 }
  0x3f   : > { %529 = vmatprep.mubr.bf16.mxu0 %v918_v32  ;;  %585 = vmatprep.mubr.bf16.mxu1 %v922_v33 }
  0x46   : > { %530 = vmatmul.mubr.bf16.gmra.mrb[16].mxu0 %v921_v35  ;;  %586 = vmatmul.mubr.bf16.gmra.mrb[16].mxu1 %v926_v36 }
  0x47   : > { %537 = vmatprep.mubr.bf16.mxu0 %v924_v37  ;;  %593 = vmatprep.mubr.bf16.mxu1 %v741_v38 }
  0x4e   : > { %538 = vmatmul.mubr.bf16.gmra.mrb[20].mxu0 %v927_v39  ;;  %594 = vmatmul.mubr.bf16.gmra.mrb[20].mxu1 %v740_v40 }
  0x4f   : > { %545 = vmatprep.mubr.bf16.mxu0 %v929_v41 }
  0x56   : > { %546 = vmatmul.mubr.bf16.gmra.mrb[24].mxu0 %v932_v42 }
  0xf9   : > { %v777_v43 = vpop.f32.mrb[0].mxu0  ;;  %v819_v44 = vpop.f32.mrb[0].mxu1 }
  0xfa   : > { %v778_v46 = vpop.f32.mrb[1].mxu0  ;;  %v820_v47 = vpop.f32.mrb[1].mxu1 }
  0xfb   : > { %v779_v48 = vadd.f32 %v778_v46, %v777_v43  ;;  %v780_v49 = vpop.f32.mrb[2].mxu0  ;;  %v821_v50 = vadd.f32 %v820_v47, %v819_v44  ;;  %v822_v51 = vpop.f32.mrb[2].mxu1 }
  0xfc   : > { %v781_v52 = vpop.f32.mrb[3].mxu0  ;;  %v823_v53 = vpop.f32.mrb[3].mxu1 }
  0xfd   : > { %v500_v54 = vadd.f32 %v779_v48, %v1055_v45  ;;  %v782_v55 = vadd.f32 %v781_v52, %v780_v49  ;;  %v556_v56 = vadd.f32 %v821_v50, %v1055_v45  ;;  %v824_v57 = vadd.f32 %v823_v53, %v822_v51 }
  0xff   : > { %v601_v58 = vmax.f32 %v500_v54, 0.0  ;;  %v503_v59 = vadd.f32 %v782_v55, %v1055_v45  ;;  %v615_v60 = vmax.f32 %v556_v56, 0.0  ;;  %v559_v61 = vadd.f32 %v824_v57, %v1055_v45 }
 0x101   : > { %626 = vst [vmem:[%s1064_s30] sm:$0xff] %v601_v58  ;;  %v602_v62 = vmax.f32 %v503_v59, 0.0  ;;  %v783_v63 = vpop.f32.mrb[4].mxu0  ;;  %640 = vst [vmem:[%s1064_s30 + $0x70] sm:$0xff] %v615_v60  ;;  %v616_v0 = vmax.f32 %v559_v61, 0.0  ;;  %v825_v1 = vpop.f32.mrb[4].mxu1 }
 0x102   : > { %v784_v2 = vpop.f32.mrb[5].mxu0  ;;  %v826_v3 = vpop.f32.mrb[5].mxu1 }
 0x103   : > { %627 = vst [vmem:[%s1064_s30 + $0x8] sm:$0xff] %v602_v62  ;;  %v785_v4 = vadd.f32 %v784_v2, %v783_v63  ;;  %v786_v5 = vpop.f32.mrb[6].mxu0  ;;  %641 = vst [vmem:[%s1064_s30 + $0x78] sm:$0xff] %v616_v0  ;;  %v827_v6 = vadd.f32 %v826_v3, %v825_v1  ;;  %v828_v7 = vpop.f32.mrb[6].mxu1 }
 0x104   : > { %v787_v8 = vpop.f32.mrb[7].mxu0  ;;  %v829_v9 = vpop.f32.mrb[7].mxu1 }
 0x105   : > { %v508_v10 = vadd.f32 %v785_v4, %v1055_v45  ;;  %v788_v11 = vadd.f32 %v787_v8, %v786_v5  ;;  %v564_v12 = vadd.f32 %v827_v6, %v1055_v45  ;;  %v830_v13 = vadd.f32 %v829_v9, %v828_v7 }
 0x107   : > { %v603_v14 = vmax.f32 %v508_v10, 0.0  ;;  %v511_v15 = vadd.f32 %v788_v11, %v1055_v45  ;;  %v617_v16 = vmax.f32 %v564_v12, 0.0  ;;  %v567_v17 = vadd.f32 %v830_v13, %v1055_v45 }
 0x109   : > { %628 = vst [vmem:[%s1064_s30 + $0x10] sm:$0xff] %v603_v14  ;;  %v604_v18 = vmax.f32 %v511_v15, 0.0  ;;  %v789_v19 = vpop.f32.mrb[8].mxu0  ;;  %642 = vst [vmem:[%s1064_s30 + $0x80] sm:$0xff] %v617_v16  ;;  %v618_v20 = vmax.f32 %v567_v17, 0.0  ;;  %v831_v21 = vpop.f32.mrb[8].mxu1 }
 0x10a   : > { %v790_v22 = vpop.f32.mrb[9].mxu0  ;;  %v832_v23 = vpop.f32.mrb[9].mxu1 }
 0x10b   : > { %629 = vst [vmem:[%s1064_s30 + $0x18] sm:$0xff] %v604_v18  ;;  %v791_v24 = vadd.f32 %v790_v22, %v789_v19  ;;  %v792_v25 = vpop.f32.mrb[10].mxu0  ;;  %643 = vst [vmem:[%s1064_s30 + $0x88] sm:$0xff] %v618_v20  ;;  %v833_v26 = vadd.f32 %v832_v23, %v831_v21  ;;  %v834_v27 = vpop.f32.mrb[10].mxu1 }
 0x10c   : > { %v793_v28 = vpop.f32.mrb[11].mxu0  ;;  %v835_v29 = vpop.f32.mrb[11].mxu1 }
 0x10d   : > { %v516_v30 = vadd.f32 %v791_v24, %v1055_v45  ;;  %v794_v31 = vadd.f32 %v793_v28, %v792_v25  ;;  %v572_v32 = vadd.f32 %v833_v26, %v1055_v45  ;;  %v836_v33 = vadd.f32 %v835_v29, %v834_v27 }
 0x10f   : > { %v605_v34 = vmax.f32 %v516_v30, 0.0  ;;  %v519_v35 = vadd.f32 %v794_v31, %v1055_v45  ;;  %v619_v36 = vmax.f32 %v572_v32, 0.0  ;;  %v575_v37 = vadd.f32 %v836_v33, %v1055_v45 }
 0x111   : > { %630 = vst [vmem:[%s1064_s30 + $0x20] sm:$0xff] %v605_v34  ;;  %v606_v38 = vmax.f32 %v519_v35, 0.0  ;;  %v795_v39 = vpop.f32.mrb[12].mxu0  ;;  %644 = vst [vmem:[%s1064_s30 + $0x90] sm:$0xff] %v619_v36  ;;  %v620_v40 = vmax.f32 %v575_v37, 0.0  ;;  %v837_v41 = vpop.f32.mrb[12].mxu1 }
 0x112   : > { %v796_v42 = vpop.f32.mrb[13].mxu0  ;;  %v838_v43 = vpop.f32.mrb[13].mxu1 }
 0x113   : > { %631 = vst [vmem:[%s1064_s30 + $0x28] sm:$0xff] %v606_v38  ;;  %v797_v44 = vadd.f32 %v796_v42, %v795_v39  ;;  %v798_v46 = vpop.f32.mrb[14].mxu0  ;;  %645 = vst [vmem:[%s1064_s30 + $0x98] sm:$0xff] %v620_v40  ;;  %v839_v47 = vadd.f32 %v838_v43, %v837_v41  ;;  %v840_v48 = vpop.f32.mrb[14].mxu1 }
 0x114   : > { %v799_v49 = vpop.f32.mrb[15].mxu0  ;;  %v841_v50 = vpop.f32.mrb[15].mxu1 }
 0x115   : > { %v524_v51 = vadd.f32 %v797_v44, %v1055_v45  ;;  %v800_v52 = vadd.f32 %v799_v49, %v798_v46  ;;  %v580_v53 = vadd.f32 %v839_v47, %v1055_v45  ;;  %v842_v54 = vadd.f32 %v841_v50, %v840_v48 }
 0x117   : > { %v607_v55 = vmax.f32 %v524_v51, 0.0  ;;  %v527_v56 = vadd.f32 %v800_v52, %v1055_v45  ;;  %v621_v57 = vmax.f32 %v580_v53, 0.0  ;;  %v583_v58 = vadd.f32 %v842_v54, %v1055_v45 }
 0x119   : > { %632 = vst [vmem:[%s1064_s30 + $0x30] sm:$0xff] %v607_v55  ;;  %v608_v59 = vmax.f32 %v527_v56, 0.0  ;;  %v801_v60 = vpop.f32.mrb[16].mxu0  ;;  %646 = vst [vmem:[%s1064_s30 + $0xa0] sm:$0xff] %v621_v57  ;;  %v622_v61 = vmax.f32 %v583_v58, 0.0  ;;  %v843_v62 = vpop.f32.mrb[16].mxu1 }
 0x11a   : > { %v802_v63 = vpop.f32.mrb[17].mxu0  ;;  %v844_v0 = vpop.f32.mrb[17].mxu1 }
 0x11b   : > { %633 = vst [vmem:[%s1064_s30 + $0x38] sm:$0xff] %v608_v59  ;;  %v803_v1 = vadd.f32 %v802_v63, %v801_v60  ;;  %v804_v2 = vpop.f32.mrb[18].mxu0  ;;  %647 = vst [vmem:[%s1064_s30 + $0xa8] sm:$0xff] %v622_v61  ;;  %v845_v3 = vadd.f32 %v844_v0, %v843_v62  ;;  %v846_v4 = vpop.f32.mrb[18].mxu1 }
 0x11c   : > { %v805_v5 = vpop.f32.mrb[19].mxu0  ;;  %v847_v6 = vpop.f32.mrb[19].mxu1 }
 0x11d   : > { %v532_v7 = vadd.f32 %v803_v1, %v1055_v45  ;;  %v806_v8 = vadd.f32 %v805_v5, %v804_v2  ;;  %v588_v9 = vadd.f32 %v845_v3, %v1055_v45  ;;  %v848_v10 = vadd.f32 %v847_v6, %v846_v4 }
 0x11f   : > { %v609_v11 = vmax.f32 %v532_v7, 0.0  ;;  %v535_v12 = vadd.f32 %v806_v8, %v1055_v45  ;;  %v623_v13 = vmax.f32 %v588_v9, 0.0  ;;  %v591_v14 = vadd.f32 %v848_v10, %v1055_v45 }
 0x121   : > { %634 = vst [vmem:[%s1064_s30 + $0x40] sm:$0xff] %v609_v11  ;;  %v610_v15 = vmax.f32 %v535_v12, 0.0  ;;  %v807_v16 = vpop.f32.mrb[20].mxu0  ;;  %648 = vst [vmem:[%s1064_s30 + $0xb0] sm:$0xff] %v623_v13  ;;  %v624_v17 = vmax.f32 %v591_v14, 0.0  ;;  %v849_v18 = vpop.f32.mrb[20].mxu1 }
 0x122   : > { %v808_v19 = vpop.f32.mrb[21].mxu0  ;;  %v850_v20 = vpop.f32.mrb[21].mxu1 }
 0x123   : > { %635 = vst [vmem:[%s1064_s30 + $0x48] sm:$0xff] %v610_v15  ;;  %v809_v21 = vadd.f32 %v808_v19, %v807_v16  ;;  %v810_v22 = vpop.f32.mrb[22].mxu0  ;;  %649 = vst [vmem:[%s1064_s30 + $0xb8] sm:$0xff] %v624_v17  ;;  %v851_v23 = vadd.f32 %v850_v20, %v849_v18  ;;  %v852_v24 = vpop.f32.mrb[22].mxu1 }
 0x124   : > { %v811_v25 = vpop.f32.mrb[23].mxu0  ;;  %v853_v26 = vpop.f32.mrb[23].mxu1 }
 0x125   : > { %v540_v27 = vadd.f32 %v809_v21, %v1055_v45  ;;  %v812_v28 = vadd.f32 %v811_v25, %v810_v22  ;;  %v596_v29 = vadd.f32 %v851_v23, %v1055_v45 }
 0x127   : > { %v611_v30 = vmax.f32 %v540_v27, 0.0  ;;  %v543_v31 = vadd.f32 %v812_v28, %v1055_v45  ;;  %v625_v32 = vmax.f32 %v596_v29, 0.0 }
 0x129   : > { %636 = vst [vmem:[%s1064_s30 + $0x50] sm:$0xff] %v611_v30  ;;  %v612_v33 = vmax.f32 %v543_v31, 0.0  ;;  %v813_v34 = vpop.f32.mrb[24].mxu0  ;;  %650 = vst [vmem:[%s1064_s30 + $0xc0] sm:$0xff] %v625_v32 }
 0x12a   : > { %v814_v35 = vpop.f32.mrb[25].mxu0 }
 0x12b   : > { %637 = vst [vmem:[%s1064_s30 + $0x58] sm:$0xff] %v612_v33  ;;  %v815_v36 = vadd.f32 %v814_v35, %v813_v34  ;;  %v816_v37 = vpop.f32.mrb[26].mxu0 }
 0x12c   : > { %v817_v38 = vpop.f32.mrb[27].mxu0 }
 0x12d   : > { %v548_v39 = vadd.f32 %v815_v36, %v1055_v45  ;;  %v818_v40 = vadd.f32 %v817_v38, %v816_v37 }
 0x12f   : > { %v613_v41 = vmax.f32 %v548_v39, 0.0  ;;  %v551_v42 = vadd.f32 %v818_v40, %v1055_v45 }
 0x131   : > { %638 = vst [vmem:[%s1064_s30 + $0x60] sm:$0xff] %v613_v41  ;;  %v614_v43 = vmax.f32 %v551_v42, 0.0 }
 0x133   : > { %639 = vst [vmem:[%s1064_s30 + $0x68] sm:$0xff] %v614_v43 }
 0x134 PF: > { %s13_s12 = sadd.s32 1, %s939_s12  }
 0x135   : > { %p10_p4 = scmp.ge.s32.totalorder %s13_s12, 6  }
 0x137   :  { %12 = sbr.rel (!%p10_p4) target bundleno = 1 (0x1), region = 62 }

// kernel: dqn_rgb_forward.5
= control target key start
LH: loop header
LB: loop body
LE: loop exit
PB: predicated region body
PF: predicated region fallthrough
CT: control target
= control target key end

     0   :  { %s1488_s1 = inlined_call_operand.vmem [shape: bf16[512,128], index: 1, kind: input, shape index: {}]   ;;  %s1489_s0 = inlined_call_operand.vmem [shape: bf16[168,512], index: 0, kind: input, shape index: {}]   ;;  %s1490_s2 = inlined_call_operand.vmem [shape: f32[1,128], index: 2, kind: input, shape index: {}]   ;;  %s1491_s3 = inlined_call_operand.vmem [shape: f32[168,128], index: 3, kind: output, shape index: {}]  }
   0x1   :  { %v1061_v0 = vld [vmem:[%s1488_s1 + $0x40] sm:$0xff]   ;;  %v1065_v4 = vld [vmem:[%s1488_s1 + $0x48] sm:$0xff]   ;;  %v1069_v8 = vld [vmem:[%s1488_s1 + $0x50] sm:$0xff]  }
   0x2   :  { %v1062_v1 = vld [vmem:[%s1488_s1 + $0xc0] sm:$0xff]   ;;  %897 = vmatprep.subr.bf16.mxu0 %v1061_v0  ;;  %v1066_v5 = vld [vmem:[%s1488_s1 + $0xc8] sm:$0xff]   ;;  %v1070_v9 = vld [vmem:[%s1488_s1 + $0xd0] sm:$0xff]  }
   0x3   :  { %v1063_v2 = vld [vmem:[%s1488_s1] sm:$0xff]   ;;  %979 = vmatprep.subr.bf16.mxu1 %v1062_v1  ;;  %v1067_v6 = vld [vmem:[%s1488_s1 + $0x8] sm:$0xff]   ;;  %v1071_v10 = vld [vmem:[%s1488_s1 + $0x10] sm:$0xff]  }
   0x4   :  { %v1064_v3 = vld [vmem:[%s1488_s1 + $0x80] sm:$0xff]   ;;  %898 = vmatpush3.bf16.msra.mxu0 %v1063_v2  ;;  %v1068_v7 = vld [vmem:[%s1488_s1 + $0x88] sm:$0xff]   ;;  %v1072_v11 = vld [vmem:[%s1488_s1 + $0x90] sm:$0xff]  }
   0x5   :  { %980 = vmatpush3.bf16.msra.mxu1 %v1064_v3  ;;  %899 = vmatprep.subr.bf16.mxu0 %v1065_v4  ;;  %v1073_v12 = vld [vmem:[%s1488_s1 + $0x58] sm:$0xff]   ;;  %v1077_v16 = vld [vmem:[%s1488_s1 + $0x60] sm:$0xff]   ;;  %v1081_v20 = vld [vmem:[%s1488_s1 + $0x68] sm:$0xff]  }
   0x6   :  { %981 = vmatprep.subr.bf16.mxu1 %v1066_v5  ;;  %v1074_v13 = vld [vmem:[%s1488_s1 + $0xd8] sm:$0xff]   ;;  %v1078_v17 = vld [vmem:[%s1488_s1 + $0xe0] sm:$0xff]   ;;  %v1082_v21 = vld [vmem:[%s1488_s1 + $0xe8] sm:$0xff]  }
   0x7   :  { %v1075_v14 = vld [vmem:[%s1488_s1 + $0x18] sm:$0xff]   ;;  %v1079_v18 = vld [vmem:[%s1488_s1 + $0x20] sm:$0xff]   ;;  %v1083_v22 = vld [vmem:[%s1488_s1 + $0x28] sm:$0xff]  }
   0x8   :  { %900 = vmatpush3.bf16.msra.mxu0 %v1067_v6  ;;  %v1076_v15 = vld [vmem:[%s1488_s1 + $0x98] sm:$0xff]   ;;  %v1080_v19 = vld [vmem:[%s1488_s1 + $0xa0] sm:$0xff]   ;;  %v1084_v23 = vld [vmem:[%s1488_s1 + $0xa8] sm:$0xff]  }
   0x9   :  { %982 = vmatpush3.bf16.msra.mxu1 %v1068_v7  ;;  %901 = vmatprep.subr.bf16.mxu0 %v1069_v8  ;;  %v1085_v24 = vld [vmem:[%s1488_s1 + $0x70] sm:$0xff]   ;;  %v1089_v28 = vld [vmem:[%s1488_s1 + $0x78] sm:$0xff]   ;;  %v55_v6 = vld [vmem:[%s1489_s0 + $0x140] sm:$0xff] }
   0xa   :  { %983 = vmatprep.subr.bf16.mxu1 %v1070_v9  ;;  %v1086_v25 = vld [vmem:[%s1488_s1 + $0xf0] sm:$0xff]   ;;  %v1090_v29 = vld [vmem:[%s1488_s1 + $0xf8] sm:$0xff]   ;;  %v56_v7 = vld [vmem:[%s1489_s0 + $0x148] sm:$0xff] }
   0xb   :  { %v1087_v26 = vld [vmem:[%s1488_s1 + $0x30] sm:$0xff]   ;;  %v1091_v30 = vld [vmem:[%s1488_s1 + $0x38] sm:$0xff]  }
   0xc   :  { %902 = vmatpush3.bf16.msra.mxu0 %v1071_v10  ;;  %v1088_v27 = vld [vmem:[%s1488_s1 + $0xb0] sm:$0xff]   ;;  %v1092_v31 = vld [vmem:[%s1488_s1 + $0xb8] sm:$0xff]   ;;  %v862_v10 = vcombine.high %v55_v6, %v55_v6 }
   0xd   :  { %984 = vmatpush3.bf16.msra.mxu1 %v1072_v11  ;;  %903 = vmatprep.subr.bf16.mxu0 %v1073_v12  ;;  %v1093_v32 = vld [vmem:[%s1489_s0] ss:$16 sps:$4 sm:$0xff]   ;;  %v1095_v33 = vld [vmem:[%s1489_s0 + $0x4] ss:$16 sps:$4 sm:$0xff]   ;;  %v1096_v34 = vld [vmem:[%s1489_s0 + $0x8] ss:$16 sps:$4 sm:$0xff]   ;;  %v864_v11 = vcombine.high %v56_v7, %v56_v7  ;;  %v861_v12 = vcombine.low %v55_v6, %v55_v6 }
   0xe   :  { %985 = vmatprep.subr.bf16.mxu1 %v1074_v13  ;;  %v1098_v35 = vld [vmem:[%s1489_s0 + $0xc] ss:$16 sps:$4 sm:$0xff]   ;;  %566 = vmatprep.mubr.bf16.mxu0 %v1095_v33  ;;  %v1099_v36 = vld [vmem:[%s1489_s0 + $0x24] ss:$16 sps:$4 sm:$0xff]   ;;  %v1103_v38 = vld [vmem:[%s1489_s0 + $0x20] ss:$16 sps:$4 sm:$0xff]   ;;  %v863_v13 = vcombine.low %v56_v7, %v56_v7 }
   0xf   :  { %686 = vmatprep.mubr.bf16.mxu1 %v1098_v35  ;;  %v1101_v37 = vld [vmem:[%s1489_s0 + $0x2c] ss:$16 sps:$4 sm:$0xff]   ;;  %v1104_v39 = vld [vmem:[%s1489_s0 + $0x28] ss:$16 sps:$4 sm:$0xff]   ;;  %v1105_v40 = vld [vmem:[%s1489_s0 + $0x44] ss:$16 sps:$4 sm:$0xff]  }
  0x10   :  { %904 = vmatpush3.bf16.msra.mxu0 %v1075_v14  ;;  %v1107_v41 = vld [vmem:[%s1489_s0 + $0x4c] ss:$16 sps:$4 sm:$0xff]   ;;  %v1109_v42 = vld [vmem:[%s1489_s0 + $0x40] ss:$16 sps:$4 sm:$0xff]   ;;  %v1110_v43 = vld [vmem:[%s1489_s0 + $0x48] ss:$16 sps:$4 sm:$0xff]  }
  0x11   :  { %986 = vmatpush3.bf16.msra.mxu1 %v1076_v15  ;;  %905 = vmatprep.subr.bf16.mxu0 %v1077_v16  ;;  %v1111_v44 = vld [vmem:[%s1489_s0 + $0x64] ss:$16 sps:$4 sm:$0xff]   ;;  %v1113_v45 = vld [vmem:[%s1489_s0 + $0x6c] ss:$16 sps:$4 sm:$0xff]   ;;  %v1115_v46 = vld [vmem:[%s1489_s0 + $0x60] ss:$16 sps:$4 sm:$0xff]  }
  0x12   :  { %987 = vmatprep.subr.bf16.mxu1 %v1078_v17  ;;  %v1116_v47 = vld [vmem:[%s1489_s0 + $0x68] ss:$16 sps:$4 sm:$0xff]   ;;  %v1117_v48 = vld [vmem:[%s1489_s0 + $0x84] ss:$16 sps:$4 sm:$0xff]   ;;  %v1119_v49 = vld [vmem:[%s1489_s0 + $0x8c] ss:$16 sps:$4 sm:$0xff]  }
  0x13   :  { %v1121_v50 = vld [vmem:[%s1489_s0 + $0x80] ss:$16 sps:$4 sm:$0xff]   ;;  %v1122_v51 = vld [vmem:[%s1489_s0 + $0x88] ss:$16 sps:$4 sm:$0xff]   ;;  %v1123_v52 = vld [vmem:[%s1489_s0 + $0xa4] ss:$16 sps:$4 sm:$0xff]  }
  0x14   :  { %906 = vmatpush3.bf16.msra.mxu0 %v1079_v18  ;;  %v1125_v53 = vld [vmem:[%s1489_s0 + $0xac] ss:$16 sps:$4 sm:$0xff]   ;;  %v1127_v54 = vld [vmem:[%s1489_s0 + $0xa0] ss:$16 sps:$4 sm:$0xff]   ;;  %v1128_v55 = vld [vmem:[%s1489_s0 + $0xa8] ss:$16 sps:$4 sm:$0xff]  }
  0x15   :  { %988 = vmatpush3.bf16.msra.mxu1 %v1080_v19  ;;  %907 = vmatprep.subr.bf16.mxu0 %v1081_v20  ;;  %v1129_v56 = vld [vmem:[%s1489_s0 + $0xc4] ss:$16 sps:$4 sm:$0xff]   ;;  %v1131_v57 = vld [vmem:[%s1489_s0 + $0xcc] ss:$16 sps:$4 sm:$0xff]   ;;  %v1133_v58 = vld [vmem:[%s1489_s0 + $0xc0] ss:$16 sps:$4 sm:$0xff]  }
  0x16   :  { %989 = vmatprep.subr.bf16.mxu1 %v1082_v21  ;;  %v1134_v59 = vld [vmem:[%s1489_s0 + $0xc8] ss:$16 sps:$4 sm:$0xff]   ;;  %v1135_v60 = vld [vmem:[%s1489_s0 + $0xe4] ss:$16 sps:$4 sm:$0xff]   ;;  %v1137_v61 = vld [vmem:[%s1489_s0 + $0xec] ss:$16 sps:$4 sm:$0xff]  }
  0x17   :  { %v1139_v62 = vld [vmem:[%s1489_s0 + $0xe0] ss:$16 sps:$4 sm:$0xff]   ;;  %v1140_v63 = vld [vmem:[%s1489_s0 + $0xe8] ss:$16 sps:$4 sm:$0xff]   ;;  %v1141_v0 = vld [vmem:[%s1489_s0 + $0x104] ss:$16 sps:$4 sm:$0xff]  }
  0x18   :  { %908 = vmatpush3.bf16.msra.mxu0 %v1083_v22  ;;  %v1143_v1 = vld [vmem:[%s1489_s0 + $0x10c] ss:$16 sps:$4 sm:$0xff]   ;;  %v1145_v2 = vld [vmem:[%s1489_s0 + $0x100] ss:$16 sps:$4 sm:$0xff]   ;;  %v1146_v3 = vld [vmem:[%s1489_s0 + $0x108] ss:$16 sps:$4 sm:$0xff]  }
  0x19   :  { %990 = vmatpush3.bf16.msra.mxu1 %v1084_v23  ;;  %909 = vmatprep.subr.bf16.mxu0 %v1085_v24  ;;  %v1147_v4 = vld [vmem:[%s1489_s0 + $0x124] ss:$16 sps:$4 sm:$0xff]   ;;  %v1149_v5 = vld [vmem:[%s1489_s0 + $0x12c] ss:$16 sps:$4 sm:$0xff]   ;;  %v1151_v8 = vld [vmem:[%s1489_s0 + $0x120] ss:$16 sps:$4 sm:$0xff]  }
  0x1a   :  { %991 = vmatprep.subr.bf16.mxu1 %v1086_v25  ;;  %v1152_v9 = vld [vmem:[%s1489_s0 + $0x128] ss:$16 sps:$4 sm:$0xff]   ;;  %v1402_v16 = vld [vmem:[%s1490_s2] ss:$0 sm:$0xff] }
  0x1c   :  { %910 = vmatpush3.bf16.msra.mxu0 %v1087_v26 }
  0x1d   :  { %992 = vmatpush3.bf16.msra.mxu1 %v1088_v27  ;;  %911 = vmatprep.subr.bf16.mxu0 %v1089_v28 }
  0x1e   :  { %993 = vmatprep.subr.bf16.mxu1 %v1090_v29 }
  0x20   :  { %912 = vmatpush3.bf16.msra.mxu0 %v1091_v30 }
  0x21   :  { %994 = vmatpush3.bf16.msra.mxu1 %v1092_v31 }
  0x23   :  { %567 = vmatmul.mubr.bf16.vlgmr.msra.gmra.mrb[0].mxu0 %v1093_v32 }
  0x24   :  { %687 = vmatmul.mubr.bf16.vlgmr.msra.gmra.mrb[0].mxu1 %v1096_v34  ;;  %574 = vmatprep.mubr.bf16.mxu0 %v1099_v36 }
  0x25   :  { %694 = vmatprep.mubr.bf16.mxu1 %v1101_v37 }
  0x2b   :  { %575 = vmatmul.mubr.bf16.gmra.mrb[4].mxu0 %v1103_v38 }
  0x2c   :  { %695 = vmatmul.mubr.bf16.gmra.mrb[4].mxu1 %v1104_v39  ;;  %582 = vmatprep.mubr.bf16.mxu0 %v1105_v40 }
  0x2d   :  { %702 = vmatprep.mubr.bf16.mxu1 %v1107_v41 }
  0x33   :  { %583 = vmatmul.mubr.bf16.gmra.mrb[8].mxu0 %v1109_v42 }
  0x34   :  { %703 = vmatmul.mubr.bf16.gmra.mrb[8].mxu1 %v1110_v43  ;;  %590 = vmatprep.mubr.bf16.mxu0 %v1111_v44 }
  0x35   :  { %710 = vmatprep.mubr.bf16.mxu1 %v1113_v45 }
  0x3b   :  { %591 = vmatmul.mubr.bf16.gmra.mrb[12].mxu0 %v1115_v46 }
  0x3c   :  { %711 = vmatmul.mubr.bf16.gmra.mrb[12].mxu1 %v1116_v47  ;;  %598 = vmatprep.mubr.bf16.mxu0 %v1117_v48 }
  0x3d   :  { %718 = vmatprep.mubr.bf16.mxu1 %v1119_v49 }
  0x43   :  { %599 = vmatmul.mubr.bf16.gmra.mrb[16].mxu0 %v1121_v50 }
  0x44   :  { %719 = vmatmul.mubr.bf16.gmra.mrb[16].mxu1 %v1122_v51  ;;  %606 = vmatprep.mubr.bf16.mxu0 %v1123_v52 }
  0x45   :  { %726 = vmatprep.mubr.bf16.mxu1 %v1125_v53 }
  0x4b   :  { %607 = vmatmul.mubr.bf16.gmra.mrb[20].mxu0 %v1127_v54 }
  0x4c   :  { %727 = vmatmul.mubr.bf16.gmra.mrb[20].mxu1 %v1128_v55  ;;  %614 = vmatprep.mubr.bf16.mxu0 %v1129_v56 }
  0x4d   :  { %734 = vmatprep.mubr.bf16.mxu1 %v1131_v57 }
  0x53   :  { %615 = vmatmul.mubr.bf16.gmra.mrb[24].mxu0 %v1133_v58 }
  0x54   :  { %735 = vmatmul.mubr.bf16.gmra.mrb[24].mxu1 %v1134_v59  ;;  %622 = vmatprep.mubr.bf16.mxu0 %v1135_v60 }
  0x55   :  { %742 = vmatprep.mubr.bf16.mxu1 %v1137_v61 }
  0x5b   :  { %623 = vmatmul.mubr.bf16.gmra.mrb[28].mxu0 %v1139_v62 }
  0x5c   :  { %743 = vmatmul.mubr.bf16.gmra.mrb[28].mxu1 %v1140_v63  ;;  %630 = vmatprep.mubr.bf16.mxu0 %v1141_v0 }
  0x5d   :  { %750 = vmatprep.mubr.bf16.mxu1 %v1143_v1 }
  0x63   :  { %631 = vmatmul.mubr.bf16.gmra.mrb[32].mxu0 %v1145_v2 }
  0x64   :  { %751 = vmatmul.mubr.bf16.gmra.mrb[32].mxu1 %v1146_v3  ;;  %638 = vmatprep.mubr.bf16.mxu0 %v1147_v4 }
  0x65   :  { %758 = vmatprep.mubr.bf16.mxu1 %v1149_v5 }
  0x6b   :  { %639 = vmatmul.mubr.bf16.gmra.mrb[36].mxu0 %v1151_v8 }
  0x6c   :  { %759 = vmatmul.mubr.bf16.gmra.mrb[36].mxu1 %v1152_v9  ;;  %646 = vmatprep.mubr.bf16.mxu0 %v862_v10 }
  0x6d   :  { %766 = vmatprep.mubr.bf16.mxu1 %v864_v11 }
  0x73   :  { %647 = vmatmul.mubr.bf16.gmra.mrb[40].mxu0 %v861_v12 }
  0x74   :  { %767 = vmatmul.mubr.bf16.gmra.mrb[40].mxu1 %v863_v13 }
  0xf6   :  { %v913_v14 = vpop.f32.mrb[0].mxu0 }
  0xf7   :  { %v995_v15 = vpop.f32.mrb[0].mxu1  ;;  %v914_v17 = vpop.f32.mrb[1].mxu0 }
  0xf8   :  { %v915_v18 = vadd.f32 %v914_v17, %v913_v14  ;;  %v996_v19 = vpop.f32.mrb[1].mxu1  ;;  %v916_v20 = vpop.f32.mrb[2].mxu0 }
  0xf9   :  { %v997_v21 = vadd.f32 %v996_v19, %v995_v15  ;;  %v998_v22 = vpop.f32.mrb[2].mxu1  ;;  %v917_v23 = vpop.f32.mrb[3].mxu0 }
  0xfa   :  { %v569_v24 = vadd.f32 %v915_v18, %v1402_v16  ;;  %v918_v25 = vadd.f32 %v917_v23, %v916_v20  ;;  %v999_v26 = vpop.f32.mrb[3].mxu1 }
  0xfb   :  { %v1000_v27 = vadd.f32 %v999_v26, %v998_v22 }
  0xfc   :  { %v689_v28 = vadd.f32 %v997_v21, %v569_v24  ;;  %v572_v29 = vadd.f32 %v918_v25, %v1402_v16 }
  0xfe   :  { %v774_v30 = vmax.f32 %v689_v28, 0.0  ;;  %v692_v31 = vadd.f32 %v1000_v27, %v572_v29  ;;  %v919_v32 = vpop.f32.mrb[4].mxu0 }
  0xff   :  { %v1001_v33 = vpop.f32.mrb[4].mxu1  ;;  %v920_v34 = vpop.f32.mrb[5].mxu0 }
 0x100   :  { %795 = vst [vmem:[%s1491_s3] sm:$0xff] %v774_v30  ;;  %v775_v35 = vmax.f32 %v692_v31, 0.0  ;;  %v921_v36 = vadd.f32 %v920_v34, %v919_v32  ;;  %v1002_v37 = vpop.f32.mrb[5].mxu1  ;;  %v922_v38 = vpop.f32.mrb[6].mxu0 }
 0x101   :  { %v1003_v39 = vadd.f32 %v1002_v37, %v1001_v33  ;;  %v1004_v40 = vpop.f32.mrb[6].mxu1  ;;  %v923_v41 = vpop.f32.mrb[7].mxu0 }
 0x102   :  { %796 = vst [vmem:[%s1491_s3 + $0x8] sm:$0xff] %v775_v35  ;;  %v577_v42 = vadd.f32 %v921_v36, %v1402_v16  ;;  %v924_v43 = vadd.f32 %v923_v41, %v922_v38  ;;  %v1005_v44 = vpop.f32.mrb[7].mxu1 }
 0x103   :  { %v1006_v45 = vadd.f32 %v1005_v44, %v1004_v40 }
 0x104   :  { %v697_v46 = vadd.f32 %v1003_v39, %v577_v42  ;;  %v580_v47 = vadd.f32 %v924_v43, %v1402_v16 }
 0x106   :  { %v776_v48 = vmax.f32 %v697_v46, 0.0  ;;  %v700_v49 = vadd.f32 %v1006_v45, %v580_v47  ;;  %v925_v50 = vpop.f32.mrb[8].mxu0 }
 0x107   :  { %v1007_v51 = vpop.f32.mrb[8].mxu1  ;;  %v926_v52 = vpop.f32.mrb[9].mxu0 }
 0x108   :  { %797 = vst [vmem:[%s1491_s3 + $0x10] sm:$0xff] %v776_v48  ;;  %v777_v53 = vmax.f32 %v700_v49, 0.0  ;;  %v927_v54 = vadd.f32 %v926_v52, %v925_v50  ;;  %v1008_v55 = vpop.f32.mrb[9].mxu1  ;;  %v928_v56 = vpop.f32.mrb[10].mxu0 }
 0x109   :  { %v1009_v57 = vadd.f32 %v1008_v55, %v1007_v51  ;;  %v1010_v58 = vpop.f32.mrb[10].mxu1  ;;  %v929_v59 = vpop.f32.mrb[11].mxu0 }
 0x10a   :  { %798 = vst [vmem:[%s1491_s3 + $0x18] sm:$0xff] %v777_v53  ;;  %v585_v60 = vadd.f32 %v927_v54, %v1402_v16  ;;  %v930_v61 = vadd.f32 %v929_v59, %v928_v56  ;;  %v1011_v62 = vpop.f32.mrb[11].mxu1 }
 0x10b   :  { %v1012_v63 = vadd.f32 %v1011_v62, %v1010_v58 }
 0x10c   :  { %v705_v0 = vadd.f32 %v1009_v57, %v585_v60  ;;  %v588_v1 = vadd.f32 %v930_v61, %v1402_v16 }
 0x10e   :  { %v778_v2 = vmax.f32 %v705_v0, 0.0  ;;  %v708_v3 = vadd.f32 %v1012_v63, %v588_v1  ;;  %v931_v4 = vpop.f32.mrb[12].mxu0 }
 0x10f   :  { %v1013_v5 = vpop.f32.mrb[12].mxu1  ;;  %v932_v6 = vpop.f32.mrb[13].mxu0 }
 0x110   :  { %799 = vst [vmem:[%s1491_s3 + $0x20] sm:$0xff] %v778_v2  ;;  %v779_v7 = vmax.f32 %v708_v3, 0.0  ;;  %v933_v8 = vadd.f32 %v932_v6, %v931_v4  ;;  %v1014_v9 = vpop.f32.mrb[13].mxu1  ;;  %v934_v10 = vpop.f32.mrb[14].mxu0 }
 0x111   :  { %v1015_v11 = vadd.f32 %v1014_v9, %v1013_v5  ;;  %v1016_v12 = vpop.f32.mrb[14].mxu1  ;;  %v935_v13 = vpop.f32.mrb[15].mxu0 }
 0x112   :  { %800 = vst [vmem:[%s1491_s3 + $0x28] sm:$0xff] %v779_v7  ;;  %v593_v14 = vadd.f32 %v933_v8, %v1402_v16  ;;  %v936_v15 = vadd.f32 %v935_v13, %v934_v10  ;;  %v1017_v17 = vpop.f32.mrb[15].mxu1 }
 0x113   :  { %v1018_v18 = vadd.f32 %v1017_v17, %v1016_v12 }
 0x114   :  { %v713_v19 = vadd.f32 %v1015_v11, %v593_v14  ;;  %v596_v20 = vadd.f32 %v936_v15, %v1402_v16 }
 0x116   :  { %v780_v21 = vmax.f32 %v713_v19, 0.0  ;;  %v716_v22 = vadd.f32 %v1018_v18, %v596_v20  ;;  %v937_v23 = vpop.f32.mrb[16].mxu0 }
 0x117   :  { %v1019_v24 = vpop.f32.mrb[16].mxu1  ;;  %v938_v25 = vpop.f32.mrb[17].mxu0 }
 0x118   :  { %801 = vst [vmem:[%s1491_s3 + $0x30] sm:$0xff] %v780_v21  ;;  %v781_v26 = vmax.f32 %v716_v22, 0.0  ;;  %v939_v27 = vadd.f32 %v938_v25, %v937_v23  ;;  %v1020_v28 = vpop.f32.mrb[17].mxu1  ;;  %v940_v29 = vpop.f32.mrb[18].mxu0 }
 0x119   :  { %v1021_v30 = vadd.f32 %v1020_v28, %v1019_v24  ;;  %v1022_v31 = vpop.f32.mrb[18].mxu1  ;;  %v941_v32 = vpop.f32.mrb[19].mxu0 }
 0x11a   :  { %802 = vst [vmem:[%s1491_s3 + $0x38] sm:$0xff] %v781_v26  ;;  %v601_v33 = vadd.f32 %v939_v27, %v1402_v16  ;;  %v942_v34 = vadd.f32 %v941_v32, %v940_v29  ;;  %v1023_v35 = vpop.f32.mrb[19].mxu1 }
 0x11b   :  { %v1024_v36 = vadd.f32 %v1023_v35, %v1022_v31 }
 0x11c   :  { %v721_v37 = vadd.f32 %v1021_v30, %v601_v33  ;;  %v604_v38 = vadd.f32 %v942_v34, %v1402_v16 }
 0x11e   :  { %v782_v39 = vmax.f32 %v721_v37, 0.0  ;;  %v724_v40 = vadd.f32 %v1024_v36, %v604_v38  ;;  %v943_v41 = vpop.f32.mrb[20].mxu0 }
 0x11f   :  { %v1025_v42 = vpop.f32.mrb[20].mxu1  ;;  %v944_v43 = vpop.f32.mrb[21].mxu0 }
 0x120   :  { %803 = vst [vmem:[%s1491_s3 + $0x40] sm:$0xff] %v782_v39  ;;  %v783_v44 = vmax.f32 %v724_v40, 0.0  ;;  %v945_v45 = vadd.f32 %v944_v43, %v943_v41  ;;  %v1026_v46 = vpop.f32.mrb[21].mxu1  ;;  %v946_v47 = vpop.f32.mrb[22].mxu0 }
 0x121   :  { %v1027_v48 = vadd.f32 %v1026_v46, %v1025_v42  ;;  %v1028_v49 = vpop.f32.mrb[22].mxu1  ;;  %v947_v50 = vpop.f32.mrb[23].mxu0 }
 0x122   :  { %804 = vst [vmem:[%s1491_s3 + $0x48] sm:$0xff] %v783_v44  ;;  %v609_v51 = vadd.f32 %v945_v45, %v1402_v16  ;;  %v948_v52 = vadd.f32 %v947_v50, %v946_v47  ;;  %v1029_v53 = vpop.f32.mrb[23].mxu1 }
 0x123   :  { %v1030_v54 = vadd.f32 %v1029_v53, %v1028_v49 }
 0x124   :  { %v729_v55 = vadd.f32 %v1027_v48, %v609_v51  ;;  %v612_v56 = vadd.f32 %v948_v52, %v1402_v16 }
 0x126   :  { %v784_v57 = vmax.f32 %v729_v55, 0.0  ;;  %v732_v58 = vadd.f32 %v1030_v54, %v612_v56  ;;  %v949_v59 = vpop.f32.mrb[24].mxu0 }
 0x127   :  { %v1031_v60 = vpop.f32.mrb[24].mxu1  ;;  %v950_v61 = vpop.f32.mrb[25].mxu0 }
 0x128   :  { %805 = vst [vmem:[%s1491_s3 + $0x50] sm:$0xff] %v784_v57  ;;  %v785_v62 = vmax.f32 %v732_v58, 0.0  ;;  %v951_v63 = vadd.f32 %v950_v61, %v949_v59  ;;  %v1032_v0 = vpop.f32.mrb[25].mxu1  ;;  %v952_v1 = vpop.f32.mrb[26].mxu0 }
 0x129   :  { %v1033_v2 = vadd.f32 %v1032_v0, %v1031_v60  ;;  %v1034_v3 = vpop.f32.mrb[26].mxu1  ;;  %v953_v4 = vpop.f32.mrb[27].mxu0 }
 0x12a   :  { %806 = vst [vmem:[%s1491_s3 + $0x58] sm:$0xff] %v785_v62  ;;  %v617_v5 = vadd.f32 %v951_v63, %v1402_v16  ;;  %v954_v6 = vadd.f32 %v953_v4, %v952_v1  ;;  %v1035_v7 = vpop.f32.mrb[27].mxu1 }
 0x12b   :  { %v1036_v8 = vadd.f32 %v1035_v7, %v1034_v3 }
 0x12c   :  { %v737_v9 = vadd.f32 %v1033_v2, %v617_v5  ;;  %v620_v10 = vadd.f32 %v954_v6, %v1402_v16 }
 0x12e   :  { %v786_v11 = vmax.f32 %v737_v9, 0.0  ;;  %v740_v12 = vadd.f32 %v1036_v8, %v620_v10  ;;  %v955_v13 = vpop.f32.mrb[28].mxu0 }
 0x12f   :  { %v1037_v14 = vpop.f32.mrb[28].mxu1  ;;  %v956_v15 = vpop.f32.mrb[29].mxu0 }
 0x130   :  { %807 = vst [vmem:[%s1491_s3 + $0x60] sm:$0xff] %v786_v11  ;;  %v787_v17 = vmax.f32 %v740_v12, 0.0  ;;  %v957_v18 = vadd.f32 %v956_v15, %v955_v13  ;;  %v1038_v19 = vpop.f32.mrb[29].mxu1  ;;  %v958_v20 = vpop.f32.mrb[30].mxu0 }
 0x131   :  { %v1039_v21 = vadd.f32 %v1038_v19, %v1037_v14  ;;  %v1040_v22 = vpop.f32.mrb[30].mxu1  ;;  %v959_v23 = vpop.f32.mrb[31].mxu0 }
 0x132   :  { %808 = vst [vmem:[%s1491_s3 + $0x68] sm:$0xff] %v787_v17  ;;  %v625_v24 = vadd.f32 %v957_v18, %v1402_v16  ;;  %v960_v25 = vadd.f32 %v959_v23, %v958_v20  ;;  %v1041_v26 = vpop.f32.mrb[31].mxu1 }
 0x133   :  { %v1042_v27 = vadd.f32 %v1041_v26, %v1040_v22 }
 0x134   :  { %v745_v28 = vadd.f32 %v1039_v21, %v625_v24  ;;  %v628_v29 = vadd.f32 %v960_v25, %v1402_v16 }
 0x136   :  { %v788_v30 = vmax.f32 %v745_v28, 0.0  ;;  %v748_v31 = vadd.f32 %v1042_v27, %v628_v29  ;;  %v961_v32 = vpop.f32.mrb[32].mxu0 }
 0x137   :  { %v1043_v33 = vpop.f32.mrb[32].mxu1  ;;  %v962_v34 = vpop.f32.mrb[33].mxu0 }
 0x138   :  { %809 = vst [vmem:[%s1491_s3 + $0x70] sm:$0xff] %v788_v30  ;;  %v789_v35 = vmax.f32 %v748_v31, 0.0  ;;  %v963_v36 = vadd.f32 %v962_v34, %v961_v32  ;;  %v1044_v37 = vpop.f32.mrb[33].mxu1  ;;  %v964_v38 = vpop.f32.mrb[34].mxu0 }
 0x139   :  { %v1045_v39 = vadd.f32 %v1044_v37, %v1043_v33  ;;  %v1046_v40 = vpop.f32.mrb[34].mxu1  ;;  %v965_v41 = vpop.f32.mrb[35].mxu0 }
 0x13a   :  { %810 = vst [vmem:[%s1491_s3 + $0x78] sm:$0xff] %v789_v35  ;;  %v633_v42 = vadd.f32 %v963_v36, %v1402_v16  ;;  %v966_v43 = vadd.f32 %v965_v41, %v964_v38  ;;  %v1047_v44 = vpop.f32.mrb[35].mxu1 }
 0x13b   :  { %v1048_v45 = vadd.f32 %v1047_v44, %v1046_v40 }
 0x13c   :  { %v753_v46 = vadd.f32 %v1045_v39, %v633_v42  ;;  %v636_v47 = vadd.f32 %v966_v43, %v1402_v16 }
 0x13e   :  { %v790_v48 = vmax.f32 %v753_v46, 0.0  ;;  %v756_v49 = vadd.f32 %v1048_v45, %v636_v47  ;;  %v967_v50 = vpop.f32.mrb[36].mxu0 }
 0x13f   :  { %v1049_v51 = vpop.f32.mrb[36].mxu1  ;;  %v968_v52 = vpop.f32.mrb[37].mxu0 }
 0x140   :  { %811 = vst [vmem:[%s1491_s3 + $0x80] sm:$0xff] %v790_v48  ;;  %v791_v53 = vmax.f32 %v756_v49, 0.0  ;;  %v969_v54 = vadd.f32 %v968_v52, %v967_v50  ;;  %v1050_v55 = vpop.f32.mrb[37].mxu1  ;;  %v970_v56 = vpop.f32.mrb[38].mxu0 }
 0x141   :  { %v1051_v57 = vadd.f32 %v1050_v55, %v1049_v51  ;;  %v1052_v58 = vpop.f32.mrb[38].mxu1  ;;  %v971_v59 = vpop.f32.mrb[39].mxu0 }
 0x142   :  { %812 = vst [vmem:[%s1491_s3 + $0x88] sm:$0xff] %v791_v53  ;;  %v641_v60 = vadd.f32 %v969_v54, %v1402_v16  ;;  %v972_v61 = vadd.f32 %v971_v59, %v970_v56  ;;  %v1053_v62 = vpop.f32.mrb[39].mxu1 }
 0x143   :  { %v1054_v63 = vadd.f32 %v1053_v62, %v1052_v58 }
 0x144   :  { %v761_v0 = vadd.f32 %v1051_v57, %v641_v60  ;;  %v644_v1 = vadd.f32 %v972_v61, %v1402_v16 }
 0x146   :  { %v792_v2 = vmax.f32 %v761_v0, 0.0  ;;  %v764_v3 = vadd.f32 %v1054_v63, %v644_v1  ;;  %v973_v4 = vpop.f32.mrb[40].mxu0 }
 0x147   :  { %v1055_v5 = vpop.f32.mrb[40].mxu1  ;;  %v974_v6 = vpop.f32.mrb[41].mxu0 }
 0x148   :  { %813 = vst [vmem:[%s1491_s3 + $0x90] sm:$0xff] %v792_v2  ;;  %v793_v7 = vmax.f32 %v764_v3, 0.0  ;;  %v975_v8 = vadd.f32 %v974_v6, %v973_v4  ;;  %v1056_v9 = vpop.f32.mrb[41].mxu1  ;;  %v976_v10 = vpop.f32.mrb[42].mxu0 }
 0x149   :  { %v1057_v11 = vadd.f32 %v1056_v9, %v1055_v5  ;;  %v1058_v12 = vpop.f32.mrb[42].mxu1  ;;  %v977_v13 = vpop.f32.mrb[43].mxu0 }
 0x14a   :  { %814 = vst [vmem:[%s1491_s3 + $0x98] sm:$0xff] %v793_v7  ;;  %v649_v14 = vadd.f32 %v975_v8, %v1402_v16  ;;  %v1059_v15 = vpop.f32.mrb[43].mxu1 }
 0x14c   :  { %v769_v17 = vadd.f32 %v1057_v11, %v649_v14 }
 0x14e   :  { %v794_v18 = vmax.f32 %v769_v17, 0.0 }
 0x150   :  { %815 = vst [vmem:[%s1491_s3 + $0xa0] sm:$0xff] %v794_v18 }

// kernel: dqn_rgb_forward.6
= control target key start
LH: loop header
LB: loop body
LE: loop exit
PB: predicated region body
PF: predicated region fallthrough
CT: control target
= control target key end

     0   :  { %v1205_v24 = vmov 0.0   ;;  %vm1206_vm0 = vmmov 0   ;;  %s1546_s1 = inlined_call_operand.vmem [shape: bf16[640,128], index: 1, kind: input, shape index: {}]   ;;  %s1547_s0 = inlined_call_operand.vmem [shape: bf16[104,640], index: 0, kind: input, shape index: {}]   ;;  %s1548_s2 = inlined_call_operand.vmem [shape: f32[1,128], index: 2, kind: input, shape index: {}]   ;;  %s1549_s3 = inlined_call_operand.vmem [shape: f32[104,128], index: 3, kind: output, shape index: {}]  }
   0x1   :  { %v1118_v0 = vld [vmem:[%s1546_s1 + $0x40] sm:$0xff]   ;;  %v1120_v2 = vld [vmem:[%s1546_s1 + $0x48] sm:$0xff]   ;;  %v1122_v4 = vld [vmem:[%s1546_s1 + $0x50] sm:$0xff]  }
   0x2   :  { %v1119_v1 = vld [vmem:[%s1546_s1] sm:$0xff]   ;;  %1100 = vmatprep.subr.bf16.mxu1 %v1118_v0  ;;  %925 = vmatprep.subr.bf16.mxu0 %v1118_v0  ;;  %v1121_v3 = vld [vmem:[%s1546_s1 + $0x8] sm:$0xff]   ;;  %v1123_v5 = vld [vmem:[%s1546_s1 + $0x10] sm:$0xff]  }
   0x3   :  { %1108 = vmatpush3.bf16.msra.mxu1 %v1119_v1  ;;  %926 = vmatpush3.bf16.msra.mxu0 %v1119_v1  ;;  %v1124_v6 = vld [vmem:[%s1546_s1 + $0x58] sm:$0xff]   ;;  %v1126_v8 = vld [vmem:[%s1546_s1 + $0x60] sm:$0xff]   ;;  %v1128_v10 = vld [vmem:[%s1546_s1 + $0x68] sm:$0xff]  }
   0x4   :  { %1101 = vmatprep.subr.bf16.mxu1 %v1120_v2  ;;  %927 = vmatprep.subr.bf16.mxu0 %v1120_v2  ;;  %v1125_v7 = vld [vmem:[%s1546_s1 + $0x18] sm:$0xff]   ;;  %v1127_v9 = vld [vmem:[%s1546_s1 + $0x20] sm:$0xff]   ;;  %v1129_v12 = vld [vmem:[%s1546_s1 + $0x28] sm:$0xff]  }
   0x5   :  { %v1136_v11 = vld [vmem:[%s1547_s0 + $0xa4] ss:$20 sps:$4 sm:$0xff]   ;;  %v1130_v14 = vld [vmem:[%s1546_s1 + $0x70] sm:$0xff]   ;;  %v1143_v23 = vld [vmem:[%s1546_s1 + $0xc8] sm:$0xff]  }
   0x6   :  { %v1140_v13 = vld [vmem:[%s1547_s0 + $0x4] ss:$20 sps:$4 sm:$0xff]   ;;  %619 = vmatprep.mubr.bf16.mxu1 %v1136_v11  ;;  %v1131_v15 = vld [vmem:[%s1546_s1 + $0x30] sm:$0xff]   ;;  %v1147_v25 = vld [vmem:[%s1547_s0 + $0x2c] ss:$20 sps:$4 sm:$0xff]  }
   0x7   :  { %1109 = vmatpush3.bf16.msra.mxu1 %v1121_v3  ;;  %928 = vmatpush3.bf16.msra.mxu0 %v1121_v3  ;;  %v1132_v16 = vld [vmem:[%s1546_s1 + $0x78] sm:$0xff]   ;;  %v1137_v18 = vld [vmem:[%s1546_s1 + $0xc0] sm:$0xff]   ;;  %v1144_v27 = vld [vmem:[%s1546_s1 + $0x88] sm:$0xff]  }
   0x8   :  { %1102 = vmatprep.subr.bf16.mxu1 %v1122_v4  ;;  %929 = vmatprep.subr.bf16.mxu0 %v1122_v4  ;;  %v1133_v17 = vld [vmem:[%s1546_s1 + $0x38] sm:$0xff]   ;;  %v1134_v19 = vld [vmem:[%s1547_s0 + $0xa0] ss:$20 sps:$4 sm:$0xff]   ;;  %v1145_v28 = vld [vmem:[%s1546_s1 + $0x108] sm:$0xff]  }
   0x9   :  { %587 = vmatprep.mubr.bf16.mxu0 %v1140_v13  ;;  %v1138_v20 = vld [vmem:[%s1547_s0] ss:$20 sps:$4 sm:$0xff]   ;;  %v1150_v31 = vld [vmem:[%s1547_s0 + $0x28] ss:$20 sps:$4 sm:$0xff]   ;;  %v1162_v42 = vld [vmem:[%s1547_s0 + $0x50] ss:$20 sps:$4 sm:$0xff]  }
   0xa   :  { %v1141_v21 = vld [vmem:[%s1546_s1 + $0x80] sm:$0xff]   ;;  %v1146_v29 = vld [vmem:[%s1546_s1 + $0xd0] sm:$0xff]   ;;  %v1155_v32 = vld [vmem:[%s1547_s0 + $0xc8] ss:$20 sps:$4 sm:$0xff]  }
   0xb   :  { %1110 = vmatpush3.bf16.msra.mxu1 %v1123_v5  ;;  %930 = vmatpush3.bf16.msra.mxu0 %v1123_v5  ;;  %v1142_v22 = vld [vmem:[%s1546_s1 + $0x100] sm:$0xff]   ;;  %v1149_v30 = vld [vmem:[%s1546_s1 + $0x90] sm:$0xff]   ;;  %v1154_v35 = vld [vmem:[%s1546_s1 + $0xd8] sm:$0xff]  }
   0xc   :  { %1103 = vmatprep.subr.bf16.mxu1 %v1124_v6  ;;  %931 = vmatprep.subr.bf16.mxu0 %v1124_v6  ;;  %v1152_v26 = vld [vmem:[%s1547_s0 + $0xcc] ss:$20 sps:$4 sm:$0xff]   ;;  %v51_v33 = vld [vmem:[%s1547_s0 + $0xf0] sm:$0xff]  ;;  %v1156_v38 = vld [vmem:[%s1546_s1 + $0x98] sm:$0xff]  }
   0xd   :  { %v1151_v34 = vld [vmem:[%s1546_s1 + $0x110] sm:$0xff]   ;;  %v881_v37 = vcombine.high %v51_v33, %v51_v33  ;;  %v1157_v39 = vld [vmem:[%s1546_s1 + $0x118] sm:$0xff]   ;;  %v1158_v40 = vld [vmem:[%s1546_s1 + $0xe0] sm:$0xff]   ;;  %v880_v43 = vcombine.low %v51_v33, %v51_v33 }
   0xe   :  { %v1159_v36 = vld [vmem:[%s1547_s0 + $0x54] ss:$20 sps:$4 sm:$0xff]   ;;  %v1161_v41 = vld [vmem:[%s1546_s1 + $0xa0] sm:$0xff]   ;;  %v1170_v46 = vld [vmem:[%s1547_s0 + $0x7c] ss:$20 sps:$4 sm:$0xff]  }
   0xf   :  { %1111 = vmatpush3.bf16.msra.mxu1 %v1125_v7  ;;  %932 = vmatpush3.bf16.msra.mxu0 %v1125_v7  ;;  %v1163_v44 = vld [vmem:[%s1546_s1 + $0x120] sm:$0xff]   ;;  %v1165_v45 = vld [vmem:[%s1546_s1 + $0xe8] sm:$0xff]   ;;  %v1169_v50 = vld [vmem:[%s1546_s1 + $0xf0] sm:$0xff]  }
  0x10   :  { %1104 = vmatprep.subr.bf16.mxu1 %v1126_v8  ;;  %933 = vmatprep.subr.bf16.mxu0 %v1126_v8  ;;  %v1179_v47 = vld [vmem:[%s1547_s0 + $0xc] ss:$20 sps:$4 sm:$0xff]   ;;  %v1172_v51 = vld [vmem:[%s1546_s1 + $0xb0] sm:$0xff]   ;;  %v1175_v54 = vld [vmem:[%s1546_s1 + $0xf8] sm:$0xff]  }
  0x11   :  { %v1167_v48 = vld [vmem:[%s1546_s1 + $0xa8] sm:$0xff]   ;;  %v1174_v53 = vld [vmem:[%s1546_s1 + $0x130] sm:$0xff]   ;;  %v1176_v55 = vld [vmem:[%s1546_s1 + $0xb8] sm:$0xff]  }
  0x12   :  { %v1168_v49 = vld [vmem:[%s1546_s1 + $0x128] sm:$0xff]   ;;  %v1180_v56 = vld [vmem:[%s1546_s1 + $0x138] sm:$0xff]   ;;  %v1181_v58 = vld [vmem:[%s1547_s0 + $0x10] ss:$20 sps:$4 sm:$0xff]  }
  0x13   :  { %1112 = vmatpush3.bf16.msra.mxu1 %v1127_v9  ;;  %934 = vmatpush3.bf16.msra.mxu0 %v1127_v9  ;;  %v1173_v52 = vld [vmem:[%s1547_s0 + $0x78] ss:$20 sps:$4 sm:$0xff]   ;;  %v1177_v57 = vld [vmem:[%s1547_s0 + $0x8] ss:$20 sps:$4 sm:$0xff]   ;;  %v1184_v60 = vld [vmem:[%s1547_s0 + $0x30] ss:$20 sps:$4 sm:$0xff]  }
  0x14   :  { %1105 = vmatprep.subr.bf16.mxu1 %v1128_v10  ;;  %935 = vmatprep.subr.bf16.mxu0 %v1128_v10  ;;  %v1182_v59 = vld [vmem:[%s1547_s0 + $0x34] ss:$20 sps:$4 sm:$0xff]   ;;  %v1185_v61 = vld [vmem:[%s1547_s0 + $0x38] ss:$20 sps:$4 sm:$0xff]   ;;  %v1186_v62 = vld [vmem:[%s1547_s0 + $0x5c] ss:$20 sps:$4 sm:$0xff]  }
  0x15   :  { %v1188_v63 = vld [vmem:[%s1547_s0 + $0x58] ss:$20 sps:$4 sm:$0xff]   ;;  %v1189_v0 = vld [vmem:[%s1547_s0 + $0x60] ss:$20 sps:$4 sm:$0xff]   ;;  %v1193_v3 = vld [vmem:[%s1547_s0 + $0x88] ss:$20 sps:$4 sm:$0xff]  }
  0x16   :  { %v1190_v1 = vld [vmem:[%s1547_s0 + $0x84] ss:$20 sps:$4 sm:$0xff]   ;;  %v1192_v2 = vld [vmem:[%s1547_s0 + $0x80] ss:$20 sps:$4 sm:$0xff]   ;;  %v1196_v5 = vld [vmem:[%s1547_s0 + $0xa8] ss:$20 sps:$4 sm:$0xff]  }
  0x17   :  { %1113 = vmatpush3.bf16.msra.mxu1 %v1129_v12  ;;  %936 = vmatpush3.bf16.msra.mxu0 %v1129_v12  ;;  %v1194_v4 = vld [vmem:[%s1547_s0 + $0xac] ss:$20 sps:$4 sm:$0xff]   ;;  %v1197_v6 = vld [vmem:[%s1547_s0 + $0xb0] ss:$20 sps:$4 sm:$0xff]   ;;  %v1198_v7 = vld [vmem:[%s1547_s0 + $0xd4] ss:$20 sps:$4 sm:$0xff]  }
  0x18   :  { %1106 = vmatprep.subr.bf16.mxu1 %v1130_v14  ;;  %937 = vmatprep.subr.bf16.mxu0 %v1130_v14  ;;  %v52_v8 = vld [vmem:[%s1547_s0 + $0xf8] sm:$0xff]  ;;  %v1200_v9 = vld [vmem:[%s1547_s0 + $0xd0] ss:$20 sps:$4 sm:$0xff]   ;;  %v1204_v13 = vld [vmem:[%s1547_s0 + $0x100] ss:$0 sps:$4 sm:$0xff]  }
  0x19   :  { %v1201_v10 = vld [vmem:[%s1547_s0 + $0xd8] ss:$20 sps:$4 sm:$0xff]   ;;  %v883_v11 = vcombine.high %v52_v8, %v52_v8  ;;  %v882_v12 = vcombine.low %v52_v8, %v52_v8 }
  0x1b   :  { %1114 = vmatpush3.bf16.msra.mxu1 %v1131_v15  ;;  %938 = vmatpush3.bf16.msra.mxu0 %v1131_v15 }
  0x1c   :  { %1107 = vmatprep.subr.bf16.mxu1 %v1132_v16  ;;  %939 = vmatprep.subr.bf16.mxu0 %v1132_v16 }
  0x1f   :  { %1115 = vmatpush3.bf16.msra.mxu1 %v1133_v17  ;;  %940 = vmatpush3.bf16.msra.mxu0 %v1133_v17 }
  0x20   :  { %983 = vmatprep.subr.bf16.mxu1 %v1137_v18  ;;  %1056 = vmatprep.subr.bf16.mxu0 %v1205_v24 }
  0x22   :  { %620 = vmatmul.mubr.bf16.vlgmr.msra.gmra.mrb[0].mxu1 %v1134_v19  ;;  %588 = vmatmul.mubr.bf16.vlgmr.msra.gmra.mrb[0].mxu0 %v1138_v20 }
  0x23   :  { %984 = vmatpush3.bf16.msra.mxu1 %v1141_v21  ;;  %1057 = vmatpush3.bf16.msra.mxu0 %v1142_v22 }
  0x24   :  { %985 = vmatprep.subr.bf16.mxu1 %v1143_v23  ;;  %1058 = vmatprep.subr.bf16.mxu0 %v1205_v24 }
  0x25   :  { %595 = vmatprep.mubr.bf16.mxu0 %v1147_v25  ;;  %627 = vmatprep.mubr.bf16.mxu1 %v1152_v26 }
  0x27   :  { %986 = vmatpush3.bf16.msra.mxu1 %v1144_v27  ;;  %1059 = vmatpush3.bf16.msra.mxu0 %v1145_v28 }
  0x28   :  { %987 = vmatprep.subr.bf16.mxu1 %v1146_v29  ;;  %1060 = vmatprep.subr.bf16.mxu0 %v1205_v24 }
  0x2a   :  { %596 = vmatmul.mubr.bf16.gmra.mrb[4].mxu0 %v1150_v31  ;;  %628 = vmatmul.mubr.bf16.gmra.mrb[4].mxu1 %v1155_v32 }
  0x2b   :  { %988 = vmatpush3.bf16.msra.mxu1 %v1149_v30  ;;  %1061 = vmatpush3.bf16.msra.mxu0 %v1151_v34 }
  0x2c   :  { %989 = vmatprep.subr.bf16.mxu1 %v1154_v35  ;;  %1062 = vmatprep.subr.bf16.mxu0 %v1205_v24 }
  0x2d   :  { %603 = vmatprep.mubr.bf16.mxu0 %v1159_v36  ;;  %635 = vmatprep.mubr.bf16.mxu1 %v881_v37 }
  0x2f   :  { %990 = vmatpush3.bf16.msra.mxu1 %v1156_v38  ;;  %1063 = vmatpush3.bf16.msra.mxu0 %v1157_v39 }
  0x30   :  { %991 = vmatprep.subr.bf16.mxu1 %v1158_v40  ;;  %1064 = vmatprep.subr.bf16.mxu0 %v1205_v24 }
  0x32   :  { %604 = vmatmul.mubr.bf16.gmra.mrb[8].mxu0 %v1162_v42  ;;  %636 = vmatmul.mubr.bf16.gmra.mrb[8].mxu1 %v880_v43 }
  0x33   :  { %992 = vmatpush3.bf16.msra.mxu1 %v1161_v41  ;;  %1065 = vmatpush3.bf16.msra.mxu0 %v1163_v44 }
  0x34   :  { %993 = vmatprep.subr.bf16.mxu1 %v1165_v45  ;;  %1066 = vmatprep.subr.bf16.mxu0 %v1205_v24 }
  0x35   :  { %611 = vmatprep.mubr.bf16.mxu0 %v1170_v46  ;;  %675 = vmatprep.mubr.bf16.mxu1 %v1179_v47 }
  0x37   :  { %994 = vmatpush3.bf16.msra.mxu1 %v1167_v48  ;;  %1067 = vmatpush3.bf16.msra.mxu0 %v1168_v49 }
  0x38   :  { %995 = vmatprep.subr.bf16.mxu1 %v1169_v50  ;;  %1068 = vmatprep.subr.bf16.mxu0 %v1205_v24 }
  0x3a   :  { %612 = vmatmul.mubr.bf16.gmra.mrb[12].mxu0 %v1173_v52 }
  0x3b   :  { %996 = vmatpush3.bf16.msra.mxu1 %v1172_v51  ;;  %1069 = vmatpush3.bf16.msra.mxu0 %v1174_v53 }
  0x3c   :  { %997 = vmatprep.subr.bf16.mxu1 %v1175_v54  ;;  %1070 = vmatprep.subr.bf16.mxu0 %v1205_v24 }
  0x3d   :  { %1072 = vmatprep.mubr.msk.bf16.mxu0 %vm1206_vm0, %v1205_v24 }
  0x3f   :  { %998 = vmatpush3.bf16.msra.mxu1 %v1176_v55  ;;  %1071 = vmatpush3.bf16.msra.mxu0 %v1180_v56 }
  0x42   :  { %676 = vmatmul.mubr.bf16.vlgmr.msra.gmra.mrb[12].mxu1 %v1177_v57  ;;  %1073 = vmatmul.mubr.bf16.vlgmr.msra.gmra.mrb[16].mxu0 %v1181_v58  ;;  %v1485_v57 = vld [vmem:[%s1548_s2] ss:$0 sm:$0xff] }
  0x43   :  { %683 = vmatprep.mubr.bf16.mxu1 %v1182_v59  ;;  %1076 = vmatprep.mubr.msk.bf16.mxu0 %vm1206_vm0, %v1205_v24 }
  0x4a   :  { %684 = vmatmul.mubr.bf16.gmra.mrb[16].mxu1 %v1184_v60  ;;  %1077 = vmatmul.mubr.bf16.gmra.mrb[20].mxu0 %v1185_v61 }
  0x4b   :  { %691 = vmatprep.mubr.bf16.mxu1 %v1186_v62  ;;  %1080 = vmatprep.mubr.msk.bf16.mxu0 %vm1206_vm0, %v1205_v24 }
  0x52   :  { %692 = vmatmul.mubr.bf16.gmra.mrb[20].mxu1 %v1188_v63  ;;  %1081 = vmatmul.mubr.bf16.gmra.mrb[24].mxu0 %v1189_v0 }
  0x53   :  { %699 = vmatprep.mubr.bf16.mxu1 %v1190_v1  ;;  %1084 = vmatprep.mubr.msk.bf16.mxu0 %vm1206_vm0, %v1205_v24 }
  0x5a   :  { %700 = vmatmul.mubr.bf16.gmra.mrb[24].mxu1 %v1192_v2  ;;  %1085 = vmatmul.mubr.bf16.gmra.mrb[28].mxu0 %v1193_v3 }
  0x5b   :  { %707 = vmatprep.mubr.bf16.mxu1 %v1194_v4  ;;  %1088 = vmatprep.mubr.msk.bf16.mxu0 %vm1206_vm0, %v1205_v24 }
  0x62   :  { %708 = vmatmul.mubr.bf16.gmra.mrb[28].mxu1 %v1196_v5  ;;  %1089 = vmatmul.mubr.bf16.gmra.mrb[32].mxu0 %v1197_v6 }
  0x63   :  { %715 = vmatprep.mubr.bf16.mxu1 %v1198_v7  ;;  %1092 = vmatprep.mubr.msk.bf16.mxu0 %vm1206_vm0, %v1205_v24 }
  0x6a   :  { %716 = vmatmul.mubr.bf16.gmra.mrb[32].mxu1 %v1200_v9  ;;  %1093 = vmatmul.mubr.bf16.gmra.mrb[36].mxu0 %v1201_v10 }
  0x6b   :  { %723 = vmatprep.mubr.bf16.mxu1 %v883_v11  ;;  %1096 = vmatprep.mubr.msk.bf16.mxu0 %vm1206_vm0, %v1205_v24 }
  0x72   :  { %724 = vmatmul.mubr.bf16.gmra.mrb[36].mxu1 %v882_v12  ;;  %1097 = vmatmul.mubr.bf16.gmra.mrb[40].mxu0 %v1204_v13 }
  0xf5   :  { %v965_v14 = vpop.f32.mrb[0].mxu1  ;;  %v941_v15 = vpop.f32.mrb[0].mxu0 }
  0xf6   :  { %v966_v16 = vpop.f32.mrb[1].mxu1  ;;  %v942_v17 = vpop.f32.mrb[1].mxu0 }
  0xf7   :  { %v1468_v18 = vadd.f32 %v966_v16, %v965_v14  ;;  %v968_v19 = vpop.f32.mrb[2].mxu1  ;;  %v943_v20 = vadd.f32 %v942_v17, %v941_v15  ;;  %v944_v21 = vpop.f32.mrb[2].mxu0 }
  0xf8   :  { %v969_v22 = vpop.f32.mrb[3].mxu1  ;;  %v945_v23 = vpop.f32.mrb[3].mxu0 }
  0xf9   :  { %v1470_v25 = vadd.f32 %v969_v22, %v968_v19  ;;  %v946_v24 = vadd.f32 %v945_v23, %v944_v21  ;;  %v590_v60 = vadd.f32 %v943_v20, %v1485_v57 }
  0xfb   :  { %v593_v2 = vadd.f32 %v946_v24, %v1485_v57 }
  0xfd   :  { %v947_v26 = vpop.f32.mrb[4].mxu0  ;;  %v971_v27 = vpop.f32.mrb[4].mxu1 }
  0xfe   :  { %v948_v28 = vpop.f32.mrb[5].mxu0  ;;  %v972_v29 = vpop.f32.mrb[5].mxu1 }
  0xff   :  { %v949_v30 = vadd.f32 %v948_v28, %v947_v26  ;;  %v950_v31 = vpop.f32.mrb[6].mxu0  ;;  %v1472_v32 = vadd.f32 %v972_v29, %v971_v27  ;;  %v974_v33 = vpop.f32.mrb[6].mxu1 }
 0x100   :  { %v951_v34 = vpop.f32.mrb[7].mxu0  ;;  %v975_v35 = vpop.f32.mrb[7].mxu1 }
 0x101   :  { %v952_v36 = vadd.f32 %v951_v34, %v950_v31  ;;  %v1474_v37 = vadd.f32 %v975_v35, %v974_v33  ;;  %v598_v13 = vadd.f32 %v949_v30, %v1485_v57 }
 0x103   :  { %v601_v21 = vadd.f32 %v952_v36, %v1485_v57 }
 0x105   :  { %v953_v38 = vpop.f32.mrb[8].mxu0  ;;  %v977_v39 = vpop.f32.mrb[8].mxu1 }
 0x106   :  { %v954_v40 = vpop.f32.mrb[9].mxu0  ;;  %v978_v41 = vpop.f32.mrb[9].mxu1 }
 0x107   :  { %v955_v42 = vadd.f32 %v954_v40, %v953_v38  ;;  %v956_v43 = vpop.f32.mrb[10].mxu0  ;;  %v1476_v44 = vadd.f32 %v978_v41, %v977_v39  ;;  %v980_v45 = vpop.f32.mrb[10].mxu1 }
 0x108   :  { %v957_v46 = vpop.f32.mrb[11].mxu0  ;;  %v981_v47 = vpop.f32.mrb[11].mxu1 }
 0x109   :  { %v958_v48 = vadd.f32 %v957_v46, %v956_v43  ;;  %v606_v34 = vadd.f32 %v955_v42, %v1485_v57 }
 0x10b   :  { %v609_v43 = vadd.f32 %v958_v48, %v1485_v57 }
 0x10d   :  { %v959_v49 = vpop.f32.mrb[12].mxu0 }
 0x10e   :  { %v960_v50 = vpop.f32.mrb[13].mxu0 }
 0x10f   :  { %v1478_v51 = vadd.f32 %v960_v50, %v959_v49  ;;  %v962_v52 = vpop.f32.mrb[14].mxu0 }
 0x110   :  { %v963_v53 = vpop.f32.mrb[15].mxu0 }
 0x111   :  { %v1480_v54 = vadd.f32 %v963_v53, %v962_v52 }
 0x115   :  { %v999_v55 = vpop.f32.mrb[12].mxu1  ;;  %v765_v56 = vpop.f32.mrb[16].mxu0 }
 0x116   :  { %v1000_v58 = vpop.f32.mrb[13].mxu1  ;;  %v1074_v59 = vpop.f32.mrb[17].mxu0 }
 0x117   :  { %v1001_v61 = vadd.f32 %v1000_v58, %v999_v55  ;;  %v1002_v62 = vpop.f32.mrb[14].mxu1  ;;  %v768_v63 = vpop.f32.mrb[18].mxu0  ;;  %v614_v58 = vadd.f32 %v1478_v51, %v1485_v57 }
 0x118   :  { %v1003_v0 = vpop.f32.mrb[15].mxu1  ;;  %v1075_v1 = vpop.f32.mrb[19].mxu0 }
 0x119   :  { %v678_v3 = vadd.f32 %v1001_v61, %v590_v60  ;;  %v1004_v4 = vadd.f32 %v1003_v0, %v1002_v62  ;;  %v617_v0 = vadd.f32 %v1480_v54, %v1485_v57 }
 0x11b   :  { %v766_v5 = vadd.f32 %v765_v56, %v678_v3  ;;  %v681_v6 = vadd.f32 %v1004_v4, %v593_v2 }
 0x11d   :  { %v819_v7 = vmax.f32 %v766_v5, 0.0  ;;  %v769_v8 = vadd.f32 %v768_v63, %v681_v6  ;;  %v1005_v9 = vpop.f32.mrb[16].mxu1  ;;  %v773_v10 = vpop.f32.mrb[20].mxu0 }
 0x11e   :  { %v1006_v11 = vpop.f32.mrb[17].mxu1  ;;  %v1078_v12 = vpop.f32.mrb[21].mxu0 }
 0x11f   :  { %832 = vst [vmem:[%s1549_s3] sm:$0xff] %v819_v7  ;;  %v820_v14 = vmax.f32 %v769_v8, 0.0  ;;  %v1007_v15 = vadd.f32 %v1006_v11, %v1005_v9  ;;  %v1008_v16 = vpop.f32.mrb[18].mxu1  ;;  %v776_v17 = vpop.f32.mrb[22].mxu0 }
 0x120   :  { %v1009_v19 = vpop.f32.mrb[19].mxu1  ;;  %v1079_v20 = vpop.f32.mrb[23].mxu0 }
 0x121   :  { %833 = vst [vmem:[%s1549_s3 + $0x8] sm:$0xff] %v820_v14  ;;  %v686_v22 = vadd.f32 %v1007_v15, %v598_v13  ;;  %v1010_v23 = vadd.f32 %v1009_v19, %v1008_v16  ;;  %v625_v16 = vadd.f32 %v1470_v25, %v1485_v57 }
 0x123   :  { %v774_v24 = vadd.f32 %v773_v10, %v686_v22  ;;  %v689_v26 = vadd.f32 %v1010_v23, %v601_v21  ;;  %v622_v10 = vadd.f32 %v1468_v18, %v1485_v57 }
 0x125   :  { %v821_v27 = vmax.f32 %v774_v24, 0.0  ;;  %v777_v28 = vadd.f32 %v776_v17, %v689_v26  ;;  %v1011_v29 = vpop.f32.mrb[20].mxu1  ;;  %v781_v30 = vpop.f32.mrb[24].mxu0 }
 0x126   :  { %v1012_v31 = vpop.f32.mrb[21].mxu1  ;;  %v1082_v33 = vpop.f32.mrb[25].mxu0 }
 0x127   :  { %834 = vst [vmem:[%s1549_s3 + $0x10] sm:$0xff] %v821_v27  ;;  %v822_v35 = vmax.f32 %v777_v28, 0.0  ;;  %v1013_v36 = vadd.f32 %v1012_v31, %v1011_v29  ;;  %v1014_v38 = vpop.f32.mrb[22].mxu1  ;;  %v784_v39 = vpop.f32.mrb[26].mxu0  ;;  %v630_v28 = vadd.f32 %v1472_v32, %v1485_v57 }
 0x128   :  { %v1015_v40 = vpop.f32.mrb[23].mxu1  ;;  %v1083_v41 = vpop.f32.mrb[27].mxu0 }
 0x129   :  { %835 = vst [vmem:[%s1549_s3 + $0x18] sm:$0xff] %v822_v35  ;;  %v694_v45 = vadd.f32 %v1013_v36, %v606_v34  ;;  %v1016_v46 = vadd.f32 %v1015_v40, %v1014_v38  ;;  %v633_v35 = vadd.f32 %v1474_v37, %v1485_v57 }
 0x12b   :  { %v782_v47 = vadd.f32 %v781_v30, %v694_v45  ;;  %v697_v42 = vadd.f32 %v1016_v46, %v609_v43 }
 0x12d   :  { %v823_v49 = vmax.f32 %v782_v47, 0.0  ;;  %v785_v50 = vadd.f32 %v784_v39, %v697_v42  ;;  %v1017_v52 = vpop.f32.mrb[24].mxu1  ;;  %v789_v53 = vpop.f32.mrb[28].mxu0  ;;  %v638_v42 = vadd.f32 %v1476_v44, %v1485_v57 }
 0x12e   :  { %v1018_v55 = vpop.f32.mrb[25].mxu1  ;;  %v1086_v56 = vpop.f32.mrb[29].mxu0 }
 0x12f   :  { %836 = vst [vmem:[%s1549_s3 + $0x20] sm:$0xff] %v823_v49  ;;  %v824_v48 = vmax.f32 %v785_v50, 0.0  ;;  %v1019_v59 = vadd.f32 %v1018_v55, %v1017_v52  ;;  %v1020_v60 = vpop.f32.mrb[26].mxu1  ;;  %v792_v61 = vpop.f32.mrb[30].mxu0 }
 0x130   :  { %v1021_v62 = vpop.f32.mrb[27].mxu1  ;;  %v1087_v63 = vpop.f32.mrb[31].mxu0 }
 0x131   :  { %837 = vst [vmem:[%s1549_s3 + $0x28] sm:$0xff] %v824_v48  ;;  %v702_v1 = vadd.f32 %v1019_v59, %v614_v58  ;;  %v1022_v2 = vadd.f32 %v1021_v62, %v1020_v60 }
 0x133   :  { %v790_v51 = vadd.f32 %v789_v53, %v702_v1  ;;  %v705_v3 = vadd.f32 %v1022_v2, %v617_v0 }
 0x135   :  { %v825_v4 = vmax.f32 %v790_v51, 0.0  ;;  %v793_v5 = vadd.f32 %v792_v61, %v705_v3  ;;  %v1023_v6 = vpop.f32.mrb[28].mxu1  ;;  %v797_v7 = vpop.f32.mrb[32].mxu0 }
 0x136   :  { %v1024_v8 = vpop.f32.mrb[29].mxu1  ;;  %v1090_v9 = vpop.f32.mrb[33].mxu0 }
 0x137   :  { %838 = vst [vmem:[%s1549_s3 + $0x30] sm:$0xff] %v825_v4  ;;  %v826_v54 = vmax.f32 %v793_v5, 0.0  ;;  %v1025_v11 = vadd.f32 %v1024_v8, %v1023_v6  ;;  %v1026_v12 = vpop.f32.mrb[30].mxu1  ;;  %v800_v13 = vpop.f32.mrb[34].mxu0 }
 0x138   :  { %v1027_v14 = vpop.f32.mrb[31].mxu1  ;;  %v1091_v15 = vpop.f32.mrb[35].mxu0 }
 0x139   :  { %839 = vst [vmem:[%s1549_s3 + $0x38] sm:$0xff] %v826_v54  ;;  %v710_v17 = vadd.f32 %v1025_v11, %v622_v10  ;;  %v1028_v19 = vadd.f32 %v1027_v14, %v1026_v12 }
 0x13b   :  { %v798_v18 = vadd.f32 %v797_v7, %v710_v17  ;;  %v713_v20 = vadd.f32 %v1028_v19, %v625_v16 }
 0x13d   :  { %v827_v21 = vmax.f32 %v798_v18, 0.0  ;;  %v801_v22 = vadd.f32 %v800_v13, %v713_v20  ;;  %v1029_v23 = vpop.f32.mrb[32].mxu1  ;;  %v805_v24 = vpop.f32.mrb[36].mxu0 }
 0x13e   :  { %v1030_v26 = vpop.f32.mrb[33].mxu1  ;;  %v1094_v27 = vpop.f32.mrb[37].mxu0 }
 0x13f   :  { %840 = vst [vmem:[%s1549_s3 + $0x40] sm:$0xff] %v827_v21  ;;  %v828_v25 = vmax.f32 %v801_v22, 0.0  ;;  %v1031_v29 = vadd.f32 %v1030_v26, %v1029_v23  ;;  %v1032_v30 = vpop.f32.mrb[34].mxu1  ;;  %v808_v31 = vpop.f32.mrb[38].mxu0 }
 0x140   :  { %v1033_v33 = vpop.f32.mrb[35].mxu1  ;;  %v1095_v34 = vpop.f32.mrb[39].mxu0 }
 0x141   :  { %841 = vst [vmem:[%s1549_s3 + $0x48] sm:$0xff] %v828_v25  ;;  %v718_v36 = vadd.f32 %v1031_v29, %v630_v28  ;;  %v1034_v38 = vadd.f32 %v1033_v33, %v1032_v30 }
 0x143   :  { %v806_v32 = vadd.f32 %v805_v24, %v718_v36  ;;  %v721_v39 = vadd.f32 %v1034_v38, %v633_v35 }
 0x145   :  { %v829_v40 = vmax.f32 %v806_v32, 0.0  ;;  %v809_v41 = vadd.f32 %v808_v31, %v721_v39  ;;  %v1035_v43 = vpop.f32.mrb[36].mxu1  ;;  %v813_v45 = vpop.f32.mrb[40].mxu0 }
 0x146   :  { %v1036_v46 = vpop.f32.mrb[37].mxu1  ;;  %v1098_v47 = vpop.f32.mrb[41].mxu0 }
 0x147   :  { %842 = vst [vmem:[%s1549_s3 + $0x50] sm:$0xff] %v829_v40  ;;  %v830_v37 = vmax.f32 %v809_v41, 0.0  ;;  %v1037_v49 = vadd.f32 %v1036_v46, %v1035_v43  ;;  %v1038_v50 = vpop.f32.mrb[38].mxu1  ;;  %v816_v52 = vpop.f32.mrb[42].mxu0 }
 0x148   :  { %v1039_v53 = vpop.f32.mrb[39].mxu1  ;;  %v1099_v55 = vpop.f32.mrb[43].mxu0 }
 0x149   :  { %843 = vst [vmem:[%s1549_s3 + $0x58] sm:$0xff] %v830_v37  ;;  %v726_v56 = vadd.f32 %v1037_v49, %v638_v42 }
 0x14b   :  { %v814_v58 = vadd.f32 %v813_v45, %v726_v56 }
 0x14d   :  { %v831_v48 = vmax.f32 %v814_v58, 0.0 }
 0x14f   :  { %844 = vst [vmem:[%s1549_s3 + $0x60] sm:$0xff] %v831_v48 }

// kernel: dqn_rgb_forward.7
= control target key start
LH: loop header
LB: loop body
LE: loop exit
PB: predicated region body
PF: predicated region fallthrough
CT: control target
= control target key end

     0   :  { %s11267_s1 = inlined_call_operand.vmem [shape: bf16[3200,512], index: 1, kind: input, shape index: {}]   ;;  %s11268_s0 = inlined_call_operand.vmem [shape: bf16[8,3200], index: 0, kind: input, shape index: {}]   ;;  %s11269_s3 = inlined_call_operand.vmem [shape: bf16[512,128], index: 3, kind: input, shape index: {}]   ;;  %s11270_s2 = inlined_call_operand.vmem [shape: f32[1,512], index: 2, kind: input, shape index: {}]   ;;  %s11271_s4 = inlined_call_operand.vmem [shape: f32[1,128], index: 4, kind: input, shape index: {}]   ;;  %s11272_s5 = inlined_call_operand.vmem [shape: f32[8,128], index: 5, kind: output, shape index: {}]  }
   0x1   :  { %v7369_v0 = vld [vmem:[%s11267_s1 + $0x4] ss:$16 sps:$4 sm:$0xff]   ;;  %v7371_v1 = vld [vmem:[%s11267_s1 + $0xc] ss:$16 sps:$4 sm:$0xff]   ;;  %v7373_v2 = vld [vmem:[%s11267_s1] ss:$16 sps:$4 sm:$0xff]  }
   0x2   :  { %4944 = vmatprep.subr.bf16.mxu0 %v7369_v0  ;;  %v7374_v3 = vld [vmem:[%s11267_s1 + $0x8] ss:$16 sps:$4 sm:$0xff]   ;;  %5477 = vmatprep.subr.bf16.mxu1 %v7371_v1  ;;  %v7375_v4 = vld [vmem:[%s11267_s1 + $0x24] ss:$16 sps:$4 sm:$0xff]   ;;  %v7377_v5 = vld [vmem:[%s11267_s1 + $0x2c] ss:$16 sps:$4 sm:$0xff]  }
   0x3   :  { %4945 = vmatpush1.bf16.msra.mxu0 %v7373_v2  ;;  %5478 = vmatpush1.bf16.msra.mxu1 %v7374_v3  ;;  %v7379_v6 = vld [vmem:[%s11267_s1 + $0x20] ss:$16 sps:$4 sm:$0xff]   ;;  %v7380_v7 = vld [vmem:[%s11267_s1 + $0x28] ss:$16 sps:$4 sm:$0xff]   ;;  %v7381_v8 = vld [vmem:[%s11267_s1 + $0x44] ss:$16 sps:$4 sm:$0xff]  }
   0x4   :  { %4946 = vmatprep.subr.bf16.mxu0 %v7375_v4  ;;  %5479 = vmatprep.subr.bf16.mxu1 %v7377_v5  ;;  %v7383_v9 = vld [vmem:[%s11267_s1 + $0x4c] ss:$16 sps:$4 sm:$0xff]   ;;  %v7385_v10 = vld [vmem:[%s11267_s1 + $0x40] ss:$16 sps:$4 sm:$0xff]   ;;  %v7386_v11 = vld [vmem:[%s11267_s1 + $0x48] ss:$16 sps:$4 sm:$0xff]  }
   0x5   :  { %v7387_v12 = vld [vmem:[%s11267_s1 + $0x64] ss:$16 sps:$4 sm:$0xff]   ;;  %v7389_v13 = vld [vmem:[%s11267_s1 + $0x6c] ss:$16 sps:$4 sm:$0xff]   ;;  %v7391_v14 = vld [vmem:[%s11267_s1 + $0x60] ss:$16 sps:$4 sm:$0xff]  }
   0x6   :  { %v7392_v15 = vld [vmem:[%s11267_s1 + $0x68] ss:$16 sps:$4 sm:$0xff]   ;;  %v7393_v16 = vld [vmem:[%s11267_s1 + $0x84] ss:$16 sps:$4 sm:$0xff]   ;;  %v7395_v17 = vld [vmem:[%s11267_s1 + $0x8c] ss:$16 sps:$4 sm:$0xff]  }
   0x7   :  { %4947 = vmatpush1.bf16.msra.mxu0 %v7379_v6  ;;  %5480 = vmatpush1.bf16.msra.mxu1 %v7380_v7  ;;  %v7397_v18 = vld [vmem:[%s11267_s1 + $0x80] ss:$16 sps:$4 sm:$0xff]   ;;  %v7398_v19 = vld [vmem:[%s11267_s1 + $0x88] ss:$16 sps:$4 sm:$0xff]   ;;  %v7399_v20 = vld [vmem:[%s11267_s1 + $0xa4] ss:$16 sps:$4 sm:$0xff]  }
   0x8   :  { %4948 = vmatprep.subr.bf16.mxu0 %v7381_v8  ;;  %5481 = vmatprep.subr.bf16.mxu1 %v7383_v9  ;;  %v7401_v21 = vld [vmem:[%s11267_s1 + $0xac] ss:$16 sps:$4 sm:$0xff]   ;;  %v7403_v22 = vld [vmem:[%s11267_s1 + $0xa0] ss:$16 sps:$4 sm:$0xff]   ;;  %v7404_v23 = vld [vmem:[%s11267_s1 + $0xa8] ss:$16 sps:$4 sm:$0xff]  }
   0x9   :  { %v7405_v24 = vld [vmem:[%s11267_s1 + $0xc4] ss:$16 sps:$4 sm:$0xff]   ;;  %v7407_v25 = vld [vmem:[%s11267_s1 + $0xcc] ss:$16 sps:$4 sm:$0xff]   ;;  %v7409_v26 = vld [vmem:[%s11267_s1 + $0xc0] ss:$16 sps:$4 sm:$0xff]  }
   0xa   :  { %v7410_v27 = vld [vmem:[%s11267_s1 + $0xc8] ss:$16 sps:$4 sm:$0xff]   ;;  %v7411_v28 = vld [vmem:[%s11267_s1 + $0xe4] ss:$16 sps:$4 sm:$0xff]   ;;  %v7413_v29 = vld [vmem:[%s11267_s1 + $0xec] ss:$16 sps:$4 sm:$0xff]  }
   0xb   :  { %4949 = vmatpush1.bf16.msra.mxu0 %v7385_v10  ;;  %5482 = vmatpush1.bf16.msra.mxu1 %v7386_v11  ;;  %v7415_v30 = vld [vmem:[%s11267_s1 + $0xe0] ss:$16 sps:$4 sm:$0xff]   ;;  %v7416_v31 = vld [vmem:[%s11267_s1 + $0xe8] ss:$16 sps:$4 sm:$0xff]   ;;  %v7417_v32 = vld [vmem:[%s11267_s1 + $0x104] ss:$16 sps:$4 sm:$0xff]  }
   0xc   :  { %4950 = vmatprep.subr.bf16.mxu0 %v7387_v12  ;;  %5483 = vmatprep.subr.bf16.mxu1 %v7389_v13  ;;  %v7419_v33 = vld [vmem:[%s11267_s1 + $0x10c] ss:$16 sps:$4 sm:$0xff]   ;;  %v7421_v34 = vld [vmem:[%s11267_s1 + $0x100] ss:$16 sps:$4 sm:$0xff]   ;;  %v7422_v35 = vld [vmem:[%s11267_s1 + $0x108] ss:$16 sps:$4 sm:$0xff]  }
   0xd   :  { %v7423_v36 = vld [vmem:[%s11267_s1 + $0x124] ss:$16 sps:$4 sm:$0xff]   ;;  %v7425_v37 = vld [vmem:[%s11267_s1 + $0x12c] ss:$16 sps:$4 sm:$0xff]   ;;  %v7427_v38 = vld [vmem:[%s11267_s1 + $0x120] ss:$16 sps:$4 sm:$0xff]  }
   0xe   :  { %v7428_v39 = vld [vmem:[%s11267_s1 + $0x128] ss:$16 sps:$4 sm:$0xff]   ;;  %v7429_v40 = vld [vmem:[%s11267_s1 + $0x144] ss:$16 sps:$4 sm:$0xff]   ;;  %v7431_v41 = vld [vmem:[%s11267_s1 + $0x14c] ss:$16 sps:$4 sm:$0xff]  }
   0xf   :  { %4951 = vmatpush1.bf16.msra.mxu0 %v7391_v14  ;;  %5484 = vmatpush1.bf16.msra.mxu1 %v7392_v15  ;;  %v7433_v42 = vld [vmem:[%s11267_s1 + $0x140] ss:$16 sps:$4 sm:$0xff]   ;;  %v7434_v43 = vld [vmem:[%s11267_s1 + $0x148] ss:$16 sps:$4 sm:$0xff]   ;;  %v7435_v44 = vld [vmem:[%s11267_s1 + $0x164] ss:$16 sps:$4 sm:$0xff]  }
  0x10   :  { %4952 = vmatprep.subr.bf16.mxu0 %v7393_v16  ;;  %5485 = vmatprep.subr.bf16.mxu1 %v7395_v17  ;;  %v7437_v45 = vld [vmem:[%s11267_s1 + $0x16c] ss:$16 sps:$4 sm:$0xff]   ;;  %v21_v46 = vld [vmem:[%s11268_s0] sm:$0xff]  ;;  %v7440_v49 = vld [vmem:[%s11267_s1 + $0x168] ss:$16 sps:$4 sm:$0xff]  }
  0x11   :  { %v7439_v47 = vld [vmem:[%s11267_s1 + $0x160] ss:$16 sps:$4 sm:$0xff]   ;;  %v6367_v48 = vcombine.high %v21_v46, %v21_v46  ;;  %v7441_v50 = vld [vmem:[%s11267_s1 + $0x184] ss:$16 sps:$4 sm:$0xff]   ;;  %v7443_v51 = vld [vmem:[%s11267_s1 + $0x18c] ss:$16 sps:$4 sm:$0xff]   ;;  %v6366_v4 = vcombine.low %v21_v46, %v21_v46 }
  0x12   :  { %v7445_v52 = vld [vmem:[%s11267_s1 + $0x180] ss:$16 sps:$4 sm:$0xff]   ;;  %v7446_v53 = vld [vmem:[%s11267_s1 + $0x188] ss:$16 sps:$4 sm:$0xff]   ;;  %v7447_v54 = vld [vmem:[%s11267_s1 + $0x1a4] ss:$16 sps:$4 sm:$0xff]  }
  0x13   :  { %4953 = vmatpush1.bf16.msra.mxu0 %v7397_v18  ;;  %5486 = vmatpush1.bf16.msra.mxu1 %v7398_v19  ;;  %v7449_v55 = vld [vmem:[%s11267_s1 + $0x1ac] ss:$16 sps:$4 sm:$0xff]   ;;  %v7451_v56 = vld [vmem:[%s11267_s1 + $0x1a0] ss:$16 sps:$4 sm:$0xff]   ;;  %v7452_v57 = vld [vmem:[%s11267_s1 + $0x1a8] ss:$16 sps:$4 sm:$0xff]  }
  0x14   :  { %4954 = vmatprep.subr.bf16.mxu0 %v7399_v20  ;;  %5487 = vmatprep.subr.bf16.mxu1 %v7401_v21  ;;  %v7453_v58 = vld [vmem:[%s11267_s1 + $0x1c4] ss:$16 sps:$4 sm:$0xff]   ;;  %v7455_v59 = vld [vmem:[%s11267_s1 + $0x1cc] ss:$16 sps:$4 sm:$0xff]   ;;  %v7457_v60 = vld [vmem:[%s11267_s1 + $0x1c0] ss:$16 sps:$4 sm:$0xff]  }
  0x15   :  { %4976 = vmatprep.mubr.bf16.mxu0 %v6367_v48  ;;  %5509 = vmatprep.mubr.bf16.mxu1 %v6367_v48  ;;  %v7458_v61 = vld [vmem:[%s11267_s1 + $0x1c8] ss:$16 sps:$4 sm:$0xff]   ;;  %v7459_v62 = vld [vmem:[%s11267_s1 + $0x1e4] ss:$16 sps:$4 sm:$0xff]   ;;  %v7461_v63 = vld [vmem:[%s11267_s1 + $0x1ec] ss:$16 sps:$4 sm:$0xff]  }
  0x16   :  { %v7463_v0 = vld [vmem:[%s11267_s1 + $0x1e0] ss:$16 sps:$4 sm:$0xff]   ;;  %v7464_v1 = vld [vmem:[%s11267_s1 + $0x1e8] ss:$16 sps:$4 sm:$0xff]   ;;  %v7469_v2 = vld [vmem:[%s11267_s1 + $0x204] ss:$16 sps:$4 sm:$0xff]  }
  0x17   :  { %4955 = vmatpush1.bf16.msra.mxu0 %v7403_v22  ;;  %5488 = vmatpush1.bf16.msra.mxu1 %v7404_v23  ;;  %v7472_v3 = vld [vmem:[%s11267_s1 + $0x20c] ss:$16 sps:$4 sm:$0xff]   ;;  %v7467_v5 = vld [vmem:[%s11267_s1 + $0x200] ss:$16 sps:$4 sm:$0xff]   ;;  %v7470_v6 = vld [vmem:[%s11267_s1 + $0x208] ss:$16 sps:$4 sm:$0xff]  }
  0x18   :  { %4956 = vmatprep.subr.bf16.mxu0 %v7405_v24  ;;  %5489 = vmatprep.subr.bf16.mxu1 %v7407_v25  ;;  %v7475_v7 = vld [vmem:[%s11267_s1 + $0x224] ss:$16 sps:$4 sm:$0xff]   ;;  %v7478_v8 = vld [vmem:[%s11267_s1 + $0x22c] ss:$16 sps:$4 sm:$0xff]   ;;  %v7473_v9 = vld [vmem:[%s11267_s1 + $0x220] ss:$16 sps:$4 sm:$0xff]  }
  0x19   :  { %v7476_v10 = vld [vmem:[%s11267_s1 + $0x228] ss:$16 sps:$4 sm:$0xff]   ;;  %v7481_v11 = vld [vmem:[%s11267_s1 + $0x244] ss:$16 sps:$4 sm:$0xff]   ;;  %v7484_v12 = vld [vmem:[%s11267_s1 + $0x24c] ss:$16 sps:$4 sm:$0xff]  }
  0x1a   :  { %v7479_v13 = vld [vmem:[%s11267_s1 + $0x240] ss:$16 sps:$4 sm:$0xff]   ;;  %v7482_v14 = vld [vmem:[%s11267_s1 + $0x248] ss:$16 sps:$4 sm:$0xff]   ;;  %v7487_v15 = vld [vmem:[%s11267_s1 + $0x264] ss:$16 sps:$4 sm:$0xff]  }
  0x1b   :  { %4957 = vmatpush1.bf16.msra.mxu0 %v7409_v26  ;;  %5490 = vmatpush1.bf16.msra.mxu1 %v7410_v27  ;;  %v7490_v16 = vld [vmem:[%s11267_s1 + $0x26c] ss:$16 sps:$4 sm:$0xff]   ;;  %v7485_v17 = vld [vmem:[%s11267_s1 + $0x260] ss:$16 sps:$4 sm:$0xff]   ;;  %v7488_v18 = vld [vmem:[%s11267_s1 + $0x268] ss:$16 sps:$4 sm:$0xff]  }
  0x1c   :  { %4958 = vmatprep.subr.bf16.mxu0 %v7411_v28  ;;  %5491 = vmatprep.subr.bf16.mxu1 %v7413_v29  ;;  %v7493_v19 = vld [vmem:[%s11267_s1 + $0x284] ss:$16 sps:$4 sm:$0xff]   ;;  %v7496_v20 = vld [vmem:[%s11267_s1 + $0x28c] ss:$16 sps:$4 sm:$0xff]   ;;  %v7491_v21 = vld [vmem:[%s11267_s1 + $0x280] ss:$16 sps:$4 sm:$0xff]  }
  0x1d   :  { %v7494_v22 = vld [vmem:[%s11267_s1 + $0x288] ss:$16 sps:$4 sm:$0xff]   ;;  %v7499_v23 = vld [vmem:[%s11267_s1 + $0x2a4] ss:$16 sps:$4 sm:$0xff]   ;;  %v7502_v24 = vld [vmem:[%s11267_s1 + $0x2ac] ss:$16 sps:$4 sm:$0xff]  }
  0x1e   :  { %v7497_v25 = vld [vmem:[%s11267_s1 + $0x2a0] ss:$16 sps:$4 sm:$0xff]   ;;  %v7500_v26 = vld [vmem:[%s11267_s1 + $0x2a8] ss:$16 sps:$4 sm:$0xff]   ;;  %v7505_v27 = vld [vmem:[%s11267_s1 + $0x2c4] ss:$16 sps:$4 sm:$0xff]  }
  0x1f   :  { %4959 = vmatpush1.bf16.msra.mxu0 %v7415_v30  ;;  %5492 = vmatpush1.bf16.msra.mxu1 %v7416_v31  ;;  %v7508_v28 = vld [vmem:[%s11267_s1 + $0x2cc] ss:$16 sps:$4 sm:$0xff]   ;;  %v7503_v31 = vld [vmem:[%s11267_s1 + $0x2c0] ss:$16 sps:$4 sm:$0xff]   ;;  %v7530_v48 = vld [vmem:[%s11267_s1 + $0x348] ss:$16 sps:$4 sm:$0xff]  }
  0x20   :  { %4960 = vmatprep.subr.bf16.mxu0 %v7417_v32  ;;  %5493 = vmatprep.subr.bf16.mxu1 %v7419_v33  ;;  %v8933_v29 = vld [vmem:[%s11268_s0 + $0x8] sm:$0xff]  ;;  %v7511_v33 = vld [vmem:[%s11267_s1 + $0x2e4] ss:$16 sps:$4 sm:$0xff]  }
  0x21   :  { %v6369_v30 = vcombine.high %v8933_v29, %v8933_v29  ;;  %v7506_v32 = vld [vmem:[%s11267_s1 + $0x2c8] ss:$16 sps:$4 sm:$0xff]   ;;  %v7532_v46 = vld [vmem:[%s11267_s1 + $0x34c] ss:$16 sps:$4 sm:$0xff]  }
  0x23   :  { %4961 = vmatpush1.bf16.msra.mxu0 %v7421_v34  ;;  %5494 = vmatpush1.bf16.msra.mxu1 %v7422_v35  ;;  %v7514_v34 = vld [vmem:[%s11267_s1 + $0x2ec] ss:$16 sps:$4 sm:$0xff]   ;;  %v7509_v35 = vld [vmem:[%s11267_s1 + $0x2e0] ss:$16 sps:$4 sm:$0xff]  }
  0x24   :  { %4962 = vmatprep.subr.bf16.mxu0 %v7423_v36  ;;  %5495 = vmatprep.subr.bf16.mxu1 %v7425_v37  ;;  %v7512_v36 = vld [vmem:[%s11267_s1 + $0x2e8] ss:$16 sps:$4 sm:$0xff]   ;;  %v7517_v37 = vld [vmem:[%s11267_s1 + $0x304] ss:$16 sps:$4 sm:$0xff]  }
  0x27   :  { %4963 = vmatpush1.bf16.msra.mxu0 %v7427_v38  ;;  %5496 = vmatpush1.bf16.msra.mxu1 %v7428_v39  ;;  %v7520_v38 = vld [vmem:[%s11267_s1 + $0x30c] ss:$16 sps:$4 sm:$0xff]   ;;  %v7515_v39 = vld [vmem:[%s11267_s1 + $0x300] ss:$16 sps:$4 sm:$0xff]  }
  0x28   :  { %4964 = vmatprep.subr.bf16.mxu0 %v7429_v40  ;;  %5497 = vmatprep.subr.bf16.mxu1 %v7431_v41  ;;  %v7518_v40 = vld [vmem:[%s11267_s1 + $0x308] ss:$16 sps:$4 sm:$0xff]   ;;  %v7523_v41 = vld [vmem:[%s11267_s1 + $0x324] ss:$16 sps:$4 sm:$0xff]  }
  0x2b   :  { %4965 = vmatpush1.bf16.msra.mxu0 %v7433_v42  ;;  %5498 = vmatpush1.bf16.msra.mxu1 %v7434_v43  ;;  %v7526_v42 = vld [vmem:[%s11267_s1 + $0x32c] ss:$16 sps:$4 sm:$0xff]   ;;  %v7521_v43 = vld [vmem:[%s11267_s1 + $0x320] ss:$16 sps:$4 sm:$0xff]  }
  0x2c   :  { %4966 = vmatprep.subr.bf16.mxu0 %v7435_v44  ;;  %5499 = vmatprep.subr.bf16.mxu1 %v7437_v45  ;;  %v7524_v44 = vld [vmem:[%s11267_s1 + $0x328] ss:$16 sps:$4 sm:$0xff]   ;;  %v7529_v45 = vld [vmem:[%s11267_s1 + $0x344] ss:$16 sps:$4 sm:$0xff]  }
  0x2f   :  { %4967 = vmatpush1.bf16.msra.mxu0 %v7439_v47  ;;  %5500 = vmatpush1.bf16.msra.mxu1 %v7440_v49  ;;  %v7527_v47 = vld [vmem:[%s11267_s1 + $0x340] ss:$16 sps:$4 sm:$0xff]   ;;  %v7535_v49 = vld [vmem:[%s11267_s1 + $0x364] ss:$16 sps:$4 sm:$0xff]  }
  0x30   :  { %4968 = vmatprep.subr.bf16.mxu0 %v7441_v50  ;;  %5501 = vmatprep.subr.bf16.mxu1 %v7443_v51  ;;  %v7538_v50 = vld [vmem:[%s11267_s1 + $0x36c] ss:$16 sps:$4 sm:$0xff]   ;;  %v7533_v51 = vld [vmem:[%s11267_s1 + $0x360] ss:$16 sps:$4 sm:$0xff]  }
  0x33   :  { %4969 = vmatpush1.bf16.msra.mxu0 %v7445_v52  ;;  %5502 = vmatpush1.bf16.msra.mxu1 %v7446_v53  ;;  %v7536_v52 = vld [vmem:[%s11267_s1 + $0x368] ss:$16 sps:$4 sm:$0xff]   ;;  %v7541_v53 = vld [vmem:[%s11267_s1 + $0x384] ss:$16 sps:$4 sm:$0xff]  }
  0x34   :  { %4970 = vmatprep.subr.bf16.mxu0 %v7447_v54  ;;  %5503 = vmatprep.subr.bf16.mxu1 %v7449_v55  ;;  %v7544_v54 = vld [vmem:[%s11267_s1 + $0x38c] ss:$16 sps:$4 sm:$0xff]   ;;  %v7539_v55 = vld [vmem:[%s11267_s1 + $0x380] ss:$16 sps:$4 sm:$0xff]  }
  0x37   :  { %4971 = vmatpush1.bf16.msra.mxu0 %v7451_v56  ;;  %5504 = vmatpush1.bf16.msra.mxu1 %v7452_v57  ;;  %v7542_v56 = vld [vmem:[%s11267_s1 + $0x388] ss:$16 sps:$4 sm:$0xff]   ;;  %v7547_v57 = vld [vmem:[%s11267_s1 + $0x3a4] ss:$16 sps:$4 sm:$0xff]  }
  0x38   :  { %4972 = vmatprep.subr.bf16.mxu0 %v7453_v58  ;;  %5505 = vmatprep.subr.bf16.mxu1 %v7455_v59  ;;  %v7550_v58 = vld [vmem:[%s11267_s1 + $0x3ac] ss:$16 sps:$4 sm:$0xff]   ;;  %v7545_v59 = vld [vmem:[%s11267_s1 + $0x3a0] ss:$16 sps:$4 sm:$0xff]  }
  0x3b   :  { %4973 = vmatpush1.bf16.msra.mxu0 %v7457_v60  ;;  %5506 = vmatpush1.bf16.msra.mxu1 %v7458_v61  ;;  %v7548_v60 = vld [vmem:[%s11267_s1 + $0x3a8] ss:$16 sps:$4 sm:$0xff]   ;;  %v7553_v61 = vld [vmem:[%s11267_s1 + $0x3c4] ss:$16 sps:$4 sm:$0xff]  }
  0x3c   :  { %4974 = vmatprep.subr.bf16.mxu0 %v7459_v62  ;;  %5507 = vmatprep.subr.bf16.mxu1 %v7461_v63  ;;  %v7556_v62 = vld [vmem:[%s11267_s1 + $0x3cc] ss:$16 sps:$4 sm:$0xff]   ;;  %v7551_v63 = vld [vmem:[%s11267_s1 + $0x3c0] ss:$16 sps:$4 sm:$0xff]  }
  0x3f   :  { %4975 = vmatpush1.bf16.msra.mxu0 %v7463_v0  ;;  %5508 = vmatpush1.bf16.msra.mxu1 %v7464_v1  ;;  %v7554_v0 = vld [vmem:[%s11267_s1 + $0x3c8] ss:$16 sps:$4 sm:$0xff]   ;;  %v7559_v1 = vld [vmem:[%s11267_s1 + $0x3e4] ss:$16 sps:$4 sm:$0xff]  }
  0x40   :  { %4985 = vmatprep.subr.bf16.mxu0 %v7469_v2  ;;  %5518 = vmatprep.subr.bf16.mxu1 %v7472_v3  ;;  %v7562_v2 = vld [vmem:[%s11267_s1 + $0x3ec] ss:$16 sps:$4 sm:$0xff]   ;;  %v7557_v3 = vld [vmem:[%s11267_s1 + $0x3e0] ss:$16 sps:$4 sm:$0xff]  }
  0x42   :  { %4977 = vmatmul.mubr.bf16.vlgmr.msra.gmra.mrb[0].mxu0 %v6366_v4  ;;  %5510 = vmatmul.mubr.bf16.vlgmr.msra.gmra.mrb[0].mxu1 %v6366_v4  ;;  %v7560_v4 = vld [vmem:[%s11267_s1 + $0x3e8] ss:$16 sps:$4 sm:$0xff]  }
  0x43   :  { %4986 = vmatpush1.bf16.msra.mxu0 %v7467_v5  ;;  %5519 = vmatpush1.bf16.msra.mxu1 %v7470_v6  ;;  %v7567_v5 = vld [vmem:[%s11267_s1 + $0x404] ss:$16 sps:$4 sm:$0xff]   ;;  %v7570_v6 = vld [vmem:[%s11267_s1 + $0x40c] ss:$16 sps:$4 sm:$0xff]  }
  0x44   :  { %4987 = vmatprep.subr.bf16.mxu0 %v7475_v7  ;;  %5520 = vmatprep.subr.bf16.mxu1 %v7478_v8  ;;  %v6368_v7 = vcombine.low %v8933_v29, %v8933_v29  ;;  %v7565_v8 = vld [vmem:[%s11267_s1 + $0x400] ss:$16 sps:$4 sm:$0xff]   ;;  %v7600_v29 = vld [vmem:[%s11267_s1 + $0x4ac] ss:$16 sps:$4 sm:$0xff]  }
  0x45   :  { %5017 = vmatprep.mubr.bf16.mxu0 %v6369_v30  ;;  %5550 = vmatprep.mubr.bf16.mxu1 %v6369_v30  ;;  %v7595_v30 = vld [vmem:[%s11267_s1 + $0x4a0] ss:$16 sps:$4 sm:$0xff]  }
  0x47   :  { %4988 = vmatpush1.bf16.msra.mxu0 %v7473_v9  ;;  %5521 = vmatpush1.bf16.msra.mxu1 %v7476_v10  ;;  %v7568_v9 = vld [vmem:[%s11267_s1 + $0x408] ss:$16 sps:$4 sm:$0xff]   ;;  %v7573_v10 = vld [vmem:[%s11267_s1 + $0x424] ss:$16 sps:$4 sm:$0xff]  }
  0x48   :  { %4989 = vmatprep.subr.bf16.mxu0 %v7481_v11  ;;  %5522 = vmatprep.subr.bf16.mxu1 %v7484_v12  ;;  %v9071_v11 = vld [vmem:[%s11268_s0 + $0x10] sm:$0xff]  ;;  %v7576_v12 = vld [vmem:[%s11267_s1 + $0x42c] ss:$16 sps:$4 sm:$0xff]  }
  0x4b   :  { %4990 = vmatpush1.bf16.msra.mxu0 %v7479_v13  ;;  %5523 = vmatpush1.bf16.msra.mxu1 %v7482_v14  ;;  %v6371_v13 = vcombine.high %v9071_v11, %v9071_v11  ;;  %v7571_v14 = vld [vmem:[%s11267_s1 + $0x420] ss:$16 sps:$4 sm:$0xff]  }
  0x4c   :  { %4991 = vmatprep.subr.bf16.mxu0 %v7487_v15  ;;  %5524 = vmatprep.subr.bf16.mxu1 %v7490_v16  ;;  %v7574_v15 = vld [vmem:[%s11267_s1 + $0x428] ss:$16 sps:$4 sm:$0xff]   ;;  %v7579_v16 = vld [vmem:[%s11267_s1 + $0x444] ss:$16 sps:$4 sm:$0xff]  }
  0x4f   :  { %4992 = vmatpush1.bf16.msra.mxu0 %v7485_v17  ;;  %5525 = vmatpush1.bf16.msra.mxu1 %v7488_v18  ;;  %v7582_v17 = vld [vmem:[%s11267_s1 + $0x44c] ss:$16 sps:$4 sm:$0xff]   ;;  %v7577_v18 = vld [vmem:[%s11267_s1 + $0x440] ss:$16 sps:$4 sm:$0xff]  }
  0x50   :  { %4993 = vmatprep.subr.bf16.mxu0 %v7493_v19  ;;  %5526 = vmatprep.subr.bf16.mxu1 %v7496_v20  ;;  %v7580_v19 = vld [vmem:[%s11267_s1 + $0x448] ss:$16 sps:$4 sm:$0xff]   ;;  %v7585_v20 = vld [vmem:[%s11267_s1 + $0x464] ss:$16 sps:$4 sm:$0xff]  }
  0x53   :  { %4994 = vmatpush1.bf16.msra.mxu0 %v7491_v21  ;;  %5527 = vmatpush1.bf16.msra.mxu1 %v7494_v22  ;;  %v7588_v21 = vld [vmem:[%s11267_s1 + $0x46c] ss:$16 sps:$4 sm:$0xff]   ;;  %v7583_v22 = vld [vmem:[%s11267_s1 + $0x460] ss:$16 sps:$4 sm:$0xff]  }
  0x54   :  { %4995 = vmatprep.subr.bf16.mxu0 %v7499_v23  ;;  %5528 = vmatprep.subr.bf16.mxu1 %v7502_v24  ;;  %v7586_v23 = vld [vmem:[%s11267_s1 + $0x468] ss:$16 sps:$4 sm:$0xff]   ;;  %v7591_v24 = vld [vmem:[%s11267_s1 + $0x484] ss:$16 sps:$4 sm:$0xff]  }
  0x57   :  { %4996 = vmatpush1.bf16.msra.mxu0 %v7497_v25  ;;  %5529 = vmatpush1.bf16.msra.mxu1 %v7500_v26  ;;  %v7594_v25 = vld [vmem:[%s11267_s1 + $0x48c] ss:$16 sps:$4 sm:$0xff]   ;;  %v7589_v26 = vld [vmem:[%s11267_s1 + $0x480] ss:$16 sps:$4 sm:$0xff]  }
  0x58   :  { %4997 = vmatprep.subr.bf16.mxu0 %v7505_v27  ;;  %5530 = vmatprep.subr.bf16.mxu1 %v7508_v28  ;;  %v7592_v27 = vld [vmem:[%s11267_s1 + $0x488] ss:$16 sps:$4 sm:$0xff]   ;;  %v7597_v28 = vld [vmem:[%s11267_s1 + $0x4a4] ss:$16 sps:$4 sm:$0xff]  }
  0x5b   :  { %4998 = vmatpush1.bf16.msra.mxu0 %v7503_v31  ;;  %5531 = vmatpush1.bf16.msra.mxu1 %v7506_v32  ;;  %v7598_v31 = vld [vmem:[%s11267_s1 + $0x4a8] ss:$16 sps:$4 sm:$0xff]   ;;  %v7603_v32 = vld [vmem:[%s11267_s1 + $0x4c4] ss:$16 sps:$4 sm:$0xff]  }
  0x5c   :  { %4999 = vmatprep.subr.bf16.mxu0 %v7511_v33  ;;  %5532 = vmatprep.subr.bf16.mxu1 %v7514_v34  ;;  %v7606_v33 = vld [vmem:[%s11267_s1 + $0x4cc] ss:$16 sps:$4 sm:$0xff]   ;;  %v7601_v34 = vld [vmem:[%s11267_s1 + $0x4c0] ss:$16 sps:$4 sm:$0xff]  }
  0x5f   :  { %5000 = vmatpush1.bf16.msra.mxu0 %v7509_v35  ;;  %5533 = vmatpush1.bf16.msra.mxu1 %v7512_v36  ;;  %v7604_v35 = vld [vmem:[%s11267_s1 + $0x4c8] ss:$16 sps:$4 sm:$0xff]   ;;  %v7609_v36 = vld [vmem:[%s11267_s1 + $0x4e4] ss:$16 sps:$4 sm:$0xff]  }
  0x60   :  { %5001 = vmatprep.subr.bf16.mxu0 %v7517_v37  ;;  %5534 = vmatprep.subr.bf16.mxu1 %v7520_v38  ;;  %v7612_v37 = vld [vmem:[%s11267_s1 + $0x4ec] ss:$16 sps:$4 sm:$0xff]   ;;  %v7607_v38 = vld [vmem:[%s11267_s1 + $0x4e0] ss:$16 sps:$4 sm:$0xff]  }
  0x63   :  { %5002 = vmatpush1.bf16.msra.mxu0 %v7515_v39  ;;  %5535 = vmatpush1.bf16.msra.mxu1 %v7518_v40  ;;  %v7610_v39 = vld [vmem:[%s11267_s1 + $0x4e8] ss:$16 sps:$4 sm:$0xff]   ;;  %v7615_v40 = vld [vmem:[%s11267_s1 + $0x504] ss:$16 sps:$4 sm:$0xff]  }
  0x64   :  { %5003 = vmatprep.subr.bf16.mxu0 %v7523_v41  ;;  %5536 = vmatprep.subr.bf16.mxu1 %v7526_v42  ;;  %v7618_v41 = vld [vmem:[%s11267_s1 + $0x50c] ss:$16 sps:$4 sm:$0xff]   ;;  %v7613_v42 = vld [vmem:[%s11267_s1 + $0x500] ss:$16 sps:$4 sm:$0xff]  }
  0x67   :  { %5004 = vmatpush1.bf16.msra.mxu0 %v7521_v43  ;;  %5537 = vmatpush1.bf16.msra.mxu1 %v7524_v44  ;;  %v7616_v43 = vld [vmem:[%s11267_s1 + $0x508] ss:$16 sps:$4 sm:$0xff]   ;;  %v7621_v44 = vld [vmem:[%s11267_s1 + $0x524] ss:$16 sps:$4 sm:$0xff]  }
  0x68   :  { %5005 = vmatprep.subr.bf16.mxu0 %v7529_v45  ;;  %5538 = vmatprep.subr.bf16.mxu1 %v7532_v46  ;;  %v7624_v45 = vld [vmem:[%s11267_s1 + $0x52c] ss:$16 sps:$4 sm:$0xff]   ;;  %v7619_v46 = vld [vmem:[%s11267_s1 + $0x520] ss:$16 sps:$4 sm:$0xff]  }
  0x6b   :  { %5006 = vmatpush1.bf16.msra.mxu0 %v7527_v47  ;;  %5539 = vmatpush1.bf16.msra.mxu1 %v7530_v48  ;;  %v7622_v47 = vld [vmem:[%s11267_s1 + $0x528] ss:$16 sps:$4 sm:$0xff]   ;;  %v7627_v48 = vld [vmem:[%s11267_s1 + $0x544] ss:$16 sps:$4 sm:$0xff]  }
  0x6c   :  { %5007 = vmatprep.subr.bf16.mxu0 %v7535_v49  ;;  %5540 = vmatprep.subr.bf16.mxu1 %v7538_v50  ;;  %v7630_v49 = vld [vmem:[%s11267_s1 + $0x54c] ss:$16 sps:$4 sm:$0xff]   ;;  %v7625_v50 = vld [vmem:[%s11267_s1 + $0x540] ss:$16 sps:$4 sm:$0xff]  }
  0x6f   :  { %5008 = vmatpush1.bf16.msra.mxu0 %v7533_v51  ;;  %5541 = vmatpush1.bf16.msra.mxu1 %v7536_v52  ;;  %v7628_v51 = vld [vmem:[%s11267_s1 + $0x548] ss:$16 sps:$4 sm:$0xff]   ;;  %v7633_v52 = vld [vmem:[%s11267_s1 + $0x564] ss:$16 sps:$4 sm:$0xff]  }
  0x70   :  { %5009 = vmatprep.subr.bf16.mxu0 %v7541_v53  ;;  %5542 = vmatprep.subr.bf16.mxu1 %v7544_v54  ;;  %v7636_v53 = vld [vmem:[%s11267_s1 + $0x56c] ss:$16 sps:$4 sm:$0xff]   ;;  %v7631_v54 = vld [vmem:[%s11267_s1 + $0x560] ss:$16 sps:$4 sm:$0xff]  }
  0x73   :  { %5010 = vmatpush1.bf16.msra.mxu0 %v7539_v55  ;;  %5543 = vmatpush1.bf16.msra.mxu1 %v7542_v56  ;;  %v7634_v55 = vld [vmem:[%s11267_s1 + $0x568] ss:$16 sps:$4 sm:$0xff]   ;;  %v7639_v56 = vld [vmem:[%s11267_s1 + $0x584] ss:$16 sps:$4 sm:$0xff]  }
  0x74   :  { %5011 = vmatprep.subr.bf16.mxu0 %v7547_v57  ;;  %5544 = vmatprep.subr.bf16.mxu1 %v7550_v58  ;;  %v7642_v57 = vld [vmem:[%s11267_s1 + $0x58c] ss:$16 sps:$4 sm:$0xff]   ;;  %v7637_v58 = vld [vmem:[%s11267_s1 + $0x580] ss:$16 sps:$4 sm:$0xff]  }
  0x77   :  { %5012 = vmatpush1.bf16.msra.mxu0 %v7545_v59  ;;  %5545 = vmatpush1.bf16.msra.mxu1 %v7548_v60  ;;  %v7640_v59 = vld [vmem:[%s11267_s1 + $0x588] ss:$16 sps:$4 sm:$0xff]   ;;  %v7645_v60 = vld [vmem:[%s11267_s1 + $0x5a4] ss:$16 sps:$4 sm:$0xff]  }
  0x78   :  { %5013 = vmatprep.subr.bf16.mxu0 %v7553_v61  ;;  %5546 = vmatprep.subr.bf16.mxu1 %v7556_v62  ;;  %v7648_v61 = vld [vmem:[%s11267_s1 + $0x5ac] ss:$16 sps:$4 sm:$0xff]   ;;  %v7643_v62 = vld [vmem:[%s11267_s1 + $0x5a0] ss:$16 sps:$4 sm:$0xff]  }
  0x7b   :  { %5014 = vmatpush1.bf16.msra.mxu0 %v7551_v63  ;;  %5547 = vmatpush1.bf16.msra.mxu1 %v7554_v0  ;;  %v7646_v63 = vld [vmem:[%s11267_s1 + $0x5a8] ss:$16 sps:$4 sm:$0xff]   ;;  %v7651_v0 = vld [vmem:[%s11267_s1 + $0x5c4] ss:$16 sps:$4 sm:$0xff]  }
  0x7c   :  { %5015 = vmatprep.subr.bf16.mxu0 %v7559_v1  ;;  %5548 = vmatprep.subr.bf16.mxu1 %v7562_v2  ;;  %v7654_v1 = vld [vmem:[%s11267_s1 + $0x5cc] ss:$16 sps:$4 sm:$0xff]   ;;  %v7649_v2 = vld [vmem:[%s11267_s1 + $0x5c0] ss:$16 sps:$4 sm:$0xff]  }
  0x7f   :  { %5016 = vmatpush1.bf16.msra.mxu0 %v7557_v3  ;;  %5549 = vmatpush1.bf16.msra.mxu1 %v7560_v4  ;;  %v7652_v3 = vld [vmem:[%s11267_s1 + $0x5c8] ss:$16 sps:$4 sm:$0xff]   ;;  %v7657_v4 = vld [vmem:[%s11267_s1 + $0x5e4] ss:$16 sps:$4 sm:$0xff]  }
  0x80   :  { %5026 = vmatprep.subr.bf16.mxu0 %v7567_v5  ;;  %5559 = vmatprep.subr.bf16.mxu1 %v7570_v6  ;;  %v7660_v5 = vld [vmem:[%s11267_s1 + $0x5ec] ss:$16 sps:$4 sm:$0xff]   ;;  %v7655_v6 = vld [vmem:[%s11267_s1 + $0x5e0] ss:$16 sps:$4 sm:$0xff]  }
  0x82   :  { %5018 = vmatmul.mubr.bf16.vlgmr.msra.gmra.mrb[0].mxu0 %v6368_v7  ;;  %5551 = vmatmul.mubr.bf16.vlgmr.msra.gmra.mrb[0].mxu1 %v6368_v7  ;;  %v7658_v7 = vld [vmem:[%s11267_s1 + $0x5e8] ss:$16 sps:$4 sm:$0xff]  }
  0x83   :  { %5027 = vmatpush1.bf16.msra.mxu0 %v7565_v8  ;;  %5560 = vmatpush1.bf16.msra.mxu1 %v7568_v9  ;;  %v7665_v8 = vld [vmem:[%s11267_s1 + $0x604] ss:$16 sps:$4 sm:$0xff]   ;;  %v7668_v9 = vld [vmem:[%s11267_s1 + $0x60c] ss:$16 sps:$4 sm:$0xff]  }
  0x84   :  { %5028 = vmatprep.subr.bf16.mxu0 %v7573_v10  ;;  %5561 = vmatprep.subr.bf16.mxu1 %v7576_v12  ;;  %v7663_v10 = vld [vmem:[%s11267_s1 + $0x600] ss:$16 sps:$4 sm:$0xff]   ;;  %v6370_v12 = vcombine.low %v9071_v11, %v9071_v11  ;;  %v7674_v11 = vld [vmem:[%s11267_s1 + $0x62c] ss:$16 sps:$4 sm:$0xff]  }
  0x85   :  { %5058 = vmatprep.mubr.bf16.mxu0 %v6371_v13  ;;  %5591 = vmatprep.mubr.bf16.mxu1 %v6371_v13  ;;  %v7666_v13 = vld [vmem:[%s11267_s1 + $0x608] ss:$16 sps:$4 sm:$0xff]  }
  0x87   :  { %5029 = vmatpush1.bf16.msra.mxu0 %v7571_v14  ;;  %5562 = vmatpush1.bf16.msra.mxu1 %v7574_v15  ;;  %v9269_v14 = vld [vmem:[%s11268_s0 + $0x18] sm:$0xff]  ;;  %v7671_v15 = vld [vmem:[%s11267_s1 + $0x624] ss:$16 sps:$4 sm:$0xff]  }
  0x88   :  { %5030 = vmatprep.subr.bf16.mxu0 %v7579_v16  ;;  %5563 = vmatprep.subr.bf16.mxu1 %v7582_v17  ;;  %v6373_v16 = vcombine.high %v9269_v14, %v9269_v14  ;;  %v7669_v17 = vld [vmem:[%s11267_s1 + $0x620] ss:$16 sps:$4 sm:$0xff]  }
  0x8b   :  { %5031 = vmatpush1.bf16.msra.mxu0 %v7577_v18  ;;  %5564 = vmatpush1.bf16.msra.mxu1 %v7580_v19  ;;  %v7672_v18 = vld [vmem:[%s11267_s1 + $0x628] ss:$16 sps:$4 sm:$0xff]   ;;  %v7677_v19 = vld [vmem:[%s11267_s1 + $0x644] ss:$16 sps:$4 sm:$0xff]  }
  0x8c   :  { %5032 = vmatprep.subr.bf16.mxu0 %v7585_v20  ;;  %5565 = vmatprep.subr.bf16.mxu1 %v7588_v21  ;;  %v7680_v20 = vld [vmem:[%s11267_s1 + $0x64c] ss:$16 sps:$4 sm:$0xff]   ;;  %v7675_v21 = vld [vmem:[%s11267_s1 + $0x640] ss:$16 sps:$4 sm:$0xff]  }
  0x8f   :  { %5033 = vmatpush1.bf16.msra.mxu0 %v7583_v22  ;;  %5566 = vmatpush1.bf16.msra.mxu1 %v7586_v23  ;;  %v7678_v22 = vld [vmem:[%s11267_s1 + $0x648] ss:$16 sps:$4 sm:$0xff]   ;;  %v7683_v23 = vld [vmem:[%s11267_s1 + $0x664] ss:$16 sps:$4 sm:$0xff]  }
  0x90   :  { %5034 = vmatprep.subr.bf16.mxu0 %v7591_v24  ;;  %5567 = vmatprep.subr.bf16.mxu1 %v7594_v25  ;;  %v7686_v24 = vld [vmem:[%s11267_s1 + $0x66c] ss:$16 sps:$4 sm:$0xff]   ;;  %v7681_v25 = vld [vmem:[%s11267_s1 + $0x660] ss:$16 sps:$4 sm:$0xff]  }
  0x93   :  { %5035 = vmatpush1.bf16.msra.mxu0 %v7589_v26  ;;  %5568 = vmatpush1.bf16.msra.mxu1 %v7592_v27  ;;  %v7684_v26 = vld [vmem:[%s11267_s1 + $0x668] ss:$16 sps:$4 sm:$0xff]   ;;  %v7689_v27 = vld [vmem:[%s11267_s1 + $0x684] ss:$16 sps:$4 sm:$0xff]  }
  0x94   :  { %5036 = vmatprep.subr.bf16.mxu0 %v7597_v28  ;;  %5569 = vmatprep.subr.bf16.mxu1 %v7600_v29  ;;  %v7692_v28 = vld [vmem:[%s11267_s1 + $0x68c] ss:$16 sps:$4 sm:$0xff]   ;;  %v7687_v29 = vld [vmem:[%s11267_s1 + $0x680] ss:$16 sps:$4 sm:$0xff]  }
  0x97   :  { %5037 = vmatpush1.bf16.msra.mxu0 %v7595_v30  ;;  %5570 = vmatpush1.bf16.msra.mxu1 %v7598_v31  ;;  %v7690_v30 = vld [vmem:[%s11267_s1 + $0x688] ss:$16 sps:$4 sm:$0xff]   ;;  %v7695_v31 = vld [vmem:[%s11267_s1 + $0x6a4] ss:$16 sps:$4 sm:$0xff]  }
  0x98   :  { %5038 = vmatprep.subr.bf16.mxu0 %v7603_v32  ;;  %5571 = vmatprep.subr.bf16.mxu1 %v7606_v33  ;;  %v7698_v32 = vld [vmem:[%s11267_s1 + $0x6ac] ss:$16 sps:$4 sm:$0xff]   ;;  %v7693_v33 = vld [vmem:[%s11267_s1 + $0x6a0] ss:$16 sps:$4 sm:$0xff]  }
  0x9b   :  { %5039 = vmatpush1.bf16.msra.mxu0 %v7601_v34  ;;  %5572 = vmatpush1.bf16.msra.mxu1 %v7604_v35  ;;  %v7696_v34 = vld [vmem:[%s11267_s1 + $0x6a8] ss:$16 sps:$4 sm:$0xff]   ;;  %v7701_v35 = vld [vmem:[%s11267_s1 + $0x6c4] ss:$16 sps:$4 sm:$0xff]  }
  0x9c   :  { %5040 = vmatprep.subr.bf16.mxu0 %v7609_v36  ;;  %5573 = vmatprep.subr.bf16.mxu1 %v7612_v37  ;;  %v7704_v36 = vld [vmem:[%s11267_s1 + $0x6cc] ss:$16 sps:$4 sm:$0xff]   ;;  %v7699_v37 = vld [vmem:[%s11267_s1 + $0x6c0] ss:$16 sps:$4 sm:$0xff]  }
  0x9f   :  { %5041 = vmatpush1.bf16.msra.mxu0 %v7607_v38  ;;  %5574 = vmatpush1.bf16.msra.mxu1 %v7610_v39  ;;  %v7702_v38 = vld [vmem:[%s11267_s1 + $0x6c8] ss:$16 sps:$4 sm:$0xff]   ;;  %v7707_v39 = vld [vmem:[%s11267_s1 + $0x6e4] ss:$16 sps:$4 sm:$0xff]  }
  0xa0   :  { %5042 = vmatprep.subr.bf16.mxu0 %v7615_v40  ;;  %5575 = vmatprep.subr.bf16.mxu1 %v7618_v41  ;;  %v7710_v40 = vld [vmem:[%s11267_s1 + $0x6ec] ss:$16 sps:$4 sm:$0xff]   ;;  %v7705_v41 = vld [vmem:[%s11267_s1 + $0x6e0] ss:$16 sps:$4 sm:$0xff]  }
  0xa3   :  { %5043 = vmatpush1.bf16.msra.mxu0 %v7613_v42  ;;  %5576 = vmatpush1.bf16.msra.mxu1 %v7616_v43  ;;  %v7708_v42 = vld [vmem:[%s11267_s1 + $0x6e8] ss:$16 sps:$4 sm:$0xff]   ;;  %v7713_v43 = vld [vmem:[%s11267_s1 + $0x704] ss:$16 sps:$4 sm:$0xff]  }
  0xa4   :  { %5044 = vmatprep.subr.bf16.mxu0 %v7621_v44  ;;  %5577 = vmatprep.subr.bf16.mxu1 %v7624_v45  ;;  %v7716_v44 = vld [vmem:[%s11267_s1 + $0x70c] ss:$16 sps:$4 sm:$0xff]   ;;  %v7711_v45 = vld [vmem:[%s11267_s1 + $0x700] ss:$16 sps:$4 sm:$0xff]  }
  0xa7   :  { %5045 = vmatpush1.bf16.msra.mxu0 %v7619_v46  ;;  %5578 = vmatpush1.bf16.msra.mxu1 %v7622_v47  ;;  %v7714_v46 = vld [vmem:[%s11267_s1 + $0x708] ss:$16 sps:$4 sm:$0xff]   ;;  %v7719_v47 = vld [vmem:[%s11267_s1 + $0x724] ss:$16 sps:$4 sm:$0xff]  }
  0xa8   :  { %5046 = vmatprep.subr.bf16.mxu0 %v7627_v48  ;;  %5579 = vmatprep.subr.bf16.mxu1 %v7630_v49  ;;  %v7722_v48 = vld [vmem:[%s11267_s1 + $0x72c] ss:$16 sps:$4 sm:$0xff]   ;;  %v7717_v49 = vld [vmem:[%s11267_s1 + $0x720] ss:$16 sps:$4 sm:$0xff]  }
  0xab   :  { %5047 = vmatpush1.bf16.msra.mxu0 %v7625_v50  ;;  %5580 = vmatpush1.bf16.msra.mxu1 %v7628_v51  ;;  %v7720_v50 = vld [vmem:[%s11267_s1 + $0x728] ss:$16 sps:$4 sm:$0xff]   ;;  %v7725_v51 = vld [vmem:[%s11267_s1 + $0x744] ss:$16 sps:$4 sm:$0xff]  }
  0xac   :  { %5048 = vmatprep.subr.bf16.mxu0 %v7633_v52  ;;  %5581 = vmatprep.subr.bf16.mxu1 %v7636_v53  ;;  %v7728_v52 = vld [vmem:[%s11267_s1 + $0x74c] ss:$16 sps:$4 sm:$0xff]   ;;  %v7723_v53 = vld [vmem:[%s11267_s1 + $0x740] ss:$16 sps:$4 sm:$0xff]  }
  0xaf   :  { %5049 = vmatpush1.bf16.msra.mxu0 %v7631_v54  ;;  %5582 = vmatpush1.bf16.msra.mxu1 %v7634_v55  ;;  %v7726_v54 = vld [vmem:[%s11267_s1 + $0x748] ss:$16 sps:$4 sm:$0xff]   ;;  %v7731_v55 = vld [vmem:[%s11267_s1 + $0x764] ss:$16 sps:$4 sm:$0xff]  }
  0xb0   :  { %5050 = vmatprep.subr.bf16.mxu0 %v7639_v56  ;;  %5583 = vmatprep.subr.bf16.mxu1 %v7642_v57  ;;  %v7734_v56 = vld [vmem:[%s11267_s1 + $0x76c] ss:$16 sps:$4 sm:$0xff]   ;;  %v7729_v57 = vld [vmem:[%s11267_s1 + $0x760] ss:$16 sps:$4 sm:$0xff]  }
  0xb3   :  { %5051 = vmatpush1.bf16.msra.mxu0 %v7637_v58  ;;  %5584 = vmatpush1.bf16.msra.mxu1 %v7640_v59  ;;  %v7732_v58 = vld [vmem:[%s11267_s1 + $0x768] ss:$16 sps:$4 sm:$0xff]   ;;  %v7737_v59 = vld [vmem:[%s11267_s1 + $0x784] ss:$16 sps:$4 sm:$0xff]  }
  0xb4   :  { %5052 = vmatprep.subr.bf16.mxu0 %v7645_v60  ;;  %5585 = vmatprep.subr.bf16.mxu1 %v7648_v61  ;;  %v7740_v60 = vld [vmem:[%s11267_s1 + $0x78c] ss:$16 sps:$4 sm:$0xff]   ;;  %v7735_v61 = vld [vmem:[%s11267_s1 + $0x780] ss:$16 sps:$4 sm:$0xff]  }
  0xb7   :  { %5053 = vmatpush1.bf16.msra.mxu0 %v7643_v62  ;;  %5586 = vmatpush1.bf16.msra.mxu1 %v7646_v63  ;;  %v7738_v62 = vld [vmem:[%s11267_s1 + $0x788] ss:$16 sps:$4 sm:$0xff]   ;;  %v7743_v63 = vld [vmem:[%s11267_s1 + $0x7a4] ss:$16 sps:$4 sm:$0xff]  }
  0xb8   :  { %5054 = vmatprep.subr.bf16.mxu0 %v7651_v0  ;;  %5587 = vmatprep.subr.bf16.mxu1 %v7654_v1  ;;  %v7746_v0 = vld [vmem:[%s11267_s1 + $0x7ac] ss:$16 sps:$4 sm:$0xff]   ;;  %v7741_v1 = vld [vmem:[%s11267_s1 + $0x7a0] ss:$16 sps:$4 sm:$0xff]  }
  0xbb   :  { %5055 = vmatpush1.bf16.msra.mxu0 %v7649_v2  ;;  %5588 = vmatpush1.bf16.msra.mxu1 %v7652_v3  ;;  %v7744_v2 = vld [vmem:[%s11267_s1 + $0x7a8] ss:$16 sps:$4 sm:$0xff]   ;;  %v7749_v3 = vld [vmem:[%s11267_s1 + $0x7c4] ss:$16 sps:$4 sm:$0xff]  }
  0xbc   :  { %5056 = vmatprep.subr.bf16.mxu0 %v7657_v4  ;;  %5589 = vmatprep.subr.bf16.mxu1 %v7660_v5  ;;  %v7752_v4 = vld [vmem:[%s11267_s1 + $0x7cc] ss:$16 sps:$4 sm:$0xff]   ;;  %v7747_v5 = vld [vmem:[%s11267_s1 + $0x7c0] ss:$16 sps:$4 sm:$0xff]  }
  0xbf   :  { %5057 = vmatpush1.bf16.msra.mxu0 %v7655_v6  ;;  %5590 = vmatpush1.bf16.msra.mxu1 %v7658_v7  ;;  %v7750_v6 = vld [vmem:[%s11267_s1 + $0x7c8] ss:$16 sps:$4 sm:$0xff]   ;;  %v7755_v7 = vld [vmem:[%s11267_s1 + $0x7e4] ss:$16 sps:$4 sm:$0xff]  }
  0xc0   :  { %5067 = vmatprep.subr.bf16.mxu0 %v7665_v8  ;;  %5600 = vmatprep.subr.bf16.mxu1 %v7668_v9  ;;  %v7758_v8 = vld [vmem:[%s11267_s1 + $0x7ec] ss:$16 sps:$4 sm:$0xff]   ;;  %v7753_v9 = vld [vmem:[%s11267_s1 + $0x7e0] ss:$16 sps:$4 sm:$0xff]  }
  0xc2   :  { %5059 = vmatmul.mubr.bf16.vlgmr.msra.gmra.mrb[0].mxu0 %v6370_v12  ;;  %5592 = vmatmul.mubr.bf16.vlgmr.msra.gmra.mrb[0].mxu1 %v6370_v12  ;;  %v7763_v12 = vld [vmem:[%s11267_s1 + $0x804] ss:$16 sps:$4 sm:$0xff]  }
  0xc3   :  { %5068 = vmatpush1.bf16.msra.mxu0 %v7663_v10  ;;  %5601 = vmatpush1.bf16.msra.mxu1 %v7666_v13  ;;  %v7756_v10 = vld [vmem:[%s11267_s1 + $0x7e8] ss:$16 sps:$4 sm:$0xff]   ;;  %v7766_v13 = vld [vmem:[%s11267_s1 + $0x80c] ss:$16 sps:$4 sm:$0xff]  }
  0xc4   :  { %5069 = vmatprep.subr.bf16.mxu0 %v7671_v15  ;;  %5602 = vmatprep.subr.bf16.mxu1 %v7674_v11  ;;  %v7761_v15 = vld [vmem:[%s11267_s1 + $0x800] ss:$16 sps:$4 sm:$0xff]   ;;  %v6372_v11 = vcombine.low %v9269_v14, %v9269_v14  ;;  %v7772_v14 = vld [vmem:[%s11267_s1 + $0x82c] ss:$16 sps:$4 sm:$0xff]  }
  0xc5   :  { %5099 = vmatprep.mubr.bf16.mxu0 %v6373_v16  ;;  %5632 = vmatprep.mubr.bf16.mxu1 %v6373_v16  ;;  %v9467_v16 = vld [vmem:[%s11268_s0 + $0x20] sm:$0xff] }
  0xc7   :  { %5070 = vmatpush1.bf16.msra.mxu0 %v7669_v17  ;;  %5603 = vmatpush1.bf16.msra.mxu1 %v7672_v18  ;;  %v7764_v17 = vld [vmem:[%s11267_s1 + $0x808] ss:$16 sps:$4 sm:$0xff]   ;;  %v7769_v18 = vld [vmem:[%s11267_s1 + $0x824] ss:$16 sps:$4 sm:$0xff]  }
  0xc8   :  { %5071 = vmatprep.subr.bf16.mxu0 %v7677_v19  ;;  %5604 = vmatprep.subr.bf16.mxu1 %v7680_v20  ;;  %v6375_v19 = vcombine.high %v9467_v16, %v9467_v16  ;;  %v7767_v20 = vld [vmem:[%s11267_s1 + $0x820] ss:$16 sps:$4 sm:$0xff]  }
  0xcb   :  { %5072 = vmatpush1.bf16.msra.mxu0 %v7675_v21  ;;  %5605 = vmatpush1.bf16.msra.mxu1 %v7678_v22  ;;  %v7770_v21 = vld [vmem:[%s11267_s1 + $0x828] ss:$16 sps:$4 sm:$0xff]   ;;  %v7775_v22 = vld [vmem:[%s11267_s1 + $0x844] ss:$16 sps:$4 sm:$0xff]  }
  0xcc   :  { %5073 = vmatprep.subr.bf16.mxu0 %v7683_v23  ;;  %5606 = vmatprep.subr.bf16.mxu1 %v7686_v24  ;;  %v7778_v23 = vld [vmem:[%s11267_s1 + $0x84c] ss:$16 sps:$4 sm:$0xff]   ;;  %v7773_v24 = vld [vmem:[%s11267_s1 + $0x840] ss:$16 sps:$4 sm:$0xff]  }
  0xcf   :  { %5074 = vmatpush1.bf16.msra.mxu0 %v7681_v25  ;;  %5607 = vmatpush1.bf16.msra.mxu1 %v7684_v26  ;;  %v7776_v25 = vld [vmem:[%s11267_s1 + $0x848] ss:$16 sps:$4 sm:$0xff]   ;;  %v7781_v26 = vld [vmem:[%s11267_s1 + $0x864] ss:$16 sps:$4 sm:$0xff]  }
  0xd0   :  { %5075 = vmatprep.subr.bf16.mxu0 %v7689_v27  ;;  %5608 = vmatprep.subr.bf16.mxu1 %v7692_v28  ;;  %v7784_v27 = vld [vmem:[%s11267_s1 + $0x86c] ss:$16 sps:$4 sm:$0xff]   ;;  %v7779_v28 = vld [vmem:[%s11267_s1 + $0x860] ss:$16 sps:$4 sm:$0xff]  }
  0xd3   :  { %5076 = vmatpush1.bf16.msra.mxu0 %v7687_v29  ;;  %5609 = vmatpush1.bf16.msra.mxu1 %v7690_v30  ;;  %v7782_v29 = vld [vmem:[%s11267_s1 + $0x868] ss:$16 sps:$4 sm:$0xff]   ;;  %v7787_v30 = vld [vmem:[%s11267_s1 + $0x884] ss:$16 sps:$4 sm:$0xff]  }
  0xd4   :  { %5077 = vmatprep.subr.bf16.mxu0 %v7695_v31  ;;  %5610 = vmatprep.subr.bf16.mxu1 %v7698_v32  ;;  %v7790_v31 = vld [vmem:[%s11267_s1 + $0x88c] ss:$16 sps:$4 sm:$0xff]   ;;  %v7785_v32 = vld [vmem:[%s11267_s1 + $0x880] ss:$16 sps:$4 sm:$0xff]  }
  0xd7   :  { %5078 = vmatpush1.bf16.msra.mxu0 %v7693_v33  ;;  %5611 = vmatpush1.bf16.msra.mxu1 %v7696_v34  ;;  %v7788_v33 = vld [vmem:[%s11267_s1 + $0x888] ss:$16 sps:$4 sm:$0xff]   ;;  %v7793_v34 = vld [vmem:[%s11267_s1 + $0x8a4] ss:$16 sps:$4 sm:$0xff]  }
  0xd8   :  { %5079 = vmatprep.subr.bf16.mxu0 %v7701_v35  ;;  %5612 = vmatprep.subr.bf16.mxu1 %v7704_v36  ;;  %v7796_v35 = vld [vmem:[%s11267_s1 + $0x8ac] ss:$16 sps:$4 sm:$0xff]   ;;  %v7791_v36 = vld [vmem:[%s11267_s1 + $0x8a0] ss:$16 sps:$4 sm:$0xff]  }
  0xdb   :  { %5080 = vmatpush1.bf16.msra.mxu0 %v7699_v37  ;;  %5613 = vmatpush1.bf16.msra.mxu1 %v7702_v38  ;;  %v7794_v37 = vld [vmem:[%s11267_s1 + $0x8a8] ss:$16 sps:$4 sm:$0xff]   ;;  %v7799_v38 = vld [vmem:[%s11267_s1 + $0x8c4] ss:$16 sps:$4 sm:$0xff]  }
  0xdc   :  { %5081 = vmatprep.subr.bf16.mxu0 %v7707_v39  ;;  %5614 = vmatprep.subr.bf16.mxu1 %v7710_v40  ;;  %v7802_v39 = vld [vmem:[%s11267_s1 + $0x8cc] ss:$16 sps:$4 sm:$0xff]   ;;  %v7797_v40 = vld [vmem:[%s11267_s1 + $0x8c0] ss:$16 sps:$4 sm:$0xff]  }
  0xdf   :  { %5082 = vmatpush1.bf16.msra.mxu0 %v7705_v41  ;;  %5615 = vmatpush1.bf16.msra.mxu1 %v7708_v42  ;;  %v7800_v41 = vld [vmem:[%s11267_s1 + $0x8c8] ss:$16 sps:$4 sm:$0xff]   ;;  %v7805_v42 = vld [vmem:[%s11267_s1 + $0x8e4] ss:$16 sps:$4 sm:$0xff]  }
  0xe0   :  { %5083 = vmatprep.subr.bf16.mxu0 %v7713_v43  ;;  %5616 = vmatprep.subr.bf16.mxu1 %v7716_v44  ;;  %v7808_v43 = vld [vmem:[%s11267_s1 + $0x8ec] ss:$16 sps:$4 sm:$0xff]   ;;  %v7803_v44 = vld [vmem:[%s11267_s1 + $0x8e0] ss:$16 sps:$4 sm:$0xff]  }
  0xe3   :  { %5084 = vmatpush1.bf16.msra.mxu0 %v7711_v45  ;;  %5617 = vmatpush1.bf16.msra.mxu1 %v7714_v46  ;;  %v7806_v45 = vld [vmem:[%s11267_s1 + $0x8e8] ss:$16 sps:$4 sm:$0xff]   ;;  %v7811_v46 = vld [vmem:[%s11267_s1 + $0x904] ss:$16 sps:$4 sm:$0xff]  }
  0xe4   :  { %5085 = vmatprep.subr.bf16.mxu0 %v7719_v47  ;;  %5618 = vmatprep.subr.bf16.mxu1 %v7722_v48  ;;  %v7814_v47 = vld [vmem:[%s11267_s1 + $0x90c] ss:$16 sps:$4 sm:$0xff]   ;;  %v7809_v48 = vld [vmem:[%s11267_s1 + $0x900] ss:$16 sps:$4 sm:$0xff]  }
  0xe7   :  { %5086 = vmatpush1.bf16.msra.mxu0 %v7717_v49  ;;  %5619 = vmatpush1.bf16.msra.mxu1 %v7720_v50  ;;  %v7812_v49 = vld [vmem:[%s11267_s1 + $0x908] ss:$16 sps:$4 sm:$0xff]   ;;  %v7817_v50 = vld [vmem:[%s11267_s1 + $0x924] ss:$16 sps:$4 sm:$0xff]  }
  0xe8   :  { %5087 = vmatprep.subr.bf16.mxu0 %v7725_v51  ;;  %5620 = vmatprep.subr.bf16.mxu1 %v7728_v52  ;;  %v7820_v51 = vld [vmem:[%s11267_s1 + $0x92c] ss:$16 sps:$4 sm:$0xff]   ;;  %v7815_v52 = vld [vmem:[%s11267_s1 + $0x920] ss:$16 sps:$4 sm:$0xff]  }
  0xeb   :  { %5088 = vmatpush1.bf16.msra.mxu0 %v7723_v53  ;;  %5621 = vmatpush1.bf16.msra.mxu1 %v7726_v54  ;;  %v7818_v53 = vld [vmem:[%s11267_s1 + $0x928] ss:$16 sps:$4 sm:$0xff]   ;;  %v7823_v54 = vld [vmem:[%s11267_s1 + $0x944] ss:$16 sps:$4 sm:$0xff]  }
  0xec   :  { %5089 = vmatprep.subr.bf16.mxu0 %v7731_v55  ;;  %5622 = vmatprep.subr.bf16.mxu1 %v7734_v56  ;;  %v7826_v55 = vld [vmem:[%s11267_s1 + $0x94c] ss:$16 sps:$4 sm:$0xff]   ;;  %v7821_v56 = vld [vmem:[%s11267_s1 + $0x940] ss:$16 sps:$4 sm:$0xff]  }
  0xef   :  { %5090 = vmatpush1.bf16.msra.mxu0 %v7729_v57  ;;  %5623 = vmatpush1.bf16.msra.mxu1 %v7732_v58  ;;  %v7824_v57 = vld [vmem:[%s11267_s1 + $0x948] ss:$16 sps:$4 sm:$0xff]   ;;  %v7829_v58 = vld [vmem:[%s11267_s1 + $0x964] ss:$16 sps:$4 sm:$0xff]  }
  0xf0   :  { %5091 = vmatprep.subr.bf16.mxu0 %v7737_v59  ;;  %5624 = vmatprep.subr.bf16.mxu1 %v7740_v60  ;;  %v7832_v59 = vld [vmem:[%s11267_s1 + $0x96c] ss:$16 sps:$4 sm:$0xff]   ;;  %v7827_v60 = vld [vmem:[%s11267_s1 + $0x960] ss:$16 sps:$4 sm:$0xff]  }
  0xf3   :  { %5092 = vmatpush1.bf16.msra.mxu0 %v7735_v61  ;;  %5625 = vmatpush1.bf16.msra.mxu1 %v7738_v62  ;;  %v7830_v61 = vld [vmem:[%s11267_s1 + $0x968] ss:$16 sps:$4 sm:$0xff]   ;;  %v7835_v62 = vld [vmem:[%s11267_s1 + $0x984] ss:$16 sps:$4 sm:$0xff]  }
  0xf4   :  { %5093 = vmatprep.subr.bf16.mxu0 %v7743_v63  ;;  %5626 = vmatprep.subr.bf16.mxu1 %v7746_v0  ;;  %v7838_v63 = vld [vmem:[%s11267_s1 + $0x98c] ss:$16 sps:$4 sm:$0xff]   ;;  %v7833_v0 = vld [vmem:[%s11267_s1 + $0x980] ss:$16 sps:$4 sm:$0xff]  }
  0xf7   :  { %5094 = vmatpush1.bf16.msra.mxu0 %v7741_v1  ;;  %5627 = vmatpush1.bf16.msra.mxu1 %v7744_v2  ;;  %v7836_v1 = vld [vmem:[%s11267_s1 + $0x988] ss:$16 sps:$4 sm:$0xff]   ;;  %v7841_v2 = vld [vmem:[%s11267_s1 + $0x9a4] ss:$16 sps:$4 sm:$0xff]  }
  0xf8   :  { %5095 = vmatprep.subr.bf16.mxu0 %v7749_v3  ;;  %5628 = vmatprep.subr.bf16.mxu1 %v7752_v4  ;;  %v7844_v3 = vld [vmem:[%s11267_s1 + $0x9ac] ss:$16 sps:$4 sm:$0xff]   ;;  %v7839_v4 = vld [vmem:[%s11267_s1 + $0x9a0] ss:$16 sps:$4 sm:$0xff]  }
  0xfb   :  { %5096 = vmatpush1.bf16.msra.mxu0 %v7747_v5  ;;  %5629 = vmatpush1.bf16.msra.mxu1 %v7750_v6  ;;  %v7842_v5 = vld [vmem:[%s11267_s1 + $0x9a8] ss:$16 sps:$4 sm:$0xff]   ;;  %v7847_v6 = vld [vmem:[%s11267_s1 + $0x9c4] ss:$16 sps:$4 sm:$0xff]  }
  0xfc   :  { %5097 = vmatprep.subr.bf16.mxu0 %v7755_v7  ;;  %5630 = vmatprep.subr.bf16.mxu1 %v7758_v8  ;;  %v7850_v7 = vld [vmem:[%s11267_s1 + $0x9cc] ss:$16 sps:$4 sm:$0xff]   ;;  %v7845_v8 = vld [vmem:[%s11267_s1 + $0x9c0] ss:$16 sps:$4 sm:$0xff]  }
  0xff   :  { %5098 = vmatpush1.bf16.msra.mxu0 %v7753_v9  ;;  %5631 = vmatpush1.bf16.msra.mxu1 %v7756_v10  ;;  %v7848_v9 = vld [vmem:[%s11267_s1 + $0x9c8] ss:$16 sps:$4 sm:$0xff]   ;;  %v7853_v10 = vld [vmem:[%s11267_s1 + $0x9e4] ss:$16 sps:$4 sm:$0xff]  }
 0x100   :  { %5108 = vmatprep.subr.bf16.mxu0 %v7763_v12  ;;  %5641 = vmatprep.subr.bf16.mxu1 %v7766_v13  ;;  %v7856_v12 = vld [vmem:[%s11267_s1 + $0x9ec] ss:$16 sps:$4 sm:$0xff]   ;;  %v7851_v13 = vld [vmem:[%s11267_s1 + $0x9e0] ss:$16 sps:$4 sm:$0xff]  }
 0x102   :  { %5100 = vmatmul.mubr.bf16.vlgmr.msra.gmra.mrb[0].mxu0 %v6372_v11  ;;  %5633 = vmatmul.mubr.bf16.vlgmr.msra.gmra.mrb[0].mxu1 %v6372_v11  ;;  %v7861_v11 = vld [vmem:[%s11267_s1 + $0xa04] ss:$16 sps:$4 sm:$0xff]  }
 0x103   :  { %5109 = vmatpush1.bf16.msra.mxu0 %v7761_v15  ;;  %5642 = vmatpush1.bf16.msra.mxu1 %v7764_v17  ;;  %v7854_v15 = vld [vmem:[%s11267_s1 + $0x9e8] ss:$16 sps:$4 sm:$0xff]   ;;  %v7864_v17 = vld [vmem:[%s11267_s1 + $0xa0c] ss:$16 sps:$4 sm:$0xff]  }
 0x104   :  { %5110 = vmatprep.subr.bf16.mxu0 %v7769_v18  ;;  %5643 = vmatprep.subr.bf16.mxu1 %v7772_v14  ;;  %v9663_v18 = vld [vmem:[%s11268_s0 + $0x28] sm:$0xff]  ;;  %v6374_v14 = vcombine.low %v9467_v16, %v9467_v16 }
 0x105   :  { %5140 = vmatprep.mubr.bf16.mxu0 %v6375_v19  ;;  %5673 = vmatprep.mubr.bf16.mxu1 %v6375_v19  ;;  %v7859_v19 = vld [vmem:[%s11267_s1 + $0xa00] ss:$16 sps:$4 sm:$0xff]   ;;  %v7870_v16 = vld [vmem:[%s11267_s1 + $0xa2c] ss:$16 sps:$4 sm:$0xff]  }
 0x107   :  { %5111 = vmatpush1.bf16.msra.mxu0 %v7767_v20  ;;  %5644 = vmatpush1.bf16.msra.mxu1 %v7770_v21  ;;  %v7862_v20 = vld [vmem:[%s11267_s1 + $0xa08] ss:$16 sps:$4 sm:$0xff]   ;;  %v7867_v21 = vld [vmem:[%s11267_s1 + $0xa24] ss:$16 sps:$4 sm:$0xff]  }
 0x108   :  { %5112 = vmatprep.subr.bf16.mxu0 %v7775_v22  ;;  %5645 = vmatprep.subr.bf16.mxu1 %v7778_v23  ;;  %v6377_v22 = vcombine.high %v9663_v18, %v9663_v18  ;;  %v7865_v23 = vld [vmem:[%s11267_s1 + $0xa20] ss:$16 sps:$4 sm:$0xff]  }
 0x10b   :  { %5113 = vmatpush1.bf16.msra.mxu0 %v7773_v24  ;;  %5646 = vmatpush1.bf16.msra.mxu1 %v7776_v25  ;;  %v7868_v24 = vld [vmem:[%s11267_s1 + $0xa28] ss:$16 sps:$4 sm:$0xff]   ;;  %v7873_v25 = vld [vmem:[%s11267_s1 + $0xa44] ss:$16 sps:$4 sm:$0xff]  }
 0x10c   :  { %5114 = vmatprep.subr.bf16.mxu0 %v7781_v26  ;;  %5647 = vmatprep.subr.bf16.mxu1 %v7784_v27  ;;  %v7876_v26 = vld [vmem:[%s11267_s1 + $0xa4c] ss:$16 sps:$4 sm:$0xff]   ;;  %v7871_v27 = vld [vmem:[%s11267_s1 + $0xa40] ss:$16 sps:$4 sm:$0xff]  }
 0x10f   :  { %5115 = vmatpush1.bf16.msra.mxu0 %v7779_v28  ;;  %5648 = vmatpush1.bf16.msra.mxu1 %v7782_v29  ;;  %v7874_v28 = vld [vmem:[%s11267_s1 + $0xa48] ss:$16 sps:$4 sm:$0xff]   ;;  %v7879_v29 = vld [vmem:[%s11267_s1 + $0xa64] ss:$16 sps:$4 sm:$0xff]  }
 0x110   :  { %5116 = vmatprep.subr.bf16.mxu0 %v7787_v30  ;;  %5649 = vmatprep.subr.bf16.mxu1 %v7790_v31  ;;  %v7882_v30 = vld [vmem:[%s11267_s1 + $0xa6c] ss:$16 sps:$4 sm:$0xff]   ;;  %v7877_v31 = vld [vmem:[%s11267_s1 + $0xa60] ss:$16 sps:$4 sm:$0xff]  }
 0x113   :  { %5117 = vmatpush1.bf16.msra.mxu0 %v7785_v32  ;;  %5650 = vmatpush1.bf16.msra.mxu1 %v7788_v33  ;;  %v7880_v32 = vld [vmem:[%s11267_s1 + $0xa68] ss:$16 sps:$4 sm:$0xff]   ;;  %v7885_v33 = vld [vmem:[%s11267_s1 + $0xa84] ss:$16 sps:$4 sm:$0xff]  }
 0x114   :  { %5118 = vmatprep.subr.bf16.mxu0 %v7793_v34  ;;  %5651 = vmatprep.subr.bf16.mxu1 %v7796_v35  ;;  %v7888_v34 = vld [vmem:[%s11267_s1 + $0xa8c] ss:$16 sps:$4 sm:$0xff]   ;;  %v7883_v35 = vld [vmem:[%s11267_s1 + $0xa80] ss:$16 sps:$4 sm:$0xff]  }
 0x117   :  { %5119 = vmatpush1.bf16.msra.mxu0 %v7791_v36  ;;  %5652 = vmatpush1.bf16.msra.mxu1 %v7794_v37  ;;  %v7886_v36 = vld [vmem:[%s11267_s1 + $0xa88] ss:$16 sps:$4 sm:$0xff]   ;;  %v7891_v37 = vld [vmem:[%s11267_s1 + $0xaa4] ss:$16 sps:$4 sm:$0xff]  }
 0x118   :  { %5120 = vmatprep.subr.bf16.mxu0 %v7799_v38  ;;  %5653 = vmatprep.subr.bf16.mxu1 %v7802_v39  ;;  %v7894_v38 = vld [vmem:[%s11267_s1 + $0xaac] ss:$16 sps:$4 sm:$0xff]   ;;  %v7889_v39 = vld [vmem:[%s11267_s1 + $0xaa0] ss:$16 sps:$4 sm:$0xff]  }
 0x11b   :  { %5121 = vmatpush1.bf16.msra.mxu0 %v7797_v40  ;;  %5654 = vmatpush1.bf16.msra.mxu1 %v7800_v41  ;;  %v7892_v40 = vld [vmem:[%s11267_s1 + $0xaa8] ss:$16 sps:$4 sm:$0xff]   ;;  %v7897_v41 = vld [vmem:[%s11267_s1 + $0xac4] ss:$16 sps:$4 sm:$0xff]  }
 0x11c   :  { %5122 = vmatprep.subr.bf16.mxu0 %v7805_v42  ;;  %5655 = vmatprep.subr.bf16.mxu1 %v7808_v43  ;;  %v7900_v42 = vld [vmem:[%s11267_s1 + $0xacc] ss:$16 sps:$4 sm:$0xff]   ;;  %v7895_v43 = vld [vmem:[%s11267_s1 + $0xac0] ss:$16 sps:$4 sm:$0xff]  }
 0x11f   :  { %5123 = vmatpush1.bf16.msra.mxu0 %v7803_v44  ;;  %5656 = vmatpush1.bf16.msra.mxu1 %v7806_v45  ;;  %v7898_v44 = vld [vmem:[%s11267_s1 + $0xac8] ss:$16 sps:$4 sm:$0xff]   ;;  %v7903_v45 = vld [vmem:[%s11267_s1 + $0xae4] ss:$16 sps:$4 sm:$0xff]  }
 0x120   :  { %5124 = vmatprep.subr.bf16.mxu0 %v7811_v46  ;;  %5657 = vmatprep.subr.bf16.mxu1 %v7814_v47  ;;  %v7906_v46 = vld [vmem:[%s11267_s1 + $0xaec] ss:$16 sps:$4 sm:$0xff]   ;;  %v7901_v47 = vld [vmem:[%s11267_s1 + $0xae0] ss:$16 sps:$4 sm:$0xff]  }
 0x123   :  { %5125 = vmatpush1.bf16.msra.mxu0 %v7809_v48  ;;  %5658 = vmatpush1.bf16.msra.mxu1 %v7812_v49  ;;  %v7904_v48 = vld [vmem:[%s11267_s1 + $0xae8] ss:$16 sps:$4 sm:$0xff]   ;;  %v7909_v49 = vld [vmem:[%s11267_s1 + $0xb04] ss:$16 sps:$4 sm:$0xff]  }
 0x124   :  { %5126 = vmatprep.subr.bf16.mxu0 %v7817_v50  ;;  %5659 = vmatprep.subr.bf16.mxu1 %v7820_v51  ;;  %v7912_v50 = vld [vmem:[%s11267_s1 + $0xb0c] ss:$16 sps:$4 sm:$0xff]   ;;  %v7907_v51 = vld [vmem:[%s11267_s1 + $0xb00] ss:$16 sps:$4 sm:$0xff]  }
 0x127   :  { %5127 = vmatpush1.bf16.msra.mxu0 %v7815_v52  ;;  %5660 = vmatpush1.bf16.msra.mxu1 %v7818_v53  ;;  %v7910_v52 = vld [vmem:[%s11267_s1 + $0xb08] ss:$16 sps:$4 sm:$0xff]   ;;  %v7915_v53 = vld [vmem:[%s11267_s1 + $0xb24] ss:$16 sps:$4 sm:$0xff]  }
 0x128   :  { %5128 = vmatprep.subr.bf16.mxu0 %v7823_v54  ;;  %5661 = vmatprep.subr.bf16.mxu1 %v7826_v55  ;;  %v7918_v54 = vld [vmem:[%s11267_s1 + $0xb2c] ss:$16 sps:$4 sm:$0xff]   ;;  %v7913_v55 = vld [vmem:[%s11267_s1 + $0xb20] ss:$16 sps:$4 sm:$0xff]  }
 0x12b   :  { %5129 = vmatpush1.bf16.msra.mxu0 %v7821_v56  ;;  %5662 = vmatpush1.bf16.msra.mxu1 %v7824_v57  ;;  %v7916_v56 = vld [vmem:[%s11267_s1 + $0xb28] ss:$16 sps:$4 sm:$0xff]   ;;  %v7921_v57 = vld [vmem:[%s11267_s1 + $0xb44] ss:$16 sps:$4 sm:$0xff]  }
 0x12c   :  { %5130 = vmatprep.subr.bf16.mxu0 %v7829_v58  ;;  %5663 = vmatprep.subr.bf16.mxu1 %v7832_v59  ;;  %v7924_v58 = vld [vmem:[%s11267_s1 + $0xb4c] ss:$16 sps:$4 sm:$0xff]   ;;  %v7919_v59 = vld [vmem:[%s11267_s1 + $0xb40] ss:$16 sps:$4 sm:$0xff]  }
 0x12f   :  { %5131 = vmatpush1.bf16.msra.mxu0 %v7827_v60  ;;  %5664 = vmatpush1.bf16.msra.mxu1 %v7830_v61  ;;  %v7922_v60 = vld [vmem:[%s11267_s1 + $0xb48] ss:$16 sps:$4 sm:$0xff]   ;;  %v7927_v61 = vld [vmem:[%s11267_s1 + $0xb64] ss:$16 sps:$4 sm:$0xff]  }
 0x130   :  { %5132 = vmatprep.subr.bf16.mxu0 %v7835_v62  ;;  %5665 = vmatprep.subr.bf16.mxu1 %v7838_v63  ;;  %v7930_v62 = vld [vmem:[%s11267_s1 + $0xb6c] ss:$16 sps:$4 sm:$0xff]   ;;  %v7925_v63 = vld [vmem:[%s11267_s1 + $0xb60] ss:$16 sps:$4 sm:$0xff]  }
 0x133   :  { %5133 = vmatpush1.bf16.msra.mxu0 %v7833_v0  ;;  %5666 = vmatpush1.bf16.msra.mxu1 %v7836_v1  ;;  %v7928_v0 = vld [vmem:[%s11267_s1 + $0xb68] ss:$16 sps:$4 sm:$0xff]   ;;  %v7933_v1 = vld [vmem:[%s11267_s1 + $0xb84] ss:$16 sps:$4 sm:$0xff]  }
 0x134   :  { %5134 = vmatprep.subr.bf16.mxu0 %v7841_v2  ;;  %5667 = vmatprep.subr.bf16.mxu1 %v7844_v3  ;;  %v7936_v2 = vld [vmem:[%s11267_s1 + $0xb8c] ss:$16 sps:$4 sm:$0xff]   ;;  %v7931_v3 = vld [vmem:[%s11267_s1 + $0xb80] ss:$16 sps:$4 sm:$0xff]  }
 0x137   :  { %5135 = vmatpush1.bf16.msra.mxu0 %v7839_v4  ;;  %5668 = vmatpush1.bf16.msra.mxu1 %v7842_v5  ;;  %v7934_v4 = vld [vmem:[%s11267_s1 + $0xb88] ss:$16 sps:$4 sm:$0xff]   ;;  %v7939_v5 = vld [vmem:[%s11267_s1 + $0xba4] ss:$16 sps:$4 sm:$0xff]  }
 0x138   :  { %5136 = vmatprep.subr.bf16.mxu0 %v7847_v6  ;;  %5669 = vmatprep.subr.bf16.mxu1 %v7850_v7  ;;  %v7942_v6 = vld [vmem:[%s11267_s1 + $0xbac] ss:$16 sps:$4 sm:$0xff]   ;;  %v7937_v7 = vld [vmem:[%s11267_s1 + $0xba0] ss:$16 sps:$4 sm:$0xff]  }
 0x13b   :  { %5137 = vmatpush1.bf16.msra.mxu0 %v7845_v8  ;;  %5670 = vmatpush1.bf16.msra.mxu1 %v7848_v9  ;;  %v7940_v8 = vld [vmem:[%s11267_s1 + $0xba8] ss:$16 sps:$4 sm:$0xff]   ;;  %v7945_v9 = vld [vmem:[%s11267_s1 + $0xbc4] ss:$16 sps:$4 sm:$0xff]  }
 0x13c   :  { %5138 = vmatprep.subr.bf16.mxu0 %v7853_v10  ;;  %5671 = vmatprep.subr.bf16.mxu1 %v7856_v12  ;;  %v7948_v10 = vld [vmem:[%s11267_s1 + $0xbcc] ss:$16 sps:$4 sm:$0xff]   ;;  %v7943_v12 = vld [vmem:[%s11267_s1 + $0xbc0] ss:$16 sps:$4 sm:$0xff]  }
 0x13f   :  { %5139 = vmatpush1.bf16.msra.mxu0 %v7851_v13  ;;  %5672 = vmatpush1.bf16.msra.mxu1 %v7854_v15  ;;  %v7946_v13 = vld [vmem:[%s11267_s1 + $0xbc8] ss:$16 sps:$4 sm:$0xff]   ;;  %v7951_v15 = vld [vmem:[%s11267_s1 + $0xbe4] ss:$16 sps:$4 sm:$0xff]  }
 0x140   :  { %5149 = vmatprep.subr.bf16.mxu0 %v7861_v11  ;;  %5682 = vmatprep.subr.bf16.mxu1 %v7864_v17  ;;  %v7954_v11 = vld [vmem:[%s11267_s1 + $0xbec] ss:$16 sps:$4 sm:$0xff]   ;;  %v7949_v17 = vld [vmem:[%s11267_s1 + $0xbe0] ss:$16 sps:$4 sm:$0xff]  }
 0x142   :  { %5141 = vmatmul.mubr.bf16.vlgmr.msra.gmra.mrb[0].mxu0 %v6374_v14  ;;  %5674 = vmatmul.mubr.bf16.vlgmr.msra.gmra.mrb[0].mxu1 %v6374_v14  ;;  %v7952_v14 = vld [vmem:[%s11267_s1 + $0xbe8] ss:$16 sps:$4 sm:$0xff]  }
 0x143   :  { %5150 = vmatpush1.bf16.msra.mxu0 %v7859_v19  ;;  %5683 = vmatpush1.bf16.msra.mxu1 %v7862_v20  ;;  %v7959_v19 = vld [vmem:[%s11267_s1 + $0xc04] ss:$16 sps:$4 sm:$0xff]   ;;  %v7962_v20 = vld [vmem:[%s11267_s1 + $0xc0c] ss:$16 sps:$4 sm:$0xff]  }
 0x144   :  { %5151 = vmatprep.subr.bf16.mxu0 %v7867_v21  ;;  %5684 = vmatprep.subr.bf16.mxu1 %v7870_v16  ;;  %v9864_v21 = vld [vmem:[%s11268_s0 + $0x30] sm:$0xff]  ;;  %v6376_v16 = vcombine.low %v9663_v18, %v9663_v18  ;;  %v7968_v18 = vld [vmem:[%s11267_s1 + $0xc2c] ss:$16 sps:$4 sm:$0xff]  }
 0x145   :  { %5181 = vmatprep.mubr.bf16.mxu0 %v6377_v22  ;;  %5714 = vmatprep.mubr.bf16.mxu1 %v6377_v22  ;;  %v7957_v22 = vld [vmem:[%s11267_s1 + $0xc00] ss:$16 sps:$4 sm:$0xff]  }
 0x147   :  { %5152 = vmatpush1.bf16.msra.mxu0 %v7865_v23  ;;  %5685 = vmatpush1.bf16.msra.mxu1 %v7868_v24  ;;  %v7960_v23 = vld [vmem:[%s11267_s1 + $0xc08] ss:$16 sps:$4 sm:$0xff]   ;;  %v7965_v24 = vld [vmem:[%s11267_s1 + $0xc24] ss:$16 sps:$4 sm:$0xff]  }
 0x148   :  { %5153 = vmatprep.subr.bf16.mxu0 %v7873_v25  ;;  %5686 = vmatprep.subr.bf16.mxu1 %v7876_v26  ;;  %v6379_v25 = vcombine.high %v9864_v21, %v9864_v21  ;;  %v7963_v26 = vld [vmem:[%s11267_s1 + $0xc20] ss:$16 sps:$4 sm:$0xff]  }
 0x14b   :  { %5154 = vmatpush1.bf16.msra.mxu0 %v7871_v27  ;;  %5687 = vmatpush1.bf16.msra.mxu1 %v7874_v28  ;;  %v7966_v27 = vld [vmem:[%s11267_s1 + $0xc28] ss:$16 sps:$4 sm:$0xff]   ;;  %v7971_v28 = vld [vmem:[%s11267_s1 + $0xc44] ss:$16 sps:$4 sm:$0xff]  }
 0x14c   :  { %5155 = vmatprep.subr.bf16.mxu0 %v7879_v29  ;;  %5688 = vmatprep.subr.bf16.mxu1 %v7882_v30  ;;  %v7974_v29 = vld [vmem:[%s11267_s1 + $0xc4c] ss:$16 sps:$4 sm:$0xff]   ;;  %v7969_v30 = vld [vmem:[%s11267_s1 + $0xc40] ss:$16 sps:$4 sm:$0xff]  }
 0x14f   :  { %5156 = vmatpush1.bf16.msra.mxu0 %v7877_v31  ;;  %5689 = vmatpush1.bf16.msra.mxu1 %v7880_v32  ;;  %v7972_v31 = vld [vmem:[%s11267_s1 + $0xc48] ss:$16 sps:$4 sm:$0xff]   ;;  %v7977_v32 = vld [vmem:[%s11267_s1 + $0xc64] ss:$16 sps:$4 sm:$0xff]  }
 0x150   :  { %5157 = vmatprep.subr.bf16.mxu0 %v7885_v33  ;;  %5690 = vmatprep.subr.bf16.mxu1 %v7888_v34  ;;  %v7980_v33 = vld [vmem:[%s11267_s1 + $0xc6c] ss:$16 sps:$4 sm:$0xff]   ;;  %v7975_v34 = vld [vmem:[%s11267_s1 + $0xc60] ss:$16 sps:$4 sm:$0xff]  }
 0x153   :  { %5158 = vmatpush1.bf16.msra.mxu0 %v7883_v35  ;;  %5691 = vmatpush1.bf16.msra.mxu1 %v7886_v36  ;;  %v7978_v35 = vld [vmem:[%s11267_s1 + $0xc68] ss:$16 sps:$4 sm:$0xff]   ;;  %v7983_v36 = vld [vmem:[%s11267_s1 + $0xc84] ss:$16 sps:$4 sm:$0xff]  }
 0x154   :  { %5159 = vmatprep.subr.bf16.mxu0 %v7891_v37  ;;  %5692 = vmatprep.subr.bf16.mxu1 %v7894_v38  ;;  %v7986_v37 = vld [vmem:[%s11267_s1 + $0xc8c] ss:$16 sps:$4 sm:$0xff]   ;;  %v7981_v38 = vld [vmem:[%s11267_s1 + $0xc80] ss:$16 sps:$4 sm:$0xff]  }
 0x157   :  { %5160 = vmatpush1.bf16.msra.mxu0 %v7889_v39  ;;  %5693 = vmatpush1.bf16.msra.mxu1 %v7892_v40  ;;  %v7984_v39 = vld [vmem:[%s11267_s1 + $0xc88] ss:$16 sps:$4 sm:$0xff]   ;;  %v7989_v40 = vld [vmem:[%s11267_s1 + $0xca4] ss:$16 sps:$4 sm:$0xff]  }
 0x158   :  { %5161 = vmatprep.subr.bf16.mxu0 %v7897_v41  ;;  %5694 = vmatprep.subr.bf16.mxu1 %v7900_v42  ;;  %v7992_v41 = vld [vmem:[%s11267_s1 + $0xcac] ss:$16 sps:$4 sm:$0xff]   ;;  %v7987_v42 = vld [vmem:[%s11267_s1 + $0xca0] ss:$16 sps:$4 sm:$0xff]  }
 0x15b   :  { %5162 = vmatpush1.bf16.msra.mxu0 %v7895_v43  ;;  %5695 = vmatpush1.bf16.msra.mxu1 %v7898_v44  ;;  %v7990_v43 = vld [vmem:[%s11267_s1 + $0xca8] ss:$16 sps:$4 sm:$0xff]   ;;  %v7995_v44 = vld [vmem:[%s11267_s1 + $0xcc4] ss:$16 sps:$4 sm:$0xff]  }
 0x15c   :  { %5163 = vmatprep.subr.bf16.mxu0 %v7903_v45  ;;  %5696 = vmatprep.subr.bf16.mxu1 %v7906_v46  ;;  %v7998_v45 = vld [vmem:[%s11267_s1 + $0xccc] ss:$16 sps:$4 sm:$0xff]   ;;  %v7993_v46 = vld [vmem:[%s11267_s1 + $0xcc0] ss:$16 sps:$4 sm:$0xff]  }
 0x15f   :  { %5164 = vmatpush1.bf16.msra.mxu0 %v7901_v47  ;;  %5697 = vmatpush1.bf16.msra.mxu1 %v7904_v48  ;;  %v7996_v47 = vld [vmem:[%s11267_s1 + $0xcc8] ss:$16 sps:$4 sm:$0xff]   ;;  %v8001_v48 = vld [vmem:[%s11267_s1 + $0xce4] ss:$16 sps:$4 sm:$0xff]  }
 0x160   :  { %5165 = vmatprep.subr.bf16.mxu0 %v7909_v49  ;;  %5698 = vmatprep.subr.bf16.mxu1 %v7912_v50  ;;  %v8004_v49 = vld [vmem:[%s11267_s1 + $0xcec] ss:$16 sps:$4 sm:$0xff]   ;;  %v7999_v50 = vld [vmem:[%s11267_s1 + $0xce0] ss:$16 sps:$4 sm:$0xff]  }
 0x163   :  { %5166 = vmatpush1.bf16.msra.mxu0 %v7907_v51  ;;  %5699 = vmatpush1.bf16.msra.mxu1 %v7910_v52  ;;  %v8002_v51 = vld [vmem:[%s11267_s1 + $0xce8] ss:$16 sps:$4 sm:$0xff]   ;;  %v8007_v52 = vld [vmem:[%s11267_s1 + $0xd04] ss:$16 sps:$4 sm:$0xff]  }
 0x164   :  { %5167 = vmatprep.subr.bf16.mxu0 %v7915_v53  ;;  %5700 = vmatprep.subr.bf16.mxu1 %v7918_v54  ;;  %v8010_v53 = vld [vmem:[%s11267_s1 + $0xd0c] ss:$16 sps:$4 sm:$0xff]   ;;  %v8005_v54 = vld [vmem:[%s11267_s1 + $0xd00] ss:$16 sps:$4 sm:$0xff]  }
 0x167   :  { %5168 = vmatpush1.bf16.msra.mxu0 %v7913_v55  ;;  %5701 = vmatpush1.bf16.msra.mxu1 %v7916_v56  ;;  %v8008_v55 = vld [vmem:[%s11267_s1 + $0xd08] ss:$16 sps:$4 sm:$0xff]   ;;  %v8013_v56 = vld [vmem:[%s11267_s1 + $0xd24] ss:$16 sps:$4 sm:$0xff]  }
 0x168   :  { %5169 = vmatprep.subr.bf16.mxu0 %v7921_v57  ;;  %5702 = vmatprep.subr.bf16.mxu1 %v7924_v58  ;;  %v8016_v57 = vld [vmem:[%s11267_s1 + $0xd2c] ss:$16 sps:$4 sm:$0xff]   ;;  %v8011_v58 = vld [vmem:[%s11267_s1 + $0xd20] ss:$16 sps:$4 sm:$0xff]  }
 0x16b   :  { %5170 = vmatpush1.bf16.msra.mxu0 %v7919_v59  ;;  %5703 = vmatpush1.bf16.msra.mxu1 %v7922_v60  ;;  %v8014_v59 = vld [vmem:[%s11267_s1 + $0xd28] ss:$16 sps:$4 sm:$0xff]   ;;  %v8019_v60 = vld [vmem:[%s11267_s1 + $0xd44] ss:$16 sps:$4 sm:$0xff]  }
 0x16c   :  { %5171 = vmatprep.subr.bf16.mxu0 %v7927_v61  ;;  %5704 = vmatprep.subr.bf16.mxu1 %v7930_v62  ;;  %v8022_v61 = vld [vmem:[%s11267_s1 + $0xd4c] ss:$16 sps:$4 sm:$0xff]   ;;  %v8017_v62 = vld [vmem:[%s11267_s1 + $0xd40] ss:$16 sps:$4 sm:$0xff]  }
 0x16f   :  { %5172 = vmatpush1.bf16.msra.mxu0 %v7925_v63  ;;  %5705 = vmatpush1.bf16.msra.mxu1 %v7928_v0  ;;  %v8020_v63 = vld [vmem:[%s11267_s1 + $0xd48] ss:$16 sps:$4 sm:$0xff]   ;;  %v8025_v0 = vld [vmem:[%s11267_s1 + $0xd64] ss:$16 sps:$4 sm:$0xff]  }
 0x170   :  { %5173 = vmatprep.subr.bf16.mxu0 %v7933_v1  ;;  %5706 = vmatprep.subr.bf16.mxu1 %v7936_v2  ;;  %v8028_v1 = vld [vmem:[%s11267_s1 + $0xd6c] ss:$16 sps:$4 sm:$0xff]   ;;  %v8023_v2 = vld [vmem:[%s11267_s1 + $0xd60] ss:$16 sps:$4 sm:$0xff]  }
 0x173   :  { %5174 = vmatpush1.bf16.msra.mxu0 %v7931_v3  ;;  %5707 = vmatpush1.bf16.msra.mxu1 %v7934_v4  ;;  %v8026_v3 = vld [vmem:[%s11267_s1 + $0xd68] ss:$16 sps:$4 sm:$0xff]   ;;  %v8031_v4 = vld [vmem:[%s11267_s1 + $0xd84] ss:$16 sps:$4 sm:$0xff]  }
 0x174   :  { %5175 = vmatprep.subr.bf16.mxu0 %v7939_v5  ;;  %5708 = vmatprep.subr.bf16.mxu1 %v7942_v6  ;;  %v8034_v5 = vld [vmem:[%s11267_s1 + $0xd8c] ss:$16 sps:$4 sm:$0xff]   ;;  %v8029_v6 = vld [vmem:[%s11267_s1 + $0xd80] ss:$16 sps:$4 sm:$0xff]  }
 0x177   :  { %5176 = vmatpush1.bf16.msra.mxu0 %v7937_v7  ;;  %5709 = vmatpush1.bf16.msra.mxu1 %v7940_v8  ;;  %v8032_v7 = vld [vmem:[%s11267_s1 + $0xd88] ss:$16 sps:$4 sm:$0xff]   ;;  %v8037_v8 = vld [vmem:[%s11267_s1 + $0xda4] ss:$16 sps:$4 sm:$0xff]  }
 0x178   :  { %5177 = vmatprep.subr.bf16.mxu0 %v7945_v9  ;;  %5710 = vmatprep.subr.bf16.mxu1 %v7948_v10  ;;  %v8040_v9 = vld [vmem:[%s11267_s1 + $0xdac] ss:$16 sps:$4 sm:$0xff]   ;;  %v8035_v10 = vld [vmem:[%s11267_s1 + $0xda0] ss:$16 sps:$4 sm:$0xff]  }
 0x17b   :  { %5178 = vmatpush1.bf16.msra.mxu0 %v7943_v12  ;;  %5711 = vmatpush1.bf16.msra.mxu1 %v7946_v13  ;;  %v8038_v12 = vld [vmem:[%s11267_s1 + $0xda8] ss:$16 sps:$4 sm:$0xff]   ;;  %v8043_v13 = vld [vmem:[%s11267_s1 + $0xdc4] ss:$16 sps:$4 sm:$0xff]  }
 0x17c   :  { %5179 = vmatprep.subr.bf16.mxu0 %v7951_v15  ;;  %5712 = vmatprep.subr.bf16.mxu1 %v7954_v11  ;;  %v8046_v15 = vld [vmem:[%s11267_s1 + $0xdcc] ss:$16 sps:$4 sm:$0xff]   ;;  %v8041_v11 = vld [vmem:[%s11267_s1 + $0xdc0] ss:$16 sps:$4 sm:$0xff]  }
 0x17f   :  { %5180 = vmatpush1.bf16.msra.mxu0 %v7949_v17  ;;  %5713 = vmatpush1.bf16.msra.mxu1 %v7952_v14  ;;  %v8044_v17 = vld [vmem:[%s11267_s1 + $0xdc8] ss:$16 sps:$4 sm:$0xff]   ;;  %v8049_v14 = vld [vmem:[%s11267_s1 + $0xde4] ss:$16 sps:$4 sm:$0xff]  }
 0x180   :  { %5190 = vmatprep.subr.bf16.mxu0 %v7959_v19  ;;  %5723 = vmatprep.subr.bf16.mxu1 %v7962_v20  ;;  %v8052_v19 = vld [vmem:[%s11267_s1 + $0xdec] ss:$16 sps:$4 sm:$0xff]   ;;  %v8047_v20 = vld [vmem:[%s11267_s1 + $0xde0] ss:$16 sps:$4 sm:$0xff]  }
 0x182   :  { %5182 = vmatmul.mubr.bf16.vlgmr.msra.gmra.mrb[0].mxu0 %v6376_v16  ;;  %5715 = vmatmul.mubr.bf16.vlgmr.msra.gmra.mrb[0].mxu1 %v6376_v16  ;;  %v8050_v16 = vld [vmem:[%s11267_s1 + $0xde8] ss:$16 sps:$4 sm:$0xff]  }
 0x183   :  { %5191 = vmatpush1.bf16.msra.mxu0 %v7957_v22  ;;  %5724 = vmatpush1.bf16.msra.mxu1 %v7960_v23  ;;  %v8057_v22 = vld [vmem:[%s11267_s1 + $0xe04] ss:$16 sps:$4 sm:$0xff]   ;;  %v8060_v23 = vld [vmem:[%s11267_s1 + $0xe0c] ss:$16 sps:$4 sm:$0xff]  }
 0x184   :  { %5192 = vmatprep.subr.bf16.mxu0 %v7965_v24  ;;  %5725 = vmatprep.subr.bf16.mxu1 %v7968_v18  ;;  %v10065_v24 = vld [vmem:[%s11268_s0 + $0x38] sm:$0xff]  ;;  %v6378_v18 = vcombine.low %v9864_v21, %v9864_v21 }
 0x185   :  { %5222 = vmatprep.mubr.bf16.mxu0 %v6379_v25  ;;  %5755 = vmatprep.mubr.bf16.mxu1 %v6379_v25  ;;  %v8055_v25 = vld [vmem:[%s11267_s1 + $0xe00] ss:$16 sps:$4 sm:$0xff]   ;;  %v8066_v21 = vld [vmem:[%s11267_s1 + $0xe2c] ss:$16 sps:$4 sm:$0xff]  }
 0x187   :  { %5193 = vmatpush1.bf16.msra.mxu0 %v7963_v26  ;;  %5726 = vmatpush1.bf16.msra.mxu1 %v7966_v27  ;;  %v8058_v26 = vld [vmem:[%s11267_s1 + $0xe08] ss:$16 sps:$4 sm:$0xff]   ;;  %v8063_v27 = vld [vmem:[%s11267_s1 + $0xe24] ss:$16 sps:$4 sm:$0xff]  }
 0x188   :  { %5194 = vmatprep.subr.bf16.mxu0 %v7971_v28  ;;  %5727 = vmatprep.subr.bf16.mxu1 %v7974_v29  ;;  %v6381_v28 = vcombine.high %v10065_v24, %v10065_v24  ;;  %v8061_v29 = vld [vmem:[%s11267_s1 + $0xe20] ss:$16 sps:$4 sm:$0xff]  }
 0x18b   :  { %5195 = vmatpush1.bf16.msra.mxu0 %v7969_v30  ;;  %5728 = vmatpush1.bf16.msra.mxu1 %v7972_v31  ;;  %v8064_v30 = vld [vmem:[%s11267_s1 + $0xe28] ss:$16 sps:$4 sm:$0xff]   ;;  %v8069_v31 = vld [vmem:[%s11267_s1 + $0xe44] ss:$16 sps:$4 sm:$0xff]  }
 0x18c   :  { %5196 = vmatprep.subr.bf16.mxu0 %v7977_v32  ;;  %5729 = vmatprep.subr.bf16.mxu1 %v7980_v33  ;;  %v8072_v32 = vld [vmem:[%s11267_s1 + $0xe4c] ss:$16 sps:$4 sm:$0xff]   ;;  %v8067_v33 = vld [vmem:[%s11267_s1 + $0xe40] ss:$16 sps:$4 sm:$0xff]  }
 0x18f   :  { %5197 = vmatpush1.bf16.msra.mxu0 %v7975_v34  ;;  %5730 = vmatpush1.bf16.msra.mxu1 %v7978_v35  ;;  %v8070_v34 = vld [vmem:[%s11267_s1 + $0xe48] ss:$16 sps:$4 sm:$0xff]   ;;  %v8075_v35 = vld [vmem:[%s11267_s1 + $0xe64] ss:$16 sps:$4 sm:$0xff]  }
 0x190   :  { %5198 = vmatprep.subr.bf16.mxu0 %v7983_v36  ;;  %5731 = vmatprep.subr.bf16.mxu1 %v7986_v37  ;;  %v8078_v36 = vld [vmem:[%s11267_s1 + $0xe6c] ss:$16 sps:$4 sm:$0xff]   ;;  %v8073_v37 = vld [vmem:[%s11267_s1 + $0xe60] ss:$16 sps:$4 sm:$0xff]  }
 0x193   :  { %5199 = vmatpush1.bf16.msra.mxu0 %v7981_v38  ;;  %5732 = vmatpush1.bf16.msra.mxu1 %v7984_v39  ;;  %v8076_v38 = vld [vmem:[%s11267_s1 + $0xe68] ss:$16 sps:$4 sm:$0xff]   ;;  %v8081_v39 = vld [vmem:[%s11267_s1 + $0xe84] ss:$16 sps:$4 sm:$0xff]  }
 0x194   :  { %5200 = vmatprep.subr.bf16.mxu0 %v7989_v40  ;;  %5733 = vmatprep.subr.bf16.mxu1 %v7992_v41  ;;  %v8084_v40 = vld [vmem:[%s11267_s1 + $0xe8c] ss:$16 sps:$4 sm:$0xff]   ;;  %v8079_v41 = vld [vmem:[%s11267_s1 + $0xe80] ss:$16 sps:$4 sm:$0xff]  }
 0x197   :  { %5201 = vmatpush1.bf16.msra.mxu0 %v7987_v42  ;;  %5734 = vmatpush1.bf16.msra.mxu1 %v7990_v43  ;;  %v8082_v42 = vld [vmem:[%s11267_s1 + $0xe88] ss:$16 sps:$4 sm:$0xff]   ;;  %v8087_v43 = vld [vmem:[%s11267_s1 + $0xea4] ss:$16 sps:$4 sm:$0xff]  }
 0x198   :  { %5202 = vmatprep.subr.bf16.mxu0 %v7995_v44  ;;  %5735 = vmatprep.subr.bf16.mxu1 %v7998_v45  ;;  %v8090_v44 = vld [vmem:[%s11267_s1 + $0xeac] ss:$16 sps:$4 sm:$0xff]   ;;  %v8085_v45 = vld [vmem:[%s11267_s1 + $0xea0] ss:$16 sps:$4 sm:$0xff]  }
 0x19b   :  { %5203 = vmatpush1.bf16.msra.mxu0 %v7993_v46  ;;  %5736 = vmatpush1.bf16.msra.mxu1 %v7996_v47  ;;  %v8088_v46 = vld [vmem:[%s11267_s1 + $0xea8] ss:$16 sps:$4 sm:$0xff]   ;;  %v8093_v47 = vld [vmem:[%s11267_s1 + $0xec4] ss:$16 sps:$4 sm:$0xff]  }
 0x19c   :  { %5204 = vmatprep.subr.bf16.mxu0 %v8001_v48  ;;  %5737 = vmatprep.subr.bf16.mxu1 %v8004_v49  ;;  %v8096_v48 = vld [vmem:[%s11267_s1 + $0xecc] ss:$16 sps:$4 sm:$0xff]   ;;  %v8091_v49 = vld [vmem:[%s11267_s1 + $0xec0] ss:$16 sps:$4 sm:$0xff]  }
 0x19f   :  { %5205 = vmatpush1.bf16.msra.mxu0 %v7999_v50  ;;  %5738 = vmatpush1.bf16.msra.mxu1 %v8002_v51  ;;  %v8094_v50 = vld [vmem:[%s11267_s1 + $0xec8] ss:$16 sps:$4 sm:$0xff]   ;;  %v8099_v51 = vld [vmem:[%s11267_s1 + $0xee4] ss:$16 sps:$4 sm:$0xff]  }
 0x1a0   :  { %5206 = vmatprep.subr.bf16.mxu0 %v8007_v52  ;;  %5739 = vmatprep.subr.bf16.mxu1 %v8010_v53  ;;  %v8102_v52 = vld [vmem:[%s11267_s1 + $0xeec] ss:$16 sps:$4 sm:$0xff]   ;;  %v8097_v53 = vld [vmem:[%s11267_s1 + $0xee0] ss:$16 sps:$4 sm:$0xff]  }
 0x1a3   :  { %5207 = vmatpush1.bf16.msra.mxu0 %v8005_v54  ;;  %5740 = vmatpush1.bf16.msra.mxu1 %v8008_v55  ;;  %v8100_v54 = vld [vmem:[%s11267_s1 + $0xee8] ss:$16 sps:$4 sm:$0xff]   ;;  %v8105_v55 = vld [vmem:[%s11267_s1 + $0xf04] ss:$16 sps:$4 sm:$0xff]  }
 0x1a4   :  { %5208 = vmatprep.subr.bf16.mxu0 %v8013_v56  ;;  %5741 = vmatprep.subr.bf16.mxu1 %v8016_v57  ;;  %v8108_v56 = vld [vmem:[%s11267_s1 + $0xf0c] ss:$16 sps:$4 sm:$0xff]   ;;  %v8103_v57 = vld [vmem:[%s11267_s1 + $0xf00] ss:$16 sps:$4 sm:$0xff]  }
 0x1a7   :  { %5209 = vmatpush1.bf16.msra.mxu0 %v8011_v58  ;;  %5742 = vmatpush1.bf16.msra.mxu1 %v8014_v59  ;;  %v8106_v58 = vld [vmem:[%s11267_s1 + $0xf08] ss:$16 sps:$4 sm:$0xff]   ;;  %v8111_v59 = vld [vmem:[%s11267_s1 + $0xf24] ss:$16 sps:$4 sm:$0xff]  }
 0x1a8   :  { %5210 = vmatprep.subr.bf16.mxu0 %v8019_v60  ;;  %5743 = vmatprep.subr.bf16.mxu1 %v8022_v61  ;;  %v8114_v60 = vld [vmem:[%s11267_s1 + $0xf2c] ss:$16 sps:$4 sm:$0xff]   ;;  %v8109_v61 = vld [vmem:[%s11267_s1 + $0xf20] ss:$16 sps:$4 sm:$0xff]  }
 0x1ab   :  { %5211 = vmatpush1.bf16.msra.mxu0 %v8017_v62  ;;  %5744 = vmatpush1.bf16.msra.mxu1 %v8020_v63  ;;  %v8112_v62 = vld [vmem:[%s11267_s1 + $0xf28] ss:$16 sps:$4 sm:$0xff]   ;;  %v8117_v63 = vld [vmem:[%s11267_s1 + $0xf44] ss:$16 sps:$4 sm:$0xff]  }
 0x1ac   :  { %5212 = vmatprep.subr.bf16.mxu0 %v8025_v0  ;;  %5745 = vmatprep.subr.bf16.mxu1 %v8028_v1  ;;  %v8120_v0 = vld [vmem:[%s11267_s1 + $0xf4c] ss:$16 sps:$4 sm:$0xff]   ;;  %v8115_v1 = vld [vmem:[%s11267_s1 + $0xf40] ss:$16 sps:$4 sm:$0xff]  }
 0x1af   :  { %5213 = vmatpush1.bf16.msra.mxu0 %v8023_v2  ;;  %5746 = vmatpush1.bf16.msra.mxu1 %v8026_v3  ;;  %v8118_v2 = vld [vmem:[%s11267_s1 + $0xf48] ss:$16 sps:$4 sm:$0xff]   ;;  %v8123_v3 = vld [vmem:[%s11267_s1 + $0xf64] ss:$16 sps:$4 sm:$0xff]  }
 0x1b0   :  { %5214 = vmatprep.subr.bf16.mxu0 %v8031_v4  ;;  %5747 = vmatprep.subr.bf16.mxu1 %v8034_v5  ;;  %v8126_v4 = vld [vmem:[%s11267_s1 + $0xf6c] ss:$16 sps:$4 sm:$0xff]   ;;  %v8121_v5 = vld [vmem:[%s11267_s1 + $0xf60] ss:$16 sps:$4 sm:$0xff]  }
 0x1b3   :  { %5215 = vmatpush1.bf16.msra.mxu0 %v8029_v6  ;;  %5748 = vmatpush1.bf16.msra.mxu1 %v8032_v7  ;;  %v8124_v6 = vld [vmem:[%s11267_s1 + $0xf68] ss:$16 sps:$4 sm:$0xff]   ;;  %v8129_v7 = vld [vmem:[%s11267_s1 + $0xf84] ss:$16 sps:$4 sm:$0xff]  }
 0x1b4   :  { %5216 = vmatprep.subr.bf16.mxu0 %v8037_v8  ;;  %5749 = vmatprep.subr.bf16.mxu1 %v8040_v9  ;;  %v8132_v8 = vld [vmem:[%s11267_s1 + $0xf8c] ss:$16 sps:$4 sm:$0xff]   ;;  %v8127_v9 = vld [vmem:[%s11267_s1 + $0xf80] ss:$16 sps:$4 sm:$0xff]  }
 0x1b7   :  { %5217 = vmatpush1.bf16.msra.mxu0 %v8035_v10  ;;  %5750 = vmatpush1.bf16.msra.mxu1 %v8038_v12  ;;  %v8130_v10 = vld [vmem:[%s11267_s1 + $0xf88] ss:$16 sps:$4 sm:$0xff]   ;;  %v8135_v12 = vld [vmem:[%s11267_s1 + $0xfa4] ss:$16 sps:$4 sm:$0xff]  }
 0x1b8   :  { %5218 = vmatprep.subr.bf16.mxu0 %v8043_v13  ;;  %5751 = vmatprep.subr.bf16.mxu1 %v8046_v15  ;;  %v8138_v13 = vld [vmem:[%s11267_s1 + $0xfac] ss:$16 sps:$4 sm:$0xff]   ;;  %v8133_v15 = vld [vmem:[%s11267_s1 + $0xfa0] ss:$16 sps:$4 sm:$0xff]  }
 0x1bb   :  { %5219 = vmatpush1.bf16.msra.mxu0 %v8041_v11  ;;  %5752 = vmatpush1.bf16.msra.mxu1 %v8044_v17  ;;  %v8136_v11 = vld [vmem:[%s11267_s1 + $0xfa8] ss:$16 sps:$4 sm:$0xff]   ;;  %v8141_v17 = vld [vmem:[%s11267_s1 + $0xfc4] ss:$16 sps:$4 sm:$0xff]  }
 0x1bc   :  { %5220 = vmatprep.subr.bf16.mxu0 %v8049_v14  ;;  %5753 = vmatprep.subr.bf16.mxu1 %v8052_v19  ;;  %v8144_v14 = vld [vmem:[%s11267_s1 + $0xfcc] ss:$16 sps:$4 sm:$0xff]   ;;  %v8139_v19 = vld [vmem:[%s11267_s1 + $0xfc0] ss:$16 sps:$4 sm:$0xff]  }
 0x1bf   :  { %5221 = vmatpush1.bf16.msra.mxu0 %v8047_v20  ;;  %5754 = vmatpush1.bf16.msra.mxu1 %v8050_v16  ;;  %v8142_v20 = vld [vmem:[%s11267_s1 + $0xfc8] ss:$16 sps:$4 sm:$0xff]   ;;  %v8147_v16 = vld [vmem:[%s11267_s1 + $0xfe4] ss:$16 sps:$4 sm:$0xff]  }
 0x1c0   :  { %5231 = vmatprep.subr.bf16.mxu0 %v8057_v22  ;;  %5764 = vmatprep.subr.bf16.mxu1 %v8060_v23  ;;  %v8150_v22 = vld [vmem:[%s11267_s1 + $0xfec] ss:$16 sps:$4 sm:$0xff]   ;;  %v8145_v23 = vld [vmem:[%s11267_s1 + $0xfe0] ss:$16 sps:$4 sm:$0xff]  }
 0x1c2   :  { %5223 = vmatmul.mubr.bf16.vlgmr.msra.gmra.mrb[0].mxu0 %v6378_v18  ;;  %5756 = vmatmul.mubr.bf16.vlgmr.msra.gmra.mrb[0].mxu1 %v6378_v18  ;;  %v8148_v18 = vld [vmem:[%s11267_s1 + $0xfe8] ss:$16 sps:$4 sm:$0xff]  }
 0x1c3   :  { %5232 = vmatpush1.bf16.msra.mxu0 %v8055_v25  ;;  %5765 = vmatpush1.bf16.msra.mxu1 %v8058_v26  ;;  %v8155_v25 = vld [vmem:[%s11267_s1 + $0x1004] ss:$16 sps:$4 sm:$0xff]   ;;  %v8158_v26 = vld [vmem:[%s11267_s1 + $0x100c] ss:$16 sps:$4 sm:$0xff]  }
 0x1c4   :  { %5233 = vmatprep.subr.bf16.mxu0 %v8063_v27  ;;  %5766 = vmatprep.subr.bf16.mxu1 %v8066_v21  ;;  %v6380_v27 = vcombine.low %v10065_v24, %v10065_v24  ;;  %v10268_v21 = vld [vmem:[%s11268_s0 + $0x40] sm:$0xff] }
 0x1c5   :  { %5263 = vmatprep.mubr.bf16.mxu0 %v6381_v28  ;;  %5796 = vmatprep.mubr.bf16.mxu1 %v6381_v28  ;;  %v8153_v28 = vld [vmem:[%s11267_s1 + $0x1000] ss:$16 sps:$4 sm:$0xff]   ;;  %v8161_v24 = vld [vmem:[%s11267_s1 + $0x1024] ss:$16 sps:$4 sm:$0xff]  }
 0x1c7   :  { %5234 = vmatpush1.bf16.msra.mxu0 %v8061_v29  ;;  %5767 = vmatpush1.bf16.msra.mxu1 %v8064_v30  ;;  %v8156_v29 = vld [vmem:[%s11267_s1 + $0x1008] ss:$16 sps:$4 sm:$0xff]   ;;  %v8164_v30 = vld [vmem:[%s11267_s1 + $0x102c] ss:$16 sps:$4 sm:$0xff]  }
 0x1c8   :  { %5235 = vmatprep.subr.bf16.mxu0 %v8069_v31  ;;  %5768 = vmatprep.subr.bf16.mxu1 %v8072_v32  ;;  %v6383_v31 = vcombine.high %v10268_v21, %v10268_v21  ;;  %v8159_v32 = vld [vmem:[%s11267_s1 + $0x1020] ss:$16 sps:$4 sm:$0xff]  }
 0x1cb   :  { %5236 = vmatpush1.bf16.msra.mxu0 %v8067_v33  ;;  %5769 = vmatpush1.bf16.msra.mxu1 %v8070_v34  ;;  %v8162_v33 = vld [vmem:[%s11267_s1 + $0x1028] ss:$16 sps:$4 sm:$0xff]   ;;  %v8167_v34 = vld [vmem:[%s11267_s1 + $0x1044] ss:$16 sps:$4 sm:$0xff]  }
 0x1cc   :  { %5237 = vmatprep.subr.bf16.mxu0 %v8075_v35  ;;  %5770 = vmatprep.subr.bf16.mxu1 %v8078_v36  ;;  %v8170_v35 = vld [vmem:[%s11267_s1 + $0x104c] ss:$16 sps:$4 sm:$0xff]   ;;  %v8165_v36 = vld [vmem:[%s11267_s1 + $0x1040] ss:$16 sps:$4 sm:$0xff]  }
 0x1cf   :  { %5238 = vmatpush1.bf16.msra.mxu0 %v8073_v37  ;;  %5771 = vmatpush1.bf16.msra.mxu1 %v8076_v38  ;;  %v8168_v37 = vld [vmem:[%s11267_s1 + $0x1048] ss:$16 sps:$4 sm:$0xff]   ;;  %v8173_v38 = vld [vmem:[%s11267_s1 + $0x1064] ss:$16 sps:$4 sm:$0xff]  }
 0x1d0   :  { %5239 = vmatprep.subr.bf16.mxu0 %v8081_v39  ;;  %5772 = vmatprep.subr.bf16.mxu1 %v8084_v40  ;;  %v8176_v39 = vld [vmem:[%s11267_s1 + $0x106c] ss:$16 sps:$4 sm:$0xff]   ;;  %v8171_v40 = vld [vmem:[%s11267_s1 + $0x1060] ss:$16 sps:$4 sm:$0xff]  }
 0x1d3   :  { %5240 = vmatpush1.bf16.msra.mxu0 %v8079_v41  ;;  %5773 = vmatpush1.bf16.msra.mxu1 %v8082_v42  ;;  %v8174_v41 = vld [vmem:[%s11267_s1 + $0x1068] ss:$16 sps:$4 sm:$0xff]   ;;  %v8179_v42 = vld [vmem:[%s11267_s1 + $0x1084] ss:$16 sps:$4 sm:$0xff]  }
 0x1d4   :  { %5241 = vmatprep.subr.bf16.mxu0 %v8087_v43  ;;  %5774 = vmatprep.subr.bf16.mxu1 %v8090_v44  ;;  %v8182_v43 = vld [vmem:[%s11267_s1 + $0x108c] ss:$16 sps:$4 sm:$0xff]   ;;  %v8177_v44 = vld [vmem:[%s11267_s1 + $0x1080] ss:$16 sps:$4 sm:$0xff]  }
 0x1d7   :  { %5242 = vmatpush1.bf16.msra.mxu0 %v8085_v45  ;;  %5775 = vmatpush1.bf16.msra.mxu1 %v8088_v46  ;;  %v8180_v45 = vld [vmem:[%s11267_s1 + $0x1088] ss:$16 sps:$4 sm:$0xff]   ;;  %v8185_v46 = vld [vmem:[%s11267_s1 + $0x10a4] ss:$16 sps:$4 sm:$0xff]  }
 0x1d8   :  { %5243 = vmatprep.subr.bf16.mxu0 %v8093_v47  ;;  %5776 = vmatprep.subr.bf16.mxu1 %v8096_v48  ;;  %v8188_v47 = vld [vmem:[%s11267_s1 + $0x10ac] ss:$16 sps:$4 sm:$0xff]   ;;  %v8183_v48 = vld [vmem:[%s11267_s1 + $0x10a0] ss:$16 sps:$4 sm:$0xff]  }
 0x1db   :  { %5244 = vmatpush1.bf16.msra.mxu0 %v8091_v49  ;;  %5777 = vmatpush1.bf16.msra.mxu1 %v8094_v50  ;;  %v8186_v49 = vld [vmem:[%s11267_s1 + $0x10a8] ss:$16 sps:$4 sm:$0xff]   ;;  %v8191_v50 = vld [vmem:[%s11267_s1 + $0x10c4] ss:$16 sps:$4 sm:$0xff]  }
 0x1dc   :  { %5245 = vmatprep.subr.bf16.mxu0 %v8099_v51  ;;  %5778 = vmatprep.subr.bf16.mxu1 %v8102_v52  ;;  %v8194_v51 = vld [vmem:[%s11267_s1 + $0x10cc] ss:$16 sps:$4 sm:$0xff]   ;;  %v8189_v52 = vld [vmem:[%s11267_s1 + $0x10c0] ss:$16 sps:$4 sm:$0xff]  }
 0x1df   :  { %5246 = vmatpush1.bf16.msra.mxu0 %v8097_v53  ;;  %5779 = vmatpush1.bf16.msra.mxu1 %v8100_v54  ;;  %v8192_v53 = vld [vmem:[%s11267_s1 + $0x10c8] ss:$16 sps:$4 sm:$0xff]   ;;  %v8197_v54 = vld [vmem:[%s11267_s1 + $0x10e4] ss:$16 sps:$4 sm:$0xff]  }
 0x1e0   :  { %5247 = vmatprep.subr.bf16.mxu0 %v8105_v55  ;;  %5780 = vmatprep.subr.bf16.mxu1 %v8108_v56  ;;  %v8200_v55 = vld [vmem:[%s11267_s1 + $0x10ec] ss:$16 sps:$4 sm:$0xff]   ;;  %v8195_v56 = vld [vmem:[%s11267_s1 + $0x10e0] ss:$16 sps:$4 sm:$0xff]  }
 0x1e3   :  { %5248 = vmatpush1.bf16.msra.mxu0 %v8103_v57  ;;  %5781 = vmatpush1.bf16.msra.mxu1 %v8106_v58  ;;  %v8198_v57 = vld [vmem:[%s11267_s1 + $0x10e8] ss:$16 sps:$4 sm:$0xff]   ;;  %v8203_v58 = vld [vmem:[%s11267_s1 + $0x1104] ss:$16 sps:$4 sm:$0xff]  }
 0x1e4   :  { %5249 = vmatprep.subr.bf16.mxu0 %v8111_v59  ;;  %5782 = vmatprep.subr.bf16.mxu1 %v8114_v60  ;;  %v8206_v59 = vld [vmem:[%s11267_s1 + $0x110c] ss:$16 sps:$4 sm:$0xff]   ;;  %v8201_v60 = vld [vmem:[%s11267_s1 + $0x1100] ss:$16 sps:$4 sm:$0xff]  }
 0x1e7   :  { %5250 = vmatpush1.bf16.msra.mxu0 %v8109_v61  ;;  %5783 = vmatpush1.bf16.msra.mxu1 %v8112_v62  ;;  %v8204_v61 = vld [vmem:[%s11267_s1 + $0x1108] ss:$16 sps:$4 sm:$0xff]   ;;  %v8209_v62 = vld [vmem:[%s11267_s1 + $0x1124] ss:$16 sps:$4 sm:$0xff]  }
 0x1e8   :  { %5251 = vmatprep.subr.bf16.mxu0 %v8117_v63  ;;  %5784 = vmatprep.subr.bf16.mxu1 %v8120_v0  ;;  %v8212_v63 = vld [vmem:[%s11267_s1 + $0x112c] ss:$16 sps:$4 sm:$0xff]   ;;  %v8207_v0 = vld [vmem:[%s11267_s1 + $0x1120] ss:$16 sps:$4 sm:$0xff]  }
 0x1eb   :  { %5252 = vmatpush1.bf16.msra.mxu0 %v8115_v1  ;;  %5785 = vmatpush1.bf16.msra.mxu1 %v8118_v2  ;;  %v8210_v1 = vld [vmem:[%s11267_s1 + $0x1128] ss:$16 sps:$4 sm:$0xff]   ;;  %v8215_v2 = vld [vmem:[%s11267_s1 + $0x1144] ss:$16 sps:$4 sm:$0xff]  }
 0x1ec   :  { %5253 = vmatprep.subr.bf16.mxu0 %v8123_v3  ;;  %5786 = vmatprep.subr.bf16.mxu1 %v8126_v4  ;;  %v8218_v3 = vld [vmem:[%s11267_s1 + $0x114c] ss:$16 sps:$4 sm:$0xff]   ;;  %v8213_v4 = vld [vmem:[%s11267_s1 + $0x1140] ss:$16 sps:$4 sm:$0xff]  }
 0x1ef   :  { %5254 = vmatpush1.bf16.msra.mxu0 %v8121_v5  ;;  %5787 = vmatpush1.bf16.msra.mxu1 %v8124_v6  ;;  %v8216_v5 = vld [vmem:[%s11267_s1 + $0x1148] ss:$16 sps:$4 sm:$0xff]   ;;  %v8221_v6 = vld [vmem:[%s11267_s1 + $0x1164] ss:$16 sps:$4 sm:$0xff]  }
 0x1f0   :  { %5255 = vmatprep.subr.bf16.mxu0 %v8129_v7  ;;  %5788 = vmatprep.subr.bf16.mxu1 %v8132_v8  ;;  %v8224_v7 = vld [vmem:[%s11267_s1 + $0x116c] ss:$16 sps:$4 sm:$0xff]   ;;  %v8219_v8 = vld [vmem:[%s11267_s1 + $0x1160] ss:$16 sps:$4 sm:$0xff]  }
 0x1f3   :  { %5256 = vmatpush1.bf16.msra.mxu0 %v8127_v9  ;;  %5789 = vmatpush1.bf16.msra.mxu1 %v8130_v10  ;;  %v8222_v9 = vld [vmem:[%s11267_s1 + $0x1168] ss:$16 sps:$4 sm:$0xff]   ;;  %v8227_v10 = vld [vmem:[%s11267_s1 + $0x1184] ss:$16 sps:$4 sm:$0xff]  }
 0x1f4   :  { %5257 = vmatprep.subr.bf16.mxu0 %v8135_v12  ;;  %5790 = vmatprep.subr.bf16.mxu1 %v8138_v13  ;;  %v8230_v12 = vld [vmem:[%s11267_s1 + $0x118c] ss:$16 sps:$4 sm:$0xff]   ;;  %v8225_v13 = vld [vmem:[%s11267_s1 + $0x1180] ss:$16 sps:$4 sm:$0xff]  }
 0x1f7   :  { %5258 = vmatpush1.bf16.msra.mxu0 %v8133_v15  ;;  %5791 = vmatpush1.bf16.msra.mxu1 %v8136_v11  ;;  %v8228_v15 = vld [vmem:[%s11267_s1 + $0x1188] ss:$16 sps:$4 sm:$0xff]   ;;  %v8233_v11 = vld [vmem:[%s11267_s1 + $0x11a4] ss:$16 sps:$4 sm:$0xff]  }
 0x1f8   :  { %5259 = vmatprep.subr.bf16.mxu0 %v8141_v17  ;;  %5792 = vmatprep.subr.bf16.mxu1 %v8144_v14  ;;  %v8236_v17 = vld [vmem:[%s11267_s1 + $0x11ac] ss:$16 sps:$4 sm:$0xff]   ;;  %v8231_v14 = vld [vmem:[%s11267_s1 + $0x11a0] ss:$16 sps:$4 sm:$0xff]  }
 0x1fb   :  { %5260 = vmatpush1.bf16.msra.mxu0 %v8139_v19  ;;  %5793 = vmatpush1.bf16.msra.mxu1 %v8142_v20  ;;  %v8234_v19 = vld [vmem:[%s11267_s1 + $0x11a8] ss:$16 sps:$4 sm:$0xff]   ;;  %v8239_v20 = vld [vmem:[%s11267_s1 + $0x11c4] ss:$16 sps:$4 sm:$0xff]  }
 0x1fc   :  { %5261 = vmatprep.subr.bf16.mxu0 %v8147_v16  ;;  %5794 = vmatprep.subr.bf16.mxu1 %v8150_v22  ;;  %v8242_v16 = vld [vmem:[%s11267_s1 + $0x11cc] ss:$16 sps:$4 sm:$0xff]   ;;  %v8237_v22 = vld [vmem:[%s11267_s1 + $0x11c0] ss:$16 sps:$4 sm:$0xff]  }
 0x1ff   :  { %5262 = vmatpush1.bf16.msra.mxu0 %v8145_v23  ;;  %5795 = vmatpush1.bf16.msra.mxu1 %v8148_v18  ;;  %v8240_v23 = vld [vmem:[%s11267_s1 + $0x11c8] ss:$16 sps:$4 sm:$0xff]   ;;  %v8245_v18 = vld [vmem:[%s11267_s1 + $0x11e4] ss:$16 sps:$4 sm:$0xff]  }
 0x200   :  { %5272 = vmatprep.subr.bf16.mxu0 %v8155_v25  ;;  %5805 = vmatprep.subr.bf16.mxu1 %v8158_v26  ;;  %v8248_v25 = vld [vmem:[%s11267_s1 + $0x11ec] ss:$16 sps:$4 sm:$0xff]   ;;  %v8243_v26 = vld [vmem:[%s11267_s1 + $0x11e0] ss:$16 sps:$4 sm:$0xff]  }
 0x202   :  { %5264 = vmatmul.mubr.bf16.vlgmr.msra.gmra.mrb[0].mxu0 %v6380_v27  ;;  %5797 = vmatmul.mubr.bf16.vlgmr.msra.gmra.mrb[0].mxu1 %v6380_v27  ;;  %v8246_v27 = vld [vmem:[%s11267_s1 + $0x11e8] ss:$16 sps:$4 sm:$0xff]  }
 0x203   :  { %5273 = vmatpush1.bf16.msra.mxu0 %v8153_v28  ;;  %5806 = vmatpush1.bf16.msra.mxu1 %v8156_v29  ;;  %v8253_v28 = vld [vmem:[%s11267_s1 + $0x1204] ss:$16 sps:$4 sm:$0xff]   ;;  %v8256_v29 = vld [vmem:[%s11267_s1 + $0x120c] ss:$16 sps:$4 sm:$0xff]  }
 0x204   :  { %5274 = vmatprep.subr.bf16.mxu0 %v8161_v24  ;;  %5807 = vmatprep.subr.bf16.mxu1 %v8164_v30  ;;  %v6382_v24 = vcombine.low %v10268_v21, %v10268_v21  ;;  %v10469_v30 = vld [vmem:[%s11268_s0 + $0x48] sm:$0xff]  ;;  %v8259_v21 = vld [vmem:[%s11267_s1 + $0x1224] ss:$16 sps:$4 sm:$0xff]  }
 0x205   :  { %5304 = vmatprep.mubr.bf16.mxu0 %v6383_v31  ;;  %5837 = vmatprep.mubr.bf16.mxu1 %v6383_v31  ;;  %v8251_v31 = vld [vmem:[%s11267_s1 + $0x1200] ss:$16 sps:$4 sm:$0xff]  }
 0x207   :  { %5275 = vmatpush1.bf16.msra.mxu0 %v8159_v32  ;;  %5808 = vmatpush1.bf16.msra.mxu1 %v8162_v33  ;;  %v8254_v32 = vld [vmem:[%s11267_s1 + $0x1208] ss:$16 sps:$4 sm:$0xff]   ;;  %v8262_v33 = vld [vmem:[%s11267_s1 + $0x122c] ss:$16 sps:$4 sm:$0xff]  }
 0x208   :  { %5276 = vmatprep.subr.bf16.mxu0 %v8167_v34  ;;  %5809 = vmatprep.subr.bf16.mxu1 %v8170_v35  ;;  %v6385_v34 = vcombine.high %v10469_v30, %v10469_v30  ;;  %v8257_v35 = vld [vmem:[%s11267_s1 + $0x1220] ss:$16 sps:$4 sm:$0xff]  }
 0x20b   :  { %5277 = vmatpush1.bf16.msra.mxu0 %v8165_v36  ;;  %5810 = vmatpush1.bf16.msra.mxu1 %v8168_v37  ;;  %v8260_v36 = vld [vmem:[%s11267_s1 + $0x1228] ss:$16 sps:$4 sm:$0xff]   ;;  %v8265_v37 = vld [vmem:[%s11267_s1 + $0x1244] ss:$16 sps:$4 sm:$0xff]  }
 0x20c   :  { %5278 = vmatprep.subr.bf16.mxu0 %v8173_v38  ;;  %5811 = vmatprep.subr.bf16.mxu1 %v8176_v39  ;;  %v8268_v38 = vld [vmem:[%s11267_s1 + $0x124c] ss:$16 sps:$4 sm:$0xff]   ;;  %v8263_v39 = vld [vmem:[%s11267_s1 + $0x1240] ss:$16 sps:$4 sm:$0xff]  }
 0x20f   :  { %5279 = vmatpush1.bf16.msra.mxu0 %v8171_v40  ;;  %5812 = vmatpush1.bf16.msra.mxu1 %v8174_v41  ;;  %v8266_v40 = vld [vmem:[%s11267_s1 + $0x1248] ss:$16 sps:$4 sm:$0xff]   ;;  %v8271_v41 = vld [vmem:[%s11267_s1 + $0x1264] ss:$16 sps:$4 sm:$0xff]  }
 0x210   :  { %5280 = vmatprep.subr.bf16.mxu0 %v8179_v42  ;;  %5813 = vmatprep.subr.bf16.mxu1 %v8182_v43  ;;  %v8274_v42 = vld [vmem:[%s11267_s1 + $0x126c] ss:$16 sps:$4 sm:$0xff]   ;;  %v8269_v43 = vld [vmem:[%s11267_s1 + $0x1260] ss:$16 sps:$4 sm:$0xff]  }
 0x213   :  { %5281 = vmatpush1.bf16.msra.mxu0 %v8177_v44  ;;  %5814 = vmatpush1.bf16.msra.mxu1 %v8180_v45  ;;  %v8272_v44 = vld [vmem:[%s11267_s1 + $0x1268] ss:$16 sps:$4 sm:$0xff]   ;;  %v8277_v45 = vld [vmem:[%s11267_s1 + $0x1284] ss:$16 sps:$4 sm:$0xff]  }
 0x214   :  { %5282 = vmatprep.subr.bf16.mxu0 %v8185_v46  ;;  %5815 = vmatprep.subr.bf16.mxu1 %v8188_v47  ;;  %v8280_v46 = vld [vmem:[%s11267_s1 + $0x128c] ss:$16 sps:$4 sm:$0xff]   ;;  %v8275_v47 = vld [vmem:[%s11267_s1 + $0x1280] ss:$16 sps:$4 sm:$0xff]  }
 0x217   :  { %5283 = vmatpush1.bf16.msra.mxu0 %v8183_v48  ;;  %5816 = vmatpush1.bf16.msra.mxu1 %v8186_v49  ;;  %v8278_v48 = vld [vmem:[%s11267_s1 + $0x1288] ss:$16 sps:$4 sm:$0xff]   ;;  %v8283_v49 = vld [vmem:[%s11267_s1 + $0x12a4] ss:$16 sps:$4 sm:$0xff]  }
 0x218   :  { %5284 = vmatprep.subr.bf16.mxu0 %v8191_v50  ;;  %5817 = vmatprep.subr.bf16.mxu1 %v8194_v51  ;;  %v8286_v50 = vld [vmem:[%s11267_s1 + $0x12ac] ss:$16 sps:$4 sm:$0xff]   ;;  %v8281_v51 = vld [vmem:[%s11267_s1 + $0x12a0] ss:$16 sps:$4 sm:$0xff]  }
 0x21b   :  { %5285 = vmatpush1.bf16.msra.mxu0 %v8189_v52  ;;  %5818 = vmatpush1.bf16.msra.mxu1 %v8192_v53  ;;  %v8284_v52 = vld [vmem:[%s11267_s1 + $0x12a8] ss:$16 sps:$4 sm:$0xff]   ;;  %v8289_v53 = vld [vmem:[%s11267_s1 + $0x12c4] ss:$16 sps:$4 sm:$0xff]  }
 0x21c   :  { %5286 = vmatprep.subr.bf16.mxu0 %v8197_v54  ;;  %5819 = vmatprep.subr.bf16.mxu1 %v8200_v55  ;;  %v8292_v54 = vld [vmem:[%s11267_s1 + $0x12cc] ss:$16 sps:$4 sm:$0xff]   ;;  %v8287_v55 = vld [vmem:[%s11267_s1 + $0x12c0] ss:$16 sps:$4 sm:$0xff]  }
 0x21f   :  { %5287 = vmatpush1.bf16.msra.mxu0 %v8195_v56  ;;  %5820 = vmatpush1.bf16.msra.mxu1 %v8198_v57  ;;  %v8290_v56 = vld [vmem:[%s11267_s1 + $0x12c8] ss:$16 sps:$4 sm:$0xff]   ;;  %v8295_v57 = vld [vmem:[%s11267_s1 + $0x12e4] ss:$16 sps:$4 sm:$0xff]  }
 0x220   :  { %5288 = vmatprep.subr.bf16.mxu0 %v8203_v58  ;;  %5821 = vmatprep.subr.bf16.mxu1 %v8206_v59  ;;  %v8298_v58 = vld [vmem:[%s11267_s1 + $0x12ec] ss:$16 sps:$4 sm:$0xff]   ;;  %v8293_v59 = vld [vmem:[%s11267_s1 + $0x12e0] ss:$16 sps:$4 sm:$0xff]  }
 0x223   :  { %5289 = vmatpush1.bf16.msra.mxu0 %v8201_v60  ;;  %5822 = vmatpush1.bf16.msra.mxu1 %v8204_v61  ;;  %v8296_v60 = vld [vmem:[%s11267_s1 + $0x12e8] ss:$16 sps:$4 sm:$0xff]   ;;  %v8301_v61 = vld [vmem:[%s11267_s1 + $0x1304] ss:$16 sps:$4 sm:$0xff]  }
 0x224   :  { %5290 = vmatprep.subr.bf16.mxu0 %v8209_v62  ;;  %5823 = vmatprep.subr.bf16.mxu1 %v8212_v63  ;;  %v8304_v62 = vld [vmem:[%s11267_s1 + $0x130c] ss:$16 sps:$4 sm:$0xff]   ;;  %v8299_v63 = vld [vmem:[%s11267_s1 + $0x1300] ss:$16 sps:$4 sm:$0xff]  }
 0x227   :  { %5291 = vmatpush1.bf16.msra.mxu0 %v8207_v0  ;;  %5824 = vmatpush1.bf16.msra.mxu1 %v8210_v1  ;;  %v8302_v0 = vld [vmem:[%s11267_s1 + $0x1308] ss:$16 sps:$4 sm:$0xff]   ;;  %v8307_v1 = vld [vmem:[%s11267_s1 + $0x1324] ss:$16 sps:$4 sm:$0xff]  }
 0x228   :  { %5292 = vmatprep.subr.bf16.mxu0 %v8215_v2  ;;  %5825 = vmatprep.subr.bf16.mxu1 %v8218_v3  ;;  %v8310_v2 = vld [vmem:[%s11267_s1 + $0x132c] ss:$16 sps:$4 sm:$0xff]   ;;  %v8305_v3 = vld [vmem:[%s11267_s1 + $0x1320] ss:$16 sps:$4 sm:$0xff]  }
 0x22b   :  { %5293 = vmatpush1.bf16.msra.mxu0 %v8213_v4  ;;  %5826 = vmatpush1.bf16.msra.mxu1 %v8216_v5  ;;  %v8308_v4 = vld [vmem:[%s11267_s1 + $0x1328] ss:$16 sps:$4 sm:$0xff]   ;;  %v8313_v5 = vld [vmem:[%s11267_s1 + $0x1344] ss:$16 sps:$4 sm:$0xff]  }
 0x22c   :  { %5294 = vmatprep.subr.bf16.mxu0 %v8221_v6  ;;  %5827 = vmatprep.subr.bf16.mxu1 %v8224_v7  ;;  %v8316_v6 = vld [vmem:[%s11267_s1 + $0x134c] ss:$16 sps:$4 sm:$0xff]   ;;  %v8311_v7 = vld [vmem:[%s11267_s1 + $0x1340] ss:$16 sps:$4 sm:$0xff]  }
 0x22f   :  { %5295 = vmatpush1.bf16.msra.mxu0 %v8219_v8  ;;  %5828 = vmatpush1.bf16.msra.mxu1 %v8222_v9  ;;  %v8314_v8 = vld [vmem:[%s11267_s1 + $0x1348] ss:$16 sps:$4 sm:$0xff]   ;;  %v8319_v9 = vld [vmem:[%s11267_s1 + $0x1364] ss:$16 sps:$4 sm:$0xff]  }
 0x230   :  { %5296 = vmatprep.subr.bf16.mxu0 %v8227_v10  ;;  %5829 = vmatprep.subr.bf16.mxu1 %v8230_v12  ;;  %v8322_v10 = vld [vmem:[%s11267_s1 + $0x136c] ss:$16 sps:$4 sm:$0xff]   ;;  %v8317_v12 = vld [vmem:[%s11267_s1 + $0x1360] ss:$16 sps:$4 sm:$0xff]  }
 0x233   :  { %5297 = vmatpush1.bf16.msra.mxu0 %v8225_v13  ;;  %5830 = vmatpush1.bf16.msra.mxu1 %v8228_v15  ;;  %v8320_v13 = vld [vmem:[%s11267_s1 + $0x1368] ss:$16 sps:$4 sm:$0xff]   ;;  %v8325_v15 = vld [vmem:[%s11267_s1 + $0x1384] ss:$16 sps:$4 sm:$0xff]  }
 0x234   :  { %5298 = vmatprep.subr.bf16.mxu0 %v8233_v11  ;;  %5831 = vmatprep.subr.bf16.mxu1 %v8236_v17  ;;  %v8328_v11 = vld [vmem:[%s11267_s1 + $0x138c] ss:$16 sps:$4 sm:$0xff]   ;;  %v8323_v17 = vld [vmem:[%s11267_s1 + $0x1380] ss:$16 sps:$4 sm:$0xff]  }
 0x237   :  { %5299 = vmatpush1.bf16.msra.mxu0 %v8231_v14  ;;  %5832 = vmatpush1.bf16.msra.mxu1 %v8234_v19  ;;  %v8326_v14 = vld [vmem:[%s11267_s1 + $0x1388] ss:$16 sps:$4 sm:$0xff]   ;;  %v8331_v19 = vld [vmem:[%s11267_s1 + $0x13a4] ss:$16 sps:$4 sm:$0xff]  }
 0x238   :  { %5300 = vmatprep.subr.bf16.mxu0 %v8239_v20  ;;  %5833 = vmatprep.subr.bf16.mxu1 %v8242_v16  ;;  %v8334_v20 = vld [vmem:[%s11267_s1 + $0x13ac] ss:$16 sps:$4 sm:$0xff]   ;;  %v8329_v16 = vld [vmem:[%s11267_s1 + $0x13a0] ss:$16 sps:$4 sm:$0xff]  }
 0x23b   :  { %5301 = vmatpush1.bf16.msra.mxu0 %v8237_v22  ;;  %5834 = vmatpush1.bf16.msra.mxu1 %v8240_v23  ;;  %v8332_v22 = vld [vmem:[%s11267_s1 + $0x13a8] ss:$16 sps:$4 sm:$0xff]   ;;  %v8337_v23 = vld [vmem:[%s11267_s1 + $0x13c4] ss:$16 sps:$4 sm:$0xff]  }
 0x23c   :  { %5302 = vmatprep.subr.bf16.mxu0 %v8245_v18  ;;  %5835 = vmatprep.subr.bf16.mxu1 %v8248_v25  ;;  %v8340_v18 = vld [vmem:[%s11267_s1 + $0x13cc] ss:$16 sps:$4 sm:$0xff]   ;;  %v8335_v25 = vld [vmem:[%s11267_s1 + $0x13c0] ss:$16 sps:$4 sm:$0xff]  }
 0x23f   :  { %5303 = vmatpush1.bf16.msra.mxu0 %v8243_v26  ;;  %5836 = vmatpush1.bf16.msra.mxu1 %v8246_v27  ;;  %v8338_v26 = vld [vmem:[%s11267_s1 + $0x13c8] ss:$16 sps:$4 sm:$0xff]   ;;  %v8343_v27 = vld [vmem:[%s11267_s1 + $0x13e4] ss:$16 sps:$4 sm:$0xff]  }
 0x240   :  { %5313 = vmatprep.subr.bf16.mxu0 %v8253_v28  ;;  %5846 = vmatprep.subr.bf16.mxu1 %v8256_v29  ;;  %v8346_v28 = vld [vmem:[%s11267_s1 + $0x13ec] ss:$16 sps:$4 sm:$0xff]   ;;  %v8341_v29 = vld [vmem:[%s11267_s1 + $0x13e0] ss:$16 sps:$4 sm:$0xff]  }
 0x242   :  { %5305 = vmatmul.mubr.bf16.vlgmr.msra.gmra.mrb[0].mxu0 %v6382_v24  ;;  %5838 = vmatmul.mubr.bf16.vlgmr.msra.gmra.mrb[0].mxu1 %v6382_v24  ;;  %v8344_v24 = vld [vmem:[%s11267_s1 + $0x13e8] ss:$16 sps:$4 sm:$0xff]  }
 0x243   :  { %5314 = vmatpush1.bf16.msra.mxu0 %v8251_v31  ;;  %5847 = vmatpush1.bf16.msra.mxu1 %v8254_v32  ;;  %v8351_v31 = vld [vmem:[%s11267_s1 + $0x1404] ss:$16 sps:$4 sm:$0xff]   ;;  %v8354_v32 = vld [vmem:[%s11267_s1 + $0x140c] ss:$16 sps:$4 sm:$0xff]  }
 0x244   :  { %5315 = vmatprep.subr.bf16.mxu0 %v8259_v21  ;;  %5848 = vmatprep.subr.bf16.mxu1 %v8262_v33  ;;  %v6384_v21 = vcombine.low %v10469_v30, %v10469_v30  ;;  %v10670_v33 = vld [vmem:[%s11268_s0 + $0x50] sm:$0xff] }
 0x245   :  { %5345 = vmatprep.mubr.bf16.mxu0 %v6385_v34  ;;  %5878 = vmatprep.mubr.bf16.mxu1 %v6385_v34  ;;  %v8349_v34 = vld [vmem:[%s11267_s1 + $0x1400] ss:$16 sps:$4 sm:$0xff]   ;;  %v8357_v30 = vld [vmem:[%s11267_s1 + $0x1424] ss:$16 sps:$4 sm:$0xff]  }
 0x247   :  { %5316 = vmatpush1.bf16.msra.mxu0 %v8257_v35  ;;  %5849 = vmatpush1.bf16.msra.mxu1 %v8260_v36  ;;  %v8352_v35 = vld [vmem:[%s11267_s1 + $0x1408] ss:$16 sps:$4 sm:$0xff]   ;;  %v8360_v36 = vld [vmem:[%s11267_s1 + $0x142c] ss:$16 sps:$4 sm:$0xff]  }
 0x248   :  { %5317 = vmatprep.subr.bf16.mxu0 %v8265_v37  ;;  %5850 = vmatprep.subr.bf16.mxu1 %v8268_v38  ;;  %v6387_v37 = vcombine.high %v10670_v33, %v10670_v33  ;;  %v8355_v38 = vld [vmem:[%s11267_s1 + $0x1420] ss:$16 sps:$4 sm:$0xff]  }
 0x24b   :  { %5318 = vmatpush1.bf16.msra.mxu0 %v8263_v39  ;;  %5851 = vmatpush1.bf16.msra.mxu1 %v8266_v40  ;;  %v8358_v39 = vld [vmem:[%s11267_s1 + $0x1428] ss:$16 sps:$4 sm:$0xff]   ;;  %v8363_v40 = vld [vmem:[%s11267_s1 + $0x1444] ss:$16 sps:$4 sm:$0xff]  }
 0x24c   :  { %5319 = vmatprep.subr.bf16.mxu0 %v8271_v41  ;;  %5852 = vmatprep.subr.bf16.mxu1 %v8274_v42  ;;  %v8366_v41 = vld [vmem:[%s11267_s1 + $0x144c] ss:$16 sps:$4 sm:$0xff]   ;;  %v8361_v42 = vld [vmem:[%s11267_s1 + $0x1440] ss:$16 sps:$4 sm:$0xff]  }
 0x24f   :  { %5320 = vmatpush1.bf16.msra.mxu0 %v8269_v43  ;;  %5853 = vmatpush1.bf16.msra.mxu1 %v8272_v44  ;;  %v8364_v43 = vld [vmem:[%s11267_s1 + $0x1448] ss:$16 sps:$4 sm:$0xff]   ;;  %v8369_v44 = vld [vmem:[%s11267_s1 + $0x1464] ss:$16 sps:$4 sm:$0xff]  }
 0x250   :  { %5321 = vmatprep.subr.bf16.mxu0 %v8277_v45  ;;  %5854 = vmatprep.subr.bf16.mxu1 %v8280_v46  ;;  %v8372_v45 = vld [vmem:[%s11267_s1 + $0x146c] ss:$16 sps:$4 sm:$0xff]   ;;  %v8367_v46 = vld [vmem:[%s11267_s1 + $0x1460] ss:$16 sps:$4 sm:$0xff]  }
 0x253   :  { %5322 = vmatpush1.bf16.msra.mxu0 %v8275_v47  ;;  %5855 = vmatpush1.bf16.msra.mxu1 %v8278_v48  ;;  %v8370_v47 = vld [vmem:[%s11267_s1 + $0x1468] ss:$16 sps:$4 sm:$0xff]   ;;  %v8375_v48 = vld [vmem:[%s11267_s1 + $0x1484] ss:$16 sps:$4 sm:$0xff]  }
 0x254   :  { %5323 = vmatprep.subr.bf16.mxu0 %v8283_v49  ;;  %5856 = vmatprep.subr.bf16.mxu1 %v8286_v50  ;;  %v8378_v49 = vld [vmem:[%s11267_s1 + $0x148c] ss:$16 sps:$4 sm:$0xff]   ;;  %v8373_v50 = vld [vmem:[%s11267_s1 + $0x1480] ss:$16 sps:$4 sm:$0xff]  }
 0x257   :  { %5324 = vmatpush1.bf16.msra.mxu0 %v8281_v51  ;;  %5857 = vmatpush1.bf16.msra.mxu1 %v8284_v52  ;;  %v8376_v51 = vld [vmem:[%s11267_s1 + $0x1488] ss:$16 sps:$4 sm:$0xff]   ;;  %v8381_v52 = vld [vmem:[%s11267_s1 + $0x14a4] ss:$16 sps:$4 sm:$0xff]  }
 0x258   :  { %5325 = vmatprep.subr.bf16.mxu0 %v8289_v53  ;;  %5858 = vmatprep.subr.bf16.mxu1 %v8292_v54  ;;  %v8384_v53 = vld [vmem:[%s11267_s1 + $0x14ac] ss:$16 sps:$4 sm:$0xff]   ;;  %v8379_v54 = vld [vmem:[%s11267_s1 + $0x14a0] ss:$16 sps:$4 sm:$0xff]  }
 0x25b   :  { %5326 = vmatpush1.bf16.msra.mxu0 %v8287_v55  ;;  %5859 = vmatpush1.bf16.msra.mxu1 %v8290_v56  ;;  %v8382_v55 = vld [vmem:[%s11267_s1 + $0x14a8] ss:$16 sps:$4 sm:$0xff]   ;;  %v8387_v56 = vld [vmem:[%s11267_s1 + $0x14c4] ss:$16 sps:$4 sm:$0xff]  }
 0x25c   :  { %5327 = vmatprep.subr.bf16.mxu0 %v8295_v57  ;;  %5860 = vmatprep.subr.bf16.mxu1 %v8298_v58  ;;  %v8390_v57 = vld [vmem:[%s11267_s1 + $0x14cc] ss:$16 sps:$4 sm:$0xff]   ;;  %v8385_v58 = vld [vmem:[%s11267_s1 + $0x14c0] ss:$16 sps:$4 sm:$0xff]  }
 0x25f   :  { %5328 = vmatpush1.bf16.msra.mxu0 %v8293_v59  ;;  %5861 = vmatpush1.bf16.msra.mxu1 %v8296_v60  ;;  %v8388_v59 = vld [vmem:[%s11267_s1 + $0x14c8] ss:$16 sps:$4 sm:$0xff]   ;;  %v8393_v60 = vld [vmem:[%s11267_s1 + $0x14e4] ss:$16 sps:$4 sm:$0xff]  }
 0x260   :  { %5329 = vmatprep.subr.bf16.mxu0 %v8301_v61  ;;  %5862 = vmatprep.subr.bf16.mxu1 %v8304_v62  ;;  %v8396_v61 = vld [vmem:[%s11267_s1 + $0x14ec] ss:$16 sps:$4 sm:$0xff]   ;;  %v8391_v62 = vld [vmem:[%s11267_s1 + $0x14e0] ss:$16 sps:$4 sm:$0xff]  }
 0x263   :  { %5330 = vmatpush1.bf16.msra.mxu0 %v8299_v63  ;;  %5863 = vmatpush1.bf16.msra.mxu1 %v8302_v0  ;;  %v8394_v63 = vld [vmem:[%s11267_s1 + $0x14e8] ss:$16 sps:$4 sm:$0xff]   ;;  %v8399_v0 = vld [vmem:[%s11267_s1 + $0x1504] ss:$16 sps:$4 sm:$0xff]  }
 0x264   :  { %5331 = vmatprep.subr.bf16.mxu0 %v8307_v1  ;;  %5864 = vmatprep.subr.bf16.mxu1 %v8310_v2  ;;  %v8402_v1 = vld [vmem:[%s11267_s1 + $0x150c] ss:$16 sps:$4 sm:$0xff]   ;;  %v8397_v2 = vld [vmem:[%s11267_s1 + $0x1500] ss:$16 sps:$4 sm:$0xff]  }
 0x267   :  { %5332 = vmatpush1.bf16.msra.mxu0 %v8305_v3  ;;  %5865 = vmatpush1.bf16.msra.mxu1 %v8308_v4  ;;  %v8400_v3 = vld [vmem:[%s11267_s1 + $0x1508] ss:$16 sps:$4 sm:$0xff]   ;;  %v8405_v4 = vld [vmem:[%s11267_s1 + $0x1524] ss:$16 sps:$4 sm:$0xff]  }
 0x268   :  { %5333 = vmatprep.subr.bf16.mxu0 %v8313_v5  ;;  %5866 = vmatprep.subr.bf16.mxu1 %v8316_v6  ;;  %v8408_v5 = vld [vmem:[%s11267_s1 + $0x152c] ss:$16 sps:$4 sm:$0xff]   ;;  %v8403_v6 = vld [vmem:[%s11267_s1 + $0x1520] ss:$16 sps:$4 sm:$0xff]  }
 0x26b   :  { %5334 = vmatpush1.bf16.msra.mxu0 %v8311_v7  ;;  %5867 = vmatpush1.bf16.msra.mxu1 %v8314_v8  ;;  %v8406_v7 = vld [vmem:[%s11267_s1 + $0x1528] ss:$16 sps:$4 sm:$0xff]   ;;  %v8411_v8 = vld [vmem:[%s11267_s1 + $0x1544] ss:$16 sps:$4 sm:$0xff]  }
 0x26c   :  { %5335 = vmatprep.subr.bf16.mxu0 %v8319_v9  ;;  %5868 = vmatprep.subr.bf16.mxu1 %v8322_v10  ;;  %v8414_v9 = vld [vmem:[%s11267_s1 + $0x154c] ss:$16 sps:$4 sm:$0xff]   ;;  %v8409_v10 = vld [vmem:[%s11267_s1 + $0x1540] ss:$16 sps:$4 sm:$0xff]  }
 0x26f   :  { %5336 = vmatpush1.bf16.msra.mxu0 %v8317_v12  ;;  %5869 = vmatpush1.bf16.msra.mxu1 %v8320_v13  ;;  %v8412_v12 = vld [vmem:[%s11267_s1 + $0x1548] ss:$16 sps:$4 sm:$0xff]   ;;  %v8417_v13 = vld [vmem:[%s11267_s1 + $0x1564] ss:$16 sps:$4 sm:$0xff]  }
 0x270   :  { %5337 = vmatprep.subr.bf16.mxu0 %v8325_v15  ;;  %5870 = vmatprep.subr.bf16.mxu1 %v8328_v11  ;;  %v8420_v15 = vld [vmem:[%s11267_s1 + $0x156c] ss:$16 sps:$4 sm:$0xff]   ;;  %v8415_v11 = vld [vmem:[%s11267_s1 + $0x1560] ss:$16 sps:$4 sm:$0xff]  }
 0x273   :  { %5338 = vmatpush1.bf16.msra.mxu0 %v8323_v17  ;;  %5871 = vmatpush1.bf16.msra.mxu1 %v8326_v14  ;;  %v8418_v17 = vld [vmem:[%s11267_s1 + $0x1568] ss:$16 sps:$4 sm:$0xff]   ;;  %v8423_v14 = vld [vmem:[%s11267_s1 + $0x1584] ss:$16 sps:$4 sm:$0xff]  }
 0x274   :  { %5339 = vmatprep.subr.bf16.mxu0 %v8331_v19  ;;  %5872 = vmatprep.subr.bf16.mxu1 %v8334_v20  ;;  %v8426_v19 = vld [vmem:[%s11267_s1 + $0x158c] ss:$16 sps:$4 sm:$0xff]   ;;  %v8421_v20 = vld [vmem:[%s11267_s1 + $0x1580] ss:$16 sps:$4 sm:$0xff]  }
 0x277   :  { %5340 = vmatpush1.bf16.msra.mxu0 %v8329_v16  ;;  %5873 = vmatpush1.bf16.msra.mxu1 %v8332_v22  ;;  %v8424_v16 = vld [vmem:[%s11267_s1 + $0x1588] ss:$16 sps:$4 sm:$0xff]   ;;  %v8429_v22 = vld [vmem:[%s11267_s1 + $0x15a4] ss:$16 sps:$4 sm:$0xff]  }
 0x278   :  { %5341 = vmatprep.subr.bf16.mxu0 %v8337_v23  ;;  %5874 = vmatprep.subr.bf16.mxu1 %v8340_v18  ;;  %v8432_v23 = vld [vmem:[%s11267_s1 + $0x15ac] ss:$16 sps:$4 sm:$0xff]   ;;  %v8427_v18 = vld [vmem:[%s11267_s1 + $0x15a0] ss:$16 sps:$4 sm:$0xff]  }
 0x27b   :  { %5342 = vmatpush1.bf16.msra.mxu0 %v8335_v25  ;;  %5875 = vmatpush1.bf16.msra.mxu1 %v8338_v26  ;;  %v8430_v25 = vld [vmem:[%s11267_s1 + $0x15a8] ss:$16 sps:$4 sm:$0xff]   ;;  %v8435_v26 = vld [vmem:[%s11267_s1 + $0x15c4] ss:$16 sps:$4 sm:$0xff]  }
 0x27c   :  { %5343 = vmatprep.subr.bf16.mxu0 %v8343_v27  ;;  %5876 = vmatprep.subr.bf16.mxu1 %v8346_v28  ;;  %v8438_v27 = vld [vmem:[%s11267_s1 + $0x15cc] ss:$16 sps:$4 sm:$0xff]   ;;  %v8433_v28 = vld [vmem:[%s11267_s1 + $0x15c0] ss:$16 sps:$4 sm:$0xff]  }
 0x27f   :  { %5344 = vmatpush1.bf16.msra.mxu0 %v8341_v29  ;;  %5877 = vmatpush1.bf16.msra.mxu1 %v8344_v24  ;;  %v8436_v29 = vld [vmem:[%s11267_s1 + $0x15c8] ss:$16 sps:$4 sm:$0xff]   ;;  %v8441_v24 = vld [vmem:[%s11267_s1 + $0x15e4] ss:$16 sps:$4 sm:$0xff]  }
 0x280   :  { %5354 = vmatprep.subr.bf16.mxu0 %v8351_v31  ;;  %5887 = vmatprep.subr.bf16.mxu1 %v8354_v32  ;;  %v8444_v31 = vld [vmem:[%s11267_s1 + $0x15ec] ss:$16 sps:$4 sm:$0xff]   ;;  %v8439_v32 = vld [vmem:[%s11267_s1 + $0x15e0] ss:$16 sps:$4 sm:$0xff]  }
 0x282   :  { %5346 = vmatmul.mubr.bf16.vlgmr.msra.gmra.mrb[0].mxu0 %v6384_v21  ;;  %5879 = vmatmul.mubr.bf16.vlgmr.msra.gmra.mrb[0].mxu1 %v6384_v21  ;;  %v8442_v21 = vld [vmem:[%s11267_s1 + $0x15e8] ss:$16 sps:$4 sm:$0xff]  }
 0x283   :  { %5355 = vmatpush1.bf16.msra.mxu0 %v8349_v34  ;;  %5888 = vmatpush1.bf16.msra.mxu1 %v8352_v35  ;;  %v8449_v34 = vld [vmem:[%s11267_s1 + $0x1604] ss:$16 sps:$4 sm:$0xff]   ;;  %v8452_v35 = vld [vmem:[%s11267_s1 + $0x160c] ss:$16 sps:$4 sm:$0xff]  }
 0x284   :  { %5356 = vmatprep.subr.bf16.mxu0 %v8357_v30  ;;  %5889 = vmatprep.subr.bf16.mxu1 %v8360_v36  ;;  %v10869_v30 = vld [vmem:[%s11268_s0 + $0x58] sm:$0xff]  ;;  %v8447_v36 = vld [vmem:[%s11267_s1 + $0x1600] ss:$16 sps:$4 sm:$0xff]  }
 0x285   :  { %5386 = vmatprep.mubr.bf16.mxu0 %v6387_v37  ;;  %5919 = vmatprep.mubr.bf16.mxu1 %v6387_v37  ;;  %v8450_v37 = vld [vmem:[%s11267_s1 + $0x1608] ss:$16 sps:$4 sm:$0xff]  }
 0x287   :  { %5357 = vmatpush1.bf16.msra.mxu0 %v8355_v38  ;;  %5890 = vmatpush1.bf16.msra.mxu1 %v8358_v39  ;;  %v6386_v38 = vcombine.low %v10670_v33, %v10670_v33  ;;  %v8455_v39 = vld [vmem:[%s11267_s1 + $0x1624] ss:$16 sps:$4 sm:$0xff]   ;;  %v8453_v33 = vld [vmem:[%s11267_s1 + $0x1620] ss:$16 sps:$4 sm:$0xff]  }
 0x288   :  { %5358 = vmatprep.subr.bf16.mxu0 %v8363_v40  ;;  %5891 = vmatprep.subr.bf16.mxu1 %v8366_v41  ;;  %v8458_v40 = vld [vmem:[%s11267_s1 + $0x162c] ss:$16 sps:$4 sm:$0xff]   ;;  %v6389_v41 = vcombine.high %v10869_v30, %v10869_v30 }
 0x28b   :  { %5359 = vmatpush1.bf16.msra.mxu0 %v8361_v42  ;;  %5892 = vmatpush1.bf16.msra.mxu1 %v8364_v43  ;;  %v8456_v42 = vld [vmem:[%s11267_s1 + $0x1628] ss:$16 sps:$4 sm:$0xff]   ;;  %v8461_v43 = vld [vmem:[%s11267_s1 + $0x1644] ss:$16 sps:$4 sm:$0xff]  }
 0x28c   :  { %5360 = vmatprep.subr.bf16.mxu0 %v8369_v44  ;;  %5893 = vmatprep.subr.bf16.mxu1 %v8372_v45  ;;  %v8464_v44 = vld [vmem:[%s11267_s1 + $0x164c] ss:$16 sps:$4 sm:$0xff]   ;;  %v8459_v45 = vld [vmem:[%s11267_s1 + $0x1640] ss:$16 sps:$4 sm:$0xff]  }
 0x28f   :  { %5361 = vmatpush1.bf16.msra.mxu0 %v8367_v46  ;;  %5894 = vmatpush1.bf16.msra.mxu1 %v8370_v47  ;;  %v8462_v46 = vld [vmem:[%s11267_s1 + $0x1648] ss:$16 sps:$4 sm:$0xff]   ;;  %v8467_v47 = vld [vmem:[%s11267_s1 + $0x1664] ss:$16 sps:$4 sm:$0xff]  }
 0x290   :  { %5362 = vmatprep.subr.bf16.mxu0 %v8375_v48  ;;  %5895 = vmatprep.subr.bf16.mxu1 %v8378_v49  ;;  %v8470_v48 = vld [vmem:[%s11267_s1 + $0x166c] ss:$16 sps:$4 sm:$0xff]   ;;  %v8465_v49 = vld [vmem:[%s11267_s1 + $0x1660] ss:$16 sps:$4 sm:$0xff]  }
 0x293   :  { %5363 = vmatpush1.bf16.msra.mxu0 %v8373_v50  ;;  %5896 = vmatpush1.bf16.msra.mxu1 %v8376_v51  ;;  %v8468_v50 = vld [vmem:[%s11267_s1 + $0x1668] ss:$16 sps:$4 sm:$0xff]   ;;  %v8473_v51 = vld [vmem:[%s11267_s1 + $0x1684] ss:$16 sps:$4 sm:$0xff]  }
 0x294   :  { %5364 = vmatprep.subr.bf16.mxu0 %v8381_v52  ;;  %5897 = vmatprep.subr.bf16.mxu1 %v8384_v53  ;;  %v8476_v52 = vld [vmem:[%s11267_s1 + $0x168c] ss:$16 sps:$4 sm:$0xff]   ;;  %v8471_v53 = vld [vmem:[%s11267_s1 + $0x1680] ss:$16 sps:$4 sm:$0xff]  }
 0x297   :  { %5365 = vmatpush1.bf16.msra.mxu0 %v8379_v54  ;;  %5898 = vmatpush1.bf16.msra.mxu1 %v8382_v55  ;;  %v8474_v54 = vld [vmem:[%s11267_s1 + $0x1688] ss:$16 sps:$4 sm:$0xff]   ;;  %v8479_v55 = vld [vmem:[%s11267_s1 + $0x16a4] ss:$16 sps:$4 sm:$0xff]  }
 0x298   :  { %5366 = vmatprep.subr.bf16.mxu0 %v8387_v56  ;;  %5899 = vmatprep.subr.bf16.mxu1 %v8390_v57  ;;  %v8482_v56 = vld [vmem:[%s11267_s1 + $0x16ac] ss:$16 sps:$4 sm:$0xff]   ;;  %v8477_v57 = vld [vmem:[%s11267_s1 + $0x16a0] ss:$16 sps:$4 sm:$0xff]  }
 0x29b   :  { %5367 = vmatpush1.bf16.msra.mxu0 %v8385_v58  ;;  %5900 = vmatpush1.bf16.msra.mxu1 %v8388_v59  ;;  %v8480_v58 = vld [vmem:[%s11267_s1 + $0x16a8] ss:$16 sps:$4 sm:$0xff]   ;;  %v8485_v59 = vld [vmem:[%s11267_s1 + $0x16c4] ss:$16 sps:$4 sm:$0xff]  }
 0x29c   :  { %5368 = vmatprep.subr.bf16.mxu0 %v8393_v60  ;;  %5901 = vmatprep.subr.bf16.mxu1 %v8396_v61  ;;  %v8488_v60 = vld [vmem:[%s11267_s1 + $0x16cc] ss:$16 sps:$4 sm:$0xff]   ;;  %v8483_v61 = vld [vmem:[%s11267_s1 + $0x16c0] ss:$16 sps:$4 sm:$0xff]  }
 0x29f   :  { %5369 = vmatpush1.bf16.msra.mxu0 %v8391_v62  ;;  %5902 = vmatpush1.bf16.msra.mxu1 %v8394_v63  ;;  %v8486_v62 = vld [vmem:[%s11267_s1 + $0x16c8] ss:$16 sps:$4 sm:$0xff]   ;;  %v8491_v63 = vld [vmem:[%s11267_s1 + $0x16e4] ss:$16 sps:$4 sm:$0xff]  }
 0x2a0   :  { %5370 = vmatprep.subr.bf16.mxu0 %v8399_v0  ;;  %5903 = vmatprep.subr.bf16.mxu1 %v8402_v1  ;;  %v8494_v0 = vld [vmem:[%s11267_s1 + $0x16ec] ss:$16 sps:$4 sm:$0xff]   ;;  %v8489_v1 = vld [vmem:[%s11267_s1 + $0x16e0] ss:$16 sps:$4 sm:$0xff]  }
 0x2a3   :  { %5371 = vmatpush1.bf16.msra.mxu0 %v8397_v2  ;;  %5904 = vmatpush1.bf16.msra.mxu1 %v8400_v3  ;;  %v8492_v2 = vld [vmem:[%s11267_s1 + $0x16e8] ss:$16 sps:$4 sm:$0xff]   ;;  %v8497_v3 = vld [vmem:[%s11267_s1 + $0x1704] ss:$16 sps:$4 sm:$0xff]  }
 0x2a4   :  { %5372 = vmatprep.subr.bf16.mxu0 %v8405_v4  ;;  %5905 = vmatprep.subr.bf16.mxu1 %v8408_v5  ;;  %v8500_v4 = vld [vmem:[%s11267_s1 + $0x170c] ss:$16 sps:$4 sm:$0xff]   ;;  %v8495_v5 = vld [vmem:[%s11267_s1 + $0x1700] ss:$16 sps:$4 sm:$0xff]  }
 0x2a7   :  { %5373 = vmatpush1.bf16.msra.mxu0 %v8403_v6  ;;  %5906 = vmatpush1.bf16.msra.mxu1 %v8406_v7  ;;  %v8498_v6 = vld [vmem:[%s11267_s1 + $0x1708] ss:$16 sps:$4 sm:$0xff]   ;;  %v8503_v7 = vld [vmem:[%s11267_s1 + $0x1724] ss:$16 sps:$4 sm:$0xff]  }
 0x2a8   :  { %5374 = vmatprep.subr.bf16.mxu0 %v8411_v8  ;;  %5907 = vmatprep.subr.bf16.mxu1 %v8414_v9  ;;  %v8506_v8 = vld [vmem:[%s11267_s1 + $0x172c] ss:$16 sps:$4 sm:$0xff]   ;;  %v8501_v9 = vld [vmem:[%s11267_s1 + $0x1720] ss:$16 sps:$4 sm:$0xff]  }
 0x2ab   :  { %5375 = vmatpush1.bf16.msra.mxu0 %v8409_v10  ;;  %5908 = vmatpush1.bf16.msra.mxu1 %v8412_v12  ;;  %v8504_v10 = vld [vmem:[%s11267_s1 + $0x1728] ss:$16 sps:$4 sm:$0xff]   ;;  %v8509_v12 = vld [vmem:[%s11267_s1 + $0x1744] ss:$16 sps:$4 sm:$0xff]  }
 0x2ac   :  { %5376 = vmatprep.subr.bf16.mxu0 %v8417_v13  ;;  %5909 = vmatprep.subr.bf16.mxu1 %v8420_v15  ;;  %v8512_v13 = vld [vmem:[%s11267_s1 + $0x174c] ss:$16 sps:$4 sm:$0xff]   ;;  %v8507_v15 = vld [vmem:[%s11267_s1 + $0x1740] ss:$16 sps:$4 sm:$0xff]  }
 0x2af   :  { %5377 = vmatpush1.bf16.msra.mxu0 %v8415_v11  ;;  %5910 = vmatpush1.bf16.msra.mxu1 %v8418_v17  ;;  %v8510_v11 = vld [vmem:[%s11267_s1 + $0x1748] ss:$16 sps:$4 sm:$0xff]   ;;  %v8515_v17 = vld [vmem:[%s11267_s1 + $0x1764] ss:$16 sps:$4 sm:$0xff]  }
 0x2b0   :  { %5378 = vmatprep.subr.bf16.mxu0 %v8423_v14  ;;  %5911 = vmatprep.subr.bf16.mxu1 %v8426_v19  ;;  %v8518_v14 = vld [vmem:[%s11267_s1 + $0x176c] ss:$16 sps:$4 sm:$0xff]   ;;  %v8513_v19 = vld [vmem:[%s11267_s1 + $0x1760] ss:$16 sps:$4 sm:$0xff]  }
 0x2b3   :  { %5379 = vmatpush1.bf16.msra.mxu0 %v8421_v20  ;;  %5912 = vmatpush1.bf16.msra.mxu1 %v8424_v16  ;;  %v8516_v20 = vld [vmem:[%s11267_s1 + $0x1768] ss:$16 sps:$4 sm:$0xff]   ;;  %v8521_v16 = vld [vmem:[%s11267_s1 + $0x1784] ss:$16 sps:$4 sm:$0xff]  }
 0x2b4   :  { %5380 = vmatprep.subr.bf16.mxu0 %v8429_v22  ;;  %5913 = vmatprep.subr.bf16.mxu1 %v8432_v23  ;;  %v8524_v22 = vld [vmem:[%s11267_s1 + $0x178c] ss:$16 sps:$4 sm:$0xff]   ;;  %v8519_v23 = vld [vmem:[%s11267_s1 + $0x1780] ss:$16 sps:$4 sm:$0xff]  }
 0x2b7   :  { %5381 = vmatpush1.bf16.msra.mxu0 %v8427_v18  ;;  %5914 = vmatpush1.bf16.msra.mxu1 %v8430_v25  ;;  %v8522_v18 = vld [vmem:[%s11267_s1 + $0x1788] ss:$16 sps:$4 sm:$0xff]   ;;  %v8527_v25 = vld [vmem:[%s11267_s1 + $0x17a4] ss:$16 sps:$4 sm:$0xff]  }
 0x2b8   :  { %5382 = vmatprep.subr.bf16.mxu0 %v8435_v26  ;;  %5915 = vmatprep.subr.bf16.mxu1 %v8438_v27  ;;  %v8530_v26 = vld [vmem:[%s11267_s1 + $0x17ac] ss:$16 sps:$4 sm:$0xff]   ;;  %v8525_v27 = vld [vmem:[%s11267_s1 + $0x17a0] ss:$16 sps:$4 sm:$0xff]  }
 0x2bb   :  { %5383 = vmatpush1.bf16.msra.mxu0 %v8433_v28  ;;  %5916 = vmatpush1.bf16.msra.mxu1 %v8436_v29  ;;  %v8528_v28 = vld [vmem:[%s11267_s1 + $0x17a8] ss:$16 sps:$4 sm:$0xff]   ;;  %v8533_v29 = vld [vmem:[%s11267_s1 + $0x17c4] ss:$16 sps:$4 sm:$0xff]  }
 0x2bc   :  { %5384 = vmatprep.subr.bf16.mxu0 %v8441_v24  ;;  %5917 = vmatprep.subr.bf16.mxu1 %v8444_v31  ;;  %v8536_v24 = vld [vmem:[%s11267_s1 + $0x17cc] ss:$16 sps:$4 sm:$0xff]   ;;  %v8531_v31 = vld [vmem:[%s11267_s1 + $0x17c0] ss:$16 sps:$4 sm:$0xff]  }
 0x2bf   :  { %5385 = vmatpush1.bf16.msra.mxu0 %v8439_v32  ;;  %5918 = vmatpush1.bf16.msra.mxu1 %v8442_v21  ;;  %v8534_v32 = vld [vmem:[%s11267_s1 + $0x17c8] ss:$16 sps:$4 sm:$0xff]   ;;  %v8539_v21 = vld [vmem:[%s11267_s1 + $0x17e4] ss:$16 sps:$4 sm:$0xff]  }
 0x2c0   :  { %5395 = vmatprep.subr.bf16.mxu0 %v8449_v34  ;;  %5928 = vmatprep.subr.bf16.mxu1 %v8452_v35  ;;  %v8542_v34 = vld [vmem:[%s11267_s1 + $0x17ec] ss:$16 sps:$4 sm:$0xff]   ;;  %v8537_v35 = vld [vmem:[%s11267_s1 + $0x17e0] ss:$16 sps:$4 sm:$0xff]  }
 0x2c2   :  { %5387 = vmatmul.mubr.bf16.vlgmr.msra.gmra.mrb[0].mxu0 %v6386_v38  ;;  %5920 = vmatmul.mubr.bf16.vlgmr.msra.gmra.mrb[0].mxu1 %v6386_v38  ;;  %v8550_v38 = vld [vmem:[%s11267_s1 + $0x180c] ss:$16 sps:$4 sm:$0xff]  }
 0x2c3   :  { %5396 = vmatpush1.bf16.msra.mxu0 %v8447_v36  ;;  %5929 = vmatpush1.bf16.msra.mxu1 %v8450_v37  ;;  %v8540_v36 = vld [vmem:[%s11267_s1 + $0x17e8] ss:$16 sps:$4 sm:$0xff]   ;;  %v8547_v37 = vld [vmem:[%s11267_s1 + $0x1804] ss:$16 sps:$4 sm:$0xff]  }
 0x2c4   :  { %5397 = vmatprep.subr.bf16.mxu0 %v8455_v39  ;;  %5930 = vmatprep.subr.bf16.mxu1 %v8458_v40  ;;  %v6388_v39 = vcombine.low %v10869_v30, %v10869_v30  ;;  %v8545_v40 = vld [vmem:[%s11267_s1 + $0x1800] ss:$16 sps:$4 sm:$0xff]   ;;  %v8556_v30 = vld [vmem:[%s11267_s1 + $0x182c] ss:$16 sps:$4 sm:$0xff]  }
 0x2c5   :  { %5427 = vmatprep.mubr.bf16.mxu0 %v6389_v41  ;;  %5960 = vmatprep.mubr.bf16.mxu1 %v6389_v41  ;;  %v8548_v41 = vld [vmem:[%s11267_s1 + $0x1808] ss:$16 sps:$4 sm:$0xff]  }
 0x2c7   :  { %5398 = vmatpush1.bf16.msra.mxu0 %v8453_v33  ;;  %5931 = vmatpush1.bf16.msra.mxu1 %v8456_v42  ;;  %v8553_v33 = vld [vmem:[%s11267_s1 + $0x1824] ss:$16 sps:$4 sm:$0xff]   ;;  %v8551_v42 = vld [vmem:[%s11267_s1 + $0x1820] ss:$16 sps:$4 sm:$0xff]  }
 0x2c8   :  { %5399 = vmatprep.subr.bf16.mxu0 %v8461_v43  ;;  %5932 = vmatprep.subr.bf16.mxu1 %v8464_v44  ;;  %v8554_v43 = vld [vmem:[%s11267_s1 + $0x1828] ss:$16 sps:$4 sm:$0xff]   ;;  %v8559_v44 = vld [vmem:[%s11267_s1 + $0x1844] ss:$16 sps:$4 sm:$0xff]  }
 0x2cb   :  { %5400 = vmatpush1.bf16.msra.mxu0 %v8459_v45  ;;  %5933 = vmatpush1.bf16.msra.mxu1 %v8462_v46  ;;  %v8562_v45 = vld [vmem:[%s11267_s1 + $0x184c] ss:$16 sps:$4 sm:$0xff]   ;;  %v8626_v46 = vmov 0  }
 0x2cc   :  { %5401 = vmatprep.subr.bf16.mxu0 %v8467_v47  ;;  %5934 = vmatprep.subr.bf16.mxu1 %v8470_v48  ;;  %v8557_v47 = vld [vmem:[%s11267_s1 + $0x1840] ss:$16 sps:$4 sm:$0xff]   ;;  %v8560_v48 = vld [vmem:[%s11267_s1 + $0x1848] ss:$16 sps:$4 sm:$0xff]  }
 0x2cf   :  { %5402 = vmatpush1.bf16.msra.mxu0 %v8465_v49  ;;  %5935 = vmatpush1.bf16.msra.mxu1 %v8468_v50  ;;  %v8565_v49 = vld [vmem:[%s11267_s1 + $0x1864] ss:$16 sps:$4 sm:$0xff]   ;;  %v8568_v50 = vld [vmem:[%s11267_s1 + $0x186c] ss:$16 sps:$4 sm:$0xff]  }
 0x2d0   :  { %5403 = vmatprep.subr.bf16.mxu0 %v8473_v51  ;;  %5936 = vmatprep.subr.bf16.mxu1 %v8476_v52  ;;  %v8563_v51 = vld [vmem:[%s11267_s1 + $0x1860] ss:$16 sps:$4 sm:$0xff]   ;;  %v8566_v52 = vld [vmem:[%s11267_s1 + $0x1868] ss:$16 sps:$4 sm:$0xff]  }
 0x2d3   :  { %5404 = vmatpush1.bf16.msra.mxu0 %v8471_v53  ;;  %5937 = vmatpush1.bf16.msra.mxu1 %v8474_v54  ;;  %v8571_v53 = vld [vmem:[%s11267_s1 + $0x1884] ss:$16 sps:$4 sm:$0xff]   ;;  %v8574_v54 = vld [vmem:[%s11267_s1 + $0x188c] ss:$16 sps:$4 sm:$0xff]  }
 0x2d4   :  { %5405 = vmatprep.subr.bf16.mxu0 %v8479_v55  ;;  %5938 = vmatprep.subr.bf16.mxu1 %v8482_v56  ;;  %v8569_v55 = vld [vmem:[%s11267_s1 + $0x1880] ss:$16 sps:$4 sm:$0xff]   ;;  %v8572_v56 = vld [vmem:[%s11267_s1 + $0x1888] ss:$16 sps:$4 sm:$0xff]  }
 0x2d7   :  { %5406 = vmatpush1.bf16.msra.mxu0 %v8477_v57  ;;  %5939 = vmatpush1.bf16.msra.mxu1 %v8480_v58  ;;  %v8577_v57 = vld [vmem:[%s11267_s1 + $0x18a4] ss:$16 sps:$4 sm:$0xff]   ;;  %v8580_v58 = vld [vmem:[%s11267_s1 + $0x18ac] ss:$16 sps:$4 sm:$0xff]  }
 0x2d8   :  { %5407 = vmatprep.subr.bf16.mxu0 %v8485_v59  ;;  %5940 = vmatprep.subr.bf16.mxu1 %v8488_v60  ;;  %v8575_v59 = vld [vmem:[%s11267_s1 + $0x18a0] ss:$16 sps:$4 sm:$0xff]   ;;  %v8578_v60 = vld [vmem:[%s11267_s1 + $0x18a8] ss:$16 sps:$4 sm:$0xff]  }
 0x2db   :  { %5408 = vmatpush1.bf16.msra.mxu0 %v8483_v61  ;;  %5941 = vmatpush1.bf16.msra.mxu1 %v8486_v62  ;;  %v8583_v61 = vld [vmem:[%s11267_s1 + $0x18c4] ss:$16 sps:$4 sm:$0xff]   ;;  %v8586_v62 = vld [vmem:[%s11267_s1 + $0x18cc] ss:$16 sps:$4 sm:$0xff]  }
 0x2dc   :  { %5409 = vmatprep.subr.bf16.mxu0 %v8491_v63  ;;  %5942 = vmatprep.subr.bf16.mxu1 %v8494_v0  ;;  %v8581_v63 = vld [vmem:[%s11267_s1 + $0x18c0] ss:$16 sps:$4 sm:$0xff]   ;;  %v8584_v0 = vld [vmem:[%s11267_s1 + $0x18c8] ss:$16 sps:$4 sm:$0xff]  }
 0x2df   :  { %5410 = vmatpush1.bf16.msra.mxu0 %v8489_v1  ;;  %5943 = vmatpush1.bf16.msra.mxu1 %v8492_v2  ;;  %v8589_v1 = vld [vmem:[%s11267_s1 + $0x18e4] ss:$16 sps:$4 sm:$0xff]   ;;  %v8592_v2 = vld [vmem:[%s11267_s1 + $0x18ec] ss:$16 sps:$4 sm:$0xff]  }
 0x2e0   :  { %5411 = vmatprep.subr.bf16.mxu0 %v8497_v3  ;;  %5944 = vmatprep.subr.bf16.mxu1 %v8500_v4  ;;  %v8587_v3 = vld [vmem:[%s11267_s1 + $0x18e0] ss:$16 sps:$4 sm:$0xff]   ;;  %v8590_v4 = vld [vmem:[%s11267_s1 + $0x18e8] ss:$16 sps:$4 sm:$0xff]  }
 0x2e3   :  { %5412 = vmatpush1.bf16.msra.mxu0 %v8495_v5  ;;  %5945 = vmatpush1.bf16.msra.mxu1 %v8498_v6  ;;  %v8594_v5 = vld [vmem:[%s11269_s3 + $0x40] sm:$0xff]  }
 0x2e4   :  { %5413 = vmatprep.subr.bf16.mxu0 %v8503_v7  ;;  %5946 = vmatprep.subr.bf16.mxu1 %v8506_v8  ;;  %v8595_v6 = vld [vmem:[%s11269_s3 + $0xc0] sm:$0xff]  }
 0x2e5   :  { %v8593_v7 = vld [vmem:[%s11268_s0 + $0x60] ss:$0 sps:$4 sm:$0xff]  }
 0x2e6   :  { %v8596_v8 = vld [vmem:[%s11269_s3] sm:$0xff]  }
 0x2e7   :  { %5414 = vmatpush1.bf16.msra.mxu0 %v8501_v9  ;;  %5947 = vmatpush1.bf16.msra.mxu1 %v8504_v10  ;;  %v8597_v9 = vld [vmem:[%s11269_s3 + $0x80] sm:$0xff]   ;;  %v8598_v10 = vld [vmem:[%s11269_s3 + $0x48] sm:$0xff]  }
 0x2e8   :  { %5415 = vmatprep.subr.bf16.mxu0 %v8509_v12  ;;  %5948 = vmatprep.subr.bf16.mxu1 %v8512_v13  ;;  %v8599_v12 = vld [vmem:[%s11269_s3 + $0xc8] sm:$0xff]  }
 0x2e9   :  { %v8600_v13 = vld [vmem:[%s11269_s3 + $0x8] sm:$0xff]  }
 0x2eb   :  { %5416 = vmatpush1.bf16.msra.mxu0 %v8507_v15  ;;  %5949 = vmatpush1.bf16.msra.mxu1 %v8510_v11  ;;  %v8601_v15 = vld [vmem:[%s11269_s3 + $0x88] sm:$0xff]   ;;  %v8602_v11 = vld [vmem:[%s11269_s3 + $0x50] sm:$0xff]  }
 0x2ec   :  { %5417 = vmatprep.subr.bf16.mxu0 %v8515_v17  ;;  %5950 = vmatprep.subr.bf16.mxu1 %v8518_v14  ;;  %v8603_v17 = vld [vmem:[%s11269_s3 + $0xd0] sm:$0xff]  }
 0x2ed   :  { %v8604_v14 = vld [vmem:[%s11269_s3 + $0x10] sm:$0xff]  }
 0x2ef   :  { %5418 = vmatpush1.bf16.msra.mxu0 %v8513_v19  ;;  %5951 = vmatpush1.bf16.msra.mxu1 %v8516_v20  ;;  %v8605_v19 = vld [vmem:[%s11269_s3 + $0x90] sm:$0xff]   ;;  %v8606_v20 = vld [vmem:[%s11269_s3 + $0x58] sm:$0xff]  }
 0x2f0   :  { %5419 = vmatprep.subr.bf16.mxu0 %v8521_v16  ;;  %5952 = vmatprep.subr.bf16.mxu1 %v8524_v22  ;;  %v8607_v16 = vld [vmem:[%s11269_s3 + $0xd8] sm:$0xff]  }
 0x2f1   :  { %v8608_v22 = vld [vmem:[%s11269_s3 + $0x18] sm:$0xff]  }
 0x2f3   :  { %5420 = vmatpush1.bf16.msra.mxu0 %v8519_v23  ;;  %5953 = vmatpush1.bf16.msra.mxu1 %v8522_v18  ;;  %v8609_v23 = vld [vmem:[%s11269_s3 + $0x98] sm:$0xff]   ;;  %v8610_v18 = vld [vmem:[%s11269_s3 + $0x60] sm:$0xff]  }
 0x2f4   :  { %5421 = vmatprep.subr.bf16.mxu0 %v8527_v25  ;;  %5954 = vmatprep.subr.bf16.mxu1 %v8530_v26  ;;  %v8611_v25 = vld [vmem:[%s11269_s3 + $0xe0] sm:$0xff]  }
 0x2f5   :  { %v8612_v26 = vld [vmem:[%s11269_s3 + $0x20] sm:$0xff]  }
 0x2f7   :  { %5422 = vmatpush1.bf16.msra.mxu0 %v8525_v27  ;;  %5955 = vmatpush1.bf16.msra.mxu1 %v8528_v28  ;;  %v8613_v27 = vld [vmem:[%s11269_s3 + $0xa0] sm:$0xff]   ;;  %v8614_v28 = vld [vmem:[%s11269_s3 + $0x68] sm:$0xff]  }
 0x2f8   :  { %5423 = vmatprep.subr.bf16.mxu0 %v8533_v29  ;;  %5956 = vmatprep.subr.bf16.mxu1 %v8536_v24  ;;  %v8615_v29 = vld [vmem:[%s11269_s3 + $0xe8] sm:$0xff]  }
 0x2f9   :  { %v8616_v24 = vld [vmem:[%s11269_s3 + $0x28] sm:$0xff]  }
 0x2fb   :  { %5424 = vmatpush1.bf16.msra.mxu0 %v8531_v31  ;;  %5957 = vmatpush1.bf16.msra.mxu1 %v8534_v32  ;;  %v8617_v31 = vld [vmem:[%s11269_s3 + $0xa8] sm:$0xff]   ;;  %v8618_v32 = vld [vmem:[%s11269_s3 + $0x70] sm:$0xff]  }
 0x2fc   :  { %5425 = vmatprep.subr.bf16.mxu0 %v8539_v21  ;;  %5958 = vmatprep.subr.bf16.mxu1 %v8542_v34  ;;  %v8619_v21 = vld [vmem:[%s11269_s3 + $0xf0] sm:$0xff]  }
 0x2fd   :  { %v8620_v34 = vld [vmem:[%s11269_s3 + $0x30] sm:$0xff]  }
 0x2ff   :  { %5426 = vmatpush1.bf16.msra.mxu0 %v8537_v35  ;;  %5959 = vmatpush1.bf16.msra.mxu1 %v8540_v36  ;;  %v8621_v35 = vld [vmem:[%s11269_s3 + $0xb0] sm:$0xff]   ;;  %v8622_v36 = vld [vmem:[%s11269_s3 + $0x78] sm:$0xff]  }
 0x300   :  { %5436 = vmatprep.subr.bf16.mxu0 %v8547_v37  ;;  %5969 = vmatprep.subr.bf16.mxu1 %v8550_v38  ;;  %v8623_v37 = vld [vmem:[%s11269_s3 + $0xf8] sm:$0xff]  }
 0x301   :  { %v8624_v38 = vld [vmem:[%s11269_s3 + $0x38] sm:$0xff]  }
 0x302   :  { %5428 = vmatmul.mubr.bf16.vlgmr.msra.gmra.mrb[0].mxu0 %v6388_v39  ;;  %5961 = vmatmul.mubr.bf16.vlgmr.msra.gmra.mrb[0].mxu1 %v6388_v39  ;;  %v8625_v39 = vld [vmem:[%s11269_s3 + $0xb8] sm:$0xff]  }
 0x303   :  { %5437 = vmatpush1.bf16.msra.mxu0 %v8545_v40  ;;  %5970 = vmatpush1.bf16.msra.mxu1 %v8548_v41  ;;  %v836_v40 = vlaneseq }
 0x304   :  { %5438 = vmatprep.subr.bf16.mxu0 %v8553_v33  ;;  %5971 = vmatprep.subr.bf16.mxu1 %v8556_v30 }
 0x305   :  { %5468 = vmatprep.mubr.bf16.mxu0 %v8626_v46  ;;  %6001 = vmatprep.mubr.bf16.mxu1 %v8626_v46  ;;  %v837_v41 = vshrl.u32 %v836_v40, 7 }
 0x307   :  { %5439 = vmatpush1.bf16.msra.mxu0 %v8551_v42  ;;  %5972 = vmatpush1.bf16.msra.mxu1 %v8554_v43  ;;  %v838_v33 = vsub.s32 0, %v837_v41  ;;  %v846_v30 = vsub.s32 2, %v837_v41  ;;  %v834_v42 = vld [vmem:[%s11270_s2] sm:$0xf]  ;;  %v842_v43 = vsub.s32 1, %v837_v41 }
 0x308   :  { %5440 = vmatprep.subr.bf16.mxu0 %v8559_v44  ;;  %5973 = vmatprep.subr.bf16.mxu1 %v8562_v45  ;;  %v850_v44 = vsub.s32 3, %v837_v41 }
 0x309   :  { %v839_v45 = vrot.slane %v834_v42, %v838_v33  ;;  %v847_v46 = vrot.slane %v834_v42, %v846_v30 }
 0x30b   :  { %5441 = vmatpush1.bf16.msra.mxu0 %v8557_v47  ;;  %5974 = vmatpush1.bf16.msra.mxu1 %v8560_v48  ;;  %v843_v47 = vrot.slane %v834_v42, %v842_v43  ;;  %v851_v48 = vrot.slane %v834_v42, %v850_v44 }
 0x30c   :  { %5442 = vmatprep.subr.bf16.mxu0 %v8565_v49  ;;  %5975 = vmatprep.subr.bf16.mxu1 %v8568_v50 }
 0x30f   :  { %5443 = vmatpush1.bf16.msra.mxu0 %v8563_v51  ;;  %5976 = vmatpush1.bf16.msra.mxu1 %v8566_v52 }
 0x310   :  { %5444 = vmatprep.subr.bf16.mxu0 %v8571_v53  ;;  %5977 = vmatprep.subr.bf16.mxu1 %v8574_v54 }
 0x313   :  { %5445 = vmatpush1.bf16.msra.mxu0 %v8569_v55  ;;  %5978 = vmatpush1.bf16.msra.mxu1 %v8572_v56 }
 0x314   :  { %5446 = vmatprep.subr.bf16.mxu0 %v8577_v57  ;;  %5979 = vmatprep.subr.bf16.mxu1 %v8580_v58 }
 0x317   :  { %5447 = vmatpush1.bf16.msra.mxu0 %v8575_v59  ;;  %5980 = vmatpush1.bf16.msra.mxu1 %v8578_v60 }
 0x318   :  { %5448 = vmatprep.subr.bf16.mxu0 %v8583_v61  ;;  %5981 = vmatprep.subr.bf16.mxu1 %v8586_v62 }
 0x31b   :  { %5449 = vmatpush1.bf16.msra.mxu0 %v8581_v63  ;;  %5982 = vmatpush1.bf16.msra.mxu1 %v8584_v0 }
 0x31c   :  { %5450 = vmatprep.subr.bf16.mxu0 %v8589_v1  ;;  %5983 = vmatprep.subr.bf16.mxu1 %v8592_v2 }
 0x31f   :  { %5451 = vmatpush1.bf16.msra.mxu0 %v8587_v3  ;;  %5984 = vmatpush1.bf16.msra.mxu1 %v8590_v4 }
 0x320   :  { %7224 = vmatprep.subr.bf16.mxu0 %v8594_v5  ;;  %7246 = vmatprep.subr.bf16.mxu1 %v8595_v6 }
 0x322   :  { %5469 = vmatmul.mubr.bf16.vlgmr.msra.gmra.mrb[0].mxu0 %v8593_v7  ;;  %6002 = vmatmul.mubr.bf16.vlgmr.msra.gmra.mrb[0].mxu1 %v8593_v7  ;;  %v7191_v7 = vld [vmem:[%s11271_s4] ss:$0 sm:$0xff] }
 0x323   :  { %7225 = vmatpush3.bf16.msra.mxu0 %v8596_v8  ;;  %7247 = vmatpush3.bf16.msra.mxu1 %v8597_v9 }
 0x324   :  { %7226 = vmatprep.subr.bf16.mxu0 %v8598_v10  ;;  %7248 = vmatprep.subr.bf16.mxu1 %v8599_v12 }
 0x327   :  { %7227 = vmatpush3.bf16.msra.mxu0 %v8600_v13  ;;  %7249 = vmatpush3.bf16.msra.mxu1 %v8601_v15 }
 0x328   :  { %7228 = vmatprep.subr.bf16.mxu0 %v8602_v11  ;;  %7250 = vmatprep.subr.bf16.mxu1 %v8603_v17 }
 0x32b   :  { %7229 = vmatpush3.bf16.msra.mxu0 %v8604_v14  ;;  %7251 = vmatpush3.bf16.msra.mxu1 %v8605_v19 }
 0x32c   :  { %7230 = vmatprep.subr.bf16.mxu0 %v8606_v20  ;;  %7252 = vmatprep.subr.bf16.mxu1 %v8607_v16 }
 0x32f   :  { %7231 = vmatpush3.bf16.msra.mxu0 %v8608_v22  ;;  %7253 = vmatpush3.bf16.msra.mxu1 %v8609_v23 }
 0x330   :  { %7232 = vmatprep.subr.bf16.mxu0 %v8610_v18  ;;  %7254 = vmatprep.subr.bf16.mxu1 %v8611_v25 }
 0x333   :  { %7233 = vmatpush3.bf16.msra.mxu0 %v8612_v26  ;;  %7255 = vmatpush3.bf16.msra.mxu1 %v8613_v27 }
 0x334   :  { %7234 = vmatprep.subr.bf16.mxu0 %v8614_v28  ;;  %7256 = vmatprep.subr.bf16.mxu1 %v8615_v29 }
 0x337   :  { %7235 = vmatpush3.bf16.msra.mxu0 %v8616_v24  ;;  %7257 = vmatpush3.bf16.msra.mxu1 %v8617_v31 }
 0x338   :  { %7236 = vmatprep.subr.bf16.mxu0 %v8618_v32  ;;  %7258 = vmatprep.subr.bf16.mxu1 %v8619_v21 }
 0x33b   :  { %7237 = vmatpush3.bf16.msra.mxu0 %v8620_v34  ;;  %7259 = vmatpush3.bf16.msra.mxu1 %v8621_v35 }
 0x33c   :  { %7238 = vmatprep.subr.bf16.mxu0 %v8622_v36  ;;  %7260 = vmatprep.subr.bf16.mxu1 %v8623_v37 }
 0x33f   :  { %7239 = vmatpush3.bf16.msra.mxu0 %v8624_v38  ;;  %7261 = vmatpush3.bf16.msra.mxu1 %v8625_v39 }
 0x3f5   :  { %v5470_v49 = vpop.f32.mrb[0].mxu0  ;;  %v6003_v50 = vpop.f32.mrb[0].mxu1 }
 0x3f6   :  { %v7268_v51 = vadd.f32 %v5470_v49, %v839_v45  ;;  %v7270_v52 = vadd.f32 %v6003_v50, %v847_v46  ;;  %v5472_v53 = vpop.f32.mrb[1].mxu0  ;;  %v6005_v54 = vpop.f32.mrb[1].mxu1 }
 0x3f7   :  { %v7269_v55 = vadd.f32 %v5472_v53, %v843_v47  ;;  %v7271_v56 = vadd.f32 %v6005_v54, %v851_v48  ;;  %v5474_v57 = vpop.f32.mrb[2].mxu0  ;;  %v6007_v58 = vpop.f32.mrb[2].mxu1 }
 0x3f8   :  { %v6010_v59 = vmax.f32 %v7268_v51, 0.0  ;;  %v6012_v60 = vmax.f32 %v7270_v52, 0.0  ;;  %v5475_v61 = vpop.f32.mrb[3].mxu0  ;;  %v6008_v62 = vpop.f32.mrb[3].mxu1 }
 0x3f9   :  { %v6011_v63 = vmax.f32 %v7269_v55, 0.0  ;;  %v6013_v0 = vmax.f32 %v7271_v56, 0.0 }
 0x3fa   :  { %v6014_v3 = vpack.c.bf16 %v6010_v59, %v6010_v59  ;;  %v6016_v4 = vpack.c.bf16 %v6012_v60, %v6012_v60 }
 0x3fb   :  { %v6015_v1 = vpack.c.bf16 %v6011_v63, %v6011_v63  ;;  %v6017_v2 = vpack.c.bf16 %v6013_v0, %v6013_v0 }
 0x3fd   :  { %6313 = vmatprep.mubr.bf16.mxu0 %v6015_v1  ;;  %6353 = vmatprep.mubr.bf16.mxu1 %v6017_v2 }
 0x3fe   :  { %6314 = vmatmul.mubr.bf16.vlgmr.msra.gmra.mrb[4].mxu0 %v6014_v3  ;;  %6354 = vmatmul.mubr.bf16.vlgmr.msra.gmra.mrb[4].mxu1 %v6016_v4 }
 0x4d1   :  { %v7240_v5 = vpop.f32.mrb[4].mxu0  ;;  %v7262_v6 = vpop.f32.mrb[4].mxu1 }
 0x4d2   :  { %v7241_v8 = vpop.f32.mrb[5].mxu0  ;;  %v7263_v9 = vpop.f32.mrb[5].mxu1 }
 0x4d3   :  { %v7242_v10 = vadd.f32 %v7241_v8, %v7240_v5  ;;  %v7264_v12 = vadd.f32 %v7263_v9, %v7262_v6  ;;  %v7243_v13 = vpop.f32.mrb[6].mxu0  ;;  %v7265_v15 = vpop.f32.mrb[6].mxu1 }
 0x4d4   :  { %v7244_v11 = vpop.f32.mrb[7].mxu0  ;;  %v7266_v17 = vpop.f32.mrb[7].mxu1 }
 0x4d5   :  { %v6316_v14 = vadd.f32 %v7242_v10, %v7191_v7 }
 0x4d7   :  { %v6356_v19 = vadd.f32 %v7264_v12, %v6316_v14 }
 0x4d9   :  { %6361 = vst [vmem:[%s11272_s5] sm:$0xff] %v6356_v19 }

</bundles_post_ra>
